<compile_context>
chip_gen: v5e
topology: v5e:2x2
jax: 0.10.0
libtpu: 0.0.40
codegen_flags: <defaults>
</compile_context>

<pallas_src>
import functools
import math

import jax
import jax.numpy as jnp
import numpy as np
from jax.experimental import pallas as pl
from jax.experimental.pallas import tpu as pltpu

F32 = jnp.float32
BF16 = jnp.bfloat16
_VMEM_LIMIT = 32 * 1024 * 1024  # scoped VMEM budget; safe on v5e/v6e/v7x


def _bf16_dot(a, b):
    """MXU matmul: bf16 operands, f32 accumulation."""
    return jnp.dot(a.astype(BF16), b.astype(BF16), preferred_element_type=F32)


def _largest_tile(dim, candidates):
    for c in candidates:
        if c <= dim and dim % c == 0:
            return c
    return dim  # fall back to the full (untiled) dimension


# ------------------------------------------------------------------------
# Fused encoder + LSTM kernel (grid over time chunks, h/c carried in VMEM)
# ------------------------------------------------------------------------
def enc_lstm_kernel(x_emb_ref, x_mask_ref, w_hc_ref, b_hc_ref,
                    y_ref, w_ih_ref, b_ih_ref, w_hh_ref,
                    hid_ref, h_sc, c_sc, *, hidden_size, batch, chunk):
    H, B, TC = hidden_size, batch, chunk

    # ---- fused BOW encoder: runs once (chunk 0), writes h0/c0 into scratch ----
    @pl.when(pl.program_id(0) == 0)
    def _():
        emb = x_emb_ref[...].astype(F32)                    # (B, Tx, E)
        mask = x_mask_ref[...]                              # (B, Tx) f32 {0,1}
        x_sum = jnp.sum(emb * mask[:, :, None], axis=1)     # (B, E)
        # Exact divide kept (single (B,1) op per forward) to preserve parity
        # with the f32 PyTorch reference.  NOTE: an all-padding row gives NaN,
        # exactly like the PyTorch module.
        x_avg = x_sum / jnp.sum(mask, axis=1, keepdims=True)
        hc = _bf16_dot(x_avg, w_hc_ref[...]) + b_hc_ref[...]  # (B, 2H) fused h|c
        h_sc[...] = hc[:, :H]
        c_sc[...] = hc[:, H:]

    # ---- hoisted input projection: one big MXU matmul for the whole chunk ----
    ig = _bf16_dot(y_ref[...], w_ih_ref[...]) + b_ih_ref[...]   # (TC*B, 4H) f32

    # ---- recurrence: only h @ W_hh is serial; static loop = fully unrolled ----
    h = h_sc[...]
    c = c_sc[...]
    w_hh = w_hh_ref[...]
    for i in range(TC):  # TC is a Python int -> all indices/slices are static
        gates = ig[i * B:(i + 1) * B, :] + _bf16_dot(h, w_hh)   # (B, 4H)
        # PyTorch gate (chunk) order: ingate, forgetgate, cellgate, outgate
        i_g = jax.nn.sigmoid(gates[:, 0 * H:1 * H])
        f_g = jax.nn.sigmoid(gates[:, 1 * H:2 * H])
        g_g = jnp.tanh(gates[:, 2 * H:3 * H])
        o_g = jax.nn.sigmoid(gates[:, 3 * H:4 * H])
        c = f_g * c + i_g * g_g
        h = o_g * jnp.tanh(c)
        hid_ref[:, i:i + 1, :] = h[:, None, :]                  # batch-major store
    h_sc[...] = h
    c_sc[...] = c


def enc_lstm_pallas(x_emb, x_mask, w_hc, b_hc, y2d_tm, w_ih, b_ih, w_hh, *,
                    seq_len):
    B, Tx, E = x_emb.shape
    H = w_hh.shape[0]
    T = seq_len
    TC = 8 if T % 8 == 0 else T          # time chunk ((·, 8k, 128)-tileable)
    assert y2d_tm.shape == (T * B, E)
    kernel = functools.partial(enc_lstm_kernel, hidden_size=H, batch=B, chunk=TC)
    return pl.pallas_call(
        kernel,
        out_shape=jax.ShapeDtypeStruct((B, T, H), F32),
        grid=(T // TC,),
        in_specs=[
            pl.BlockSpec((B, Tx, E), lambda t: (0, 0, 0)),     # x embeddings
            pl.BlockSpec((B, Tx), lambda t: (0, 0)),           # x mask
            pl.BlockSpec((E, 2 * H), lambda t: (0, 0)),        # fused h|c weights
            pl.BlockSpec((1, 2 * H), lambda t: (0, 0)),
            pl.BlockSpec((TC * B, E), lambda t: (t, 0)),       # y chunk (streamed)
            pl.BlockSpec((E, 4 * H), lambda t: (0, 0)),        # W_ih
            pl.BlockSpec((1, 4 * H), lambda t: (0, 0)),        # b_ih + b_hh
            pl.BlockSpec((H, 4 * H), lambda t: (0, 0)),        # W_hh
        ],
        out_specs=pl.BlockSpec((B, TC, H), lambda t: (0, t, 0)),
        scratch_shapes=[pltpu.VMEM((B, H), F32),               # carried h
                        pltpu.VMEM((B, H), F32)],              # carried c
        compiler_params=pltpu.CompilerParams(
            dimension_semantics=("arbitrary",),                # sequential recurrence
            vmem_limit_bytes=_VMEM_LIMIT),
    )(x_emb, x_mask, w_hc, b_hc, y2d_tm, w_ih, b_ih, w_hh)


# ------------------------------------------------------------------------
# Decoder pass 1: tiled logits + online (streaming) log-sum-exp over vocab
# ------------------------------------------------------------------------
def decode_logits_kernel(h_ref, w_ref, b_ref, logits_ref, lse_ref, m_sc, l_sc):
    v = pl.program_id(1)

    @pl.when(v == 0)
    def _():
        m_sc[...] = jnp.full(m_sc.shape, -jnp.inf, dtype=F32)
        l_sc[...] = jnp.zeros(l_sc.shape, dtype=F32)

    logits = (jnp.dot(h_ref[...].astype(BF16), w_ref[...],
                      preferred_element_type=F32) + b_ref[...])   # (Nb, Vb) f32
    logits_ref[...] = logits

    # online max / sum-exp across vocab tiles
    m_prev = m_sc[...]
    m_new = jnp.maximum(m_prev, jnp.max(logits, axis=-1, keepdims=True))
    l_sc[...] = (l_sc[...] * jnp.exp(m_prev - m_new)
                 + jnp.sum(jnp.exp(logits - m_new), axis=-1, keepdims=True))
    m_sc[...] = m_new

    @pl.when(v == pl.num_programs(1) - 1)
    def _():
        lse_ref[...] = m_sc[...] + jnp.log(l_sc[...])


# Decoder pass 2: in-place normalization  out = logits - lse  (log_softmax)
def lse_sub_kernel(logits_ref, lse_ref, out_ref):
    out_ref[...] = logits_ref[...] - lse_ref[...]


def decode_pallas(h_flat, w_t, b):
    N, H = h_flat.shape
    V = w_t.shape[1]
    nb = _largest_tile(N, (256, 128, 64, 32, 16, 8))
    vb = _largest_tile(V, (1024, 512, 256, 128))
    grid = (N // nb, V // vb)

    cost = pl.CostEstimate(
        flops=2 * N * H * V,
        transcendentals=N * V,
        bytes_accessed=(N * H * 4 + H * V * w_t.dtype.itemsize + V * 4
                        + N * V * 4 + N * 4))

    logits, lse = pl.pallas_call(
        decode_logits_kernel,
        out_shape=(jax.ShapeDtypeStruct((N, V), F32),
                   jax.ShapeDtypeStruct((N, 1), F32)),
        grid=grid,
        in_specs=[
            pl.BlockSpec((nb, H), lambda n, v: (n, 0)),    # rows (resident per n)
            pl.BlockSpec((H, vb), lambda n, v: (0, v)),    # bf16 weight tiles, streamed
            pl.BlockSpec((1, vb), lambda n, v: (0, v)),
        ],
        out_specs=(pl.BlockSpec((nb, vb), lambda n, v: (n, v)),
                   pl.BlockSpec((nb, 1), lambda n, v: (n, 0))),
        scratch_shapes=[pltpu.VMEM((nb, 1), F32),          # running max
                        pltpu.VMEM((nb, 1), F32)],         # running sum-exp
        compiler_params=pltpu.CompilerParams(
            dimension_semantics=("parallel", "arbitrary"), # rows across TCs (v7x)
            vmem_limit_bytes=_VMEM_LIMIT),
        cost_estimate=cost,
    )(h_flat, w_t, b)

    return pl.pallas_call(
        lse_sub_kernel,
        out_shape=jax.ShapeDtypeStruct((N, V), F32),
        grid=grid,
        in_specs=[pl.BlockSpec((nb, vb), lambda n, v: (n, v)),
                  pl.BlockSpec((nb, 1), lambda n, v: (n, 0))],
        out_specs=pl.BlockSpec((nb, vb), lambda n, v: (n, v)),
        input_output_aliases={0: 0},                       # normalize in place
        compiler_params=pltpu.CompilerParams(
            dimension_semantics=("parallel", "parallel"),
            vmem_limit_bytes=_VMEM_LIMIT),
    )(logits, lse)


# ------------------------------------------------------------------------
# Parameters (torch-style init) and model forward (Pallas hot path)
# ------------------------------------------------------------------------
def init_params(key, vocab_size, embedding_size, hidden_size):
    ks = jax.random.split(key, 8)
    E, H, V = embedding_size, hidden_size, vocab_size
    stdv = 1.0 / math.sqrt(H)
    u = lambda k, shape, a: jax.random.uniform(k, shape, F32, -a, a)
    return {
        # bf16 weights feed the MXU; biases / cell state / accumulation stay f32.
        "embed": u(ks[0], (V, E), 0.1).astype(BF16),
        # encoder h/c projections fused into one (E, 2H) matmul, pre-transposed
        "w_hc": jnp.concatenate([u(ks[1], (E, H), 0.1),
                                 u(ks[2], (E, H), 0.1)], axis=1).astype(BF16),
        "b_hc": jnp.zeros((1, 2 * H), F32),
        # LSTM weights pre-transposed (in, 4H); torch's two biases are summed.
        "w_ih": u(ks[3], (E, 4 * H), stdv).astype(BF16),
        "w_hh": u(ks[4], (H, 4 * H), stdv).astype(BF16),
        "b_ih": u(ks[5], (1, 4 * H), stdv) + u(ks[6], (1, 4 * H), stdv),
        # output projection
        "out_w": u(ks[7], (H, V), 0.1).astype(BF16),
        "out_b": jnp.zeros((1, V), F32),
    }


def forward(params, x, x_mask, y, hidden):
    # `hidden` accepted for API parity with the torch module; encode() overwrites it.
    del hidden
    embed = params["embed"]
    x_emb = embed[x]                  # (B, Tx, E) bf16 gather (XLA glue)
    y_emb_tm = embed[y.T]             # (Ty, B, E): time-major gather, no transpose op
    Ty, B, E = y_emb_tm.shape
    hiddens = enc_lstm_pallas(
        x_emb, x_mask, params["w_hc"], params["b_hc"],
        y_emb_tm.reshape(Ty * B, E), params["w_ih"], params["b_ih"],
        params["w_hh"], seq_len=Ty)                       # (B, Ty, H) f32
    H = hiddens.shape[-1]
    decoded = decode_pallas(hiddens.reshape(B * Ty, H),   # free (contiguous) reshape
                            params["out_w"], params["out_b"])
    return decoded.reshape(B, Ty, -1), hiddens


# ------------------------------------------------------------------------
# Pure-JAX reference (mirrors the same bf16-operand / f32-accumulate math)
# ------------------------------------------------------------------------
def forward_ref(params, x, x_mask, y):
    dot = lambda a, b: jnp.dot(a.astype(BF16), b.astype(BF16),
                               preferred_element_type=F32)
    H = params["w_hh"].shape[0]
    x_emb = params["embed"][x].astype(F32) * x_mask[:, :, None]
    x_avg = x_emb.sum(1) / x_mask.sum(1, keepdims=True)
    hc = dot(x_avg, params["w_hc"]) + params["b_hc"]
    h, c = hc[:, :H], hc[:, H:]
    y_emb = params["embed"][y]
    hs = []
    for t in range(y.shape[1]):
        gates = dot(y_emb[:, t], params["w_ih"]) + params["b_ih"] + dot(h, params["w_hh"])
        i_g = jax.nn.sigmoid(gates[:, :H])
        f_g = jax.nn.sigmoid(gates[:, H:2 * H])
        g_g = jnp.tanh(gates[:, 2 * H:3 * H])
        o_g = jax.nn.sigmoid(gates[:, 3 * H:])
        c = f_g * c + i_g * g_g
        h = o_g * jnp.tanh(c)
        hs.append(h)
    hiddens = jnp.stack(hs, 1)
    logits = dot(hiddens.reshape(-1, H), params["out_w"]) + params["out_b"]
    decoded = jax.nn.log_softmax(logits, axis=-1)
    return decoded.reshape(hiddens.shape[0], hiddens.shape[1], -1), hiddens


if __name__ == "__main__":
    # Lane-aligned small shapes (E = H = 128) per the perf review.
    B, Tx, Ty = 4, 8, 24
    VOCAB, EMB, HID = 1024, 128, 128

    key = jax.random.PRNGKey(0)
    kp, kx, ky = jax.random.split(key, 3)
    params = init_params(kp, VOCAB, EMB, HID)

    x = jax.random.randint(kx, (B, Tx), 0, VOCAB, dtype=jnp.int32)
    y = jax.random.randint(ky, (B, Ty), 0, VOCAB, dtype=jnp.int32)
    lengths = jnp.array([Tx, Tx - 3, Tx - 1, 2], jnp.int32)
    x_mask = (jnp.arange(Tx)[None, :] < lengths[:, None]).astype(F32)
    hidden0 = (jnp.zeros((B, HID), F32), jnp.zeros((B, HID), F32))

    fwd = jax.jit(forward)
    decoded, hiddens = fwd(params, x, x_mask, y, hidden0)
    jax.block_until_ready((decoded, hiddens))

    dec_r, hid_r = forward_ref(params, x, x_mask, y)
    # Tolerances account for bf16 operand rounding interacting with tiny f32
    # accumulation-order differences; real bugs are orders of magnitude larger.
    np.testing.assert_allclose(np.asarray(hiddens), np.asarray(hid_r),
                               rtol=1e-3, atol=1e-3)
    np.testing.assert_allclose(np.asarray(decoded), np.asarray(dec_r),
                               rtol=1e-3, atol=3e-3)

    assert decoded.shape == (B, Ty, VOCAB) and hiddens.shape == (B, Ty, HID)
    print("KERNEL_OK")
</pallas_src>

<mosaic_0001>
module attributes {stable_mosaic.version = 11 : i64} {
  func.func @decode_logits_kernel(%arg0: i32, %arg1: i32, %arg2: memref<32x128xf32, #tpu.memory_space<vmem>>, %arg3: memref<128x1024xbf16, #tpu.memory_space<vmem>>, %arg4: memref<1x1024xf32, #tpu.memory_space<vmem>>, %arg5: memref<32x1024xf32, #tpu.memory_space<vmem>>, %arg6: memref<32x1xf32, #tpu.memory_space<vmem>>, %arg7: memref<32x1xf32, #tpu.memory_space<vmem>>, %arg8: memref<32x1xf32, #tpu.memory_space<vmem>>) attributes {dimension_semantics = [#tpu.dimension_semantics<parallel>, #tpu.dimension_semantics<arbitrary>], iteration_bounds = array<i64: 3, 1>, scalar_prefetch = 0 : i64, scratch_operands = 2 : i64, tpu.core_type = #tpu.core_type<tc>, window_params = [{transform_indices = @transform_0, window_bounds = array<i64: 32, 128>}, {transform_indices = @transform_1, window_bounds = array<i64: 128, 1024>}, {transform_indices = @transform_2, window_bounds = array<i64: 1, 1024>}, {transform_indices = @transform_3, window_bounds = array<i64: 32, 1024>}, {transform_indices = @transform_4, window_bounds = array<i64: 32, 1>}]} {
    %c0_i32 = arith.constant 0 : i32
    %0 = arith.cmpi eq, %arg1, %c0_i32 : i32
    %1 = arith.extui %0 : i1 to i32
    %c0_i32_0 = arith.constant 0 : i32
    %2 = arith.cmpi ne, %1, %c0_i32_0 : i32
    scf.if %2 {
      %cst_20 = arith.constant 0xFF800000 : f32
      %30 = vector.broadcast %cst_20 : f32 to vector<32x1xf32>
      %c0_21 = arith.constant 0 : index
      %c0_22 = arith.constant 0 : index
      %31 = vector.load %arg7[%c0_21, %c0_22] : memref<32x1xf32, #tpu.memory_space<vmem>>, vector<32x1xf32>
      tpu.vector_store %arg7[%c0_21, %c0_22], %30 {strides = array<i32>} : memref<32x1xf32, #tpu.memory_space<vmem>>, vector<32x1xf32>,
      %cst_23 = arith.constant 0.000000e+00 : f32
      %32 = vector.broadcast %cst_23 : f32 to vector<32x1xf32>
      %c0_24 = arith.constant 0 : index
      %c0_25 = arith.constant 0 : index
      %33 = vector.load %arg8[%c0_24, %c0_25] : memref<32x1xf32, #tpu.memory_space<vmem>>, vector<32x1xf32>
      tpu.vector_store %arg8[%c0_24, %c0_25], %32 {strides = array<i32>} : memref<32x1xf32, #tpu.memory_space<vmem>>, vector<32x1xf32>,
    } else {
    }
    %c0 = arith.constant 0 : index
    %c0_1 = arith.constant 0 : index
    %3 = vector.load %arg2[%c0, %c0_1] : memref<32x128xf32, #tpu.memory_space<vmem>>, vector<32x128xf32>
    %4 = arith.truncf %3 : vector<32x128xf32> to vector<32x128xbf16>
    %c0_2 = arith.constant 0 : index
    %c0_3 = arith.constant 0 : index
    %5 = vector.load %arg3[%c0_2, %c0_3] : memref<128x1024xbf16, #tpu.memory_space<vmem>>, vector<128x1024xbf16>
    %cst = arith.constant dense<0.000000e+00> : vector<32x1024xf32>
    %6 = tpu.matmul %4, %5, %cst {dimension_numbers = #tpu.dot_dimension_numbers<[1], [0], [0], [1], [0, 0, 1, 1], [], []>} : vector<32x128xbf16>, vector<128x1024xbf16>, vector<32x1024xf32> -> vector<32x1024xf32>
    %c0_4 = arith.constant 0 : index
    %c0_5 = arith.constant 0 : index
    %7 = vector.load %arg4[%c0_4, %c0_5] : memref<1x1024xf32, #tpu.memory_space<vmem>>, vector<1x1024xf32>
    %8 = vector.broadcast %7 : vector<1x1024xf32> to vector<32x1024xf32>
    %9 = arith.addf %6, %8 : vector<32x1024xf32>
    %c0_6 = arith.constant 0 : index
    %c0_7 = arith.constant 0 : index
    %10 = vector.load %arg5[%c0_6, %c0_7] : memref<32x1024xf32, #tpu.memory_space<vmem>>, vector<32x1024xf32>
    tpu.vector_store %arg5[%c0_6, %c0_7], %9 {strides = array<i32>} : memref<32x1024xf32, #tpu.memory_space<vmem>>, vector<32x1024xf32>,
    %c0_8 = arith.constant 0 : index
    %c0_9 = arith.constant 0 : index
    %11 = vector.load %arg7[%c0_8, %c0_9] : memref<32x1xf32, #tpu.memory_space<vmem>>, vector<32x1xf32>
    %cst_10 = arith.constant dense<0xFF800000> : vector<32xf32>
    %12 = vector.multi_reduction <maximumf>, %9, %cst_10 [1] : vector<32x1024xf32> to vector<32xf32>
    %13 = vector.shape_cast %12 : vector<32xf32> to vector<32x1xf32>
    %14 = arith.maximumf %11, %13 : vector<32x1xf32>
    %c0_11 = arith.constant 0 : index
    %c0_12 = arith.constant 0 : index
    %15 = vector.load %arg8[%c0_11, %c0_12] : memref<32x1xf32, #tpu.memory_space<vmem>>, vector<32x1xf32>
    %16 = arith.subf %11, %14 : vector<32x1xf32>
    %17 = math.exp %16 : vector<32x1xf32>
    %18 = arith.mulf %15, %17 : vector<32x1xf32>
    %19 = vector.broadcast %14 : vector<32x1xf32> to vector<32x1024xf32>
    %20 = arith.subf %9, %19 : vector<32x1024xf32>
    %21 = math.exp %20 : vector<32x1024xf32>
    %cst_13 = arith.constant dense<0.000000e+00> : vector<32xf32>
    %22 = vector.multi_reduction <add>, %21, %cst_13 [1] : vector<32x1024xf32> to vector<32xf32>
    %23 = vector.shape_cast %22 : vector<32xf32> to vector<32x1xf32>
    %24 = arith.addf %18, %23 : vector<32x1xf32>
    %c0_14 = arith.constant 0 : index
    %c0_15 = arith.constant 0 : index
    %25 = vector.load %arg8[%c0_14, %c0_15] : memref<32x1xf32, #tpu.memory_space<vmem>>, vector<32x1xf32>
    tpu.vector_store %arg8[%c0_14, %c0_15], %24 {strides = array<i32>} : memref<32x1xf32, #tpu.memory_space<vmem>>, vector<32x1xf32>,
    %c0_16 = arith.constant 0 : index
    %c0_17 = arith.constant 0 : index
    %26 = vector.load %arg7[%c0_16, %c0_17] : memref<32x1xf32, #tpu.memory_space<vmem>>, vector<32x1xf32>
    tpu.vector_store %arg7[%c0_16, %c0_17], %14 {strides = array<i32>} : memref<32x1xf32, #tpu.memory_space<vmem>>, vector<32x1xf32>,
    %c0_i32_18 = arith.constant 0 : i32
    %27 = arith.cmpi eq, %arg1, %c0_i32_18 : i32
    %28 = arith.extui %27 : i1 to i32
    %c0_i32_19 = arith.constant 0 : i32
    %29 = arith.cmpi ne, %28, %c0_i32_19 : i32
    scf.if %29 {
      %c0_20 = arith.constant 0 : index
      %c0_21 = arith.constant 0 : index
      %30 = vector.load %arg7[%c0_20, %c0_21] : memref<32x1xf32, #tpu.memory_space<vmem>>, vector<32x1xf32>
      %c0_22 = arith.constant 0 : index
      %c0_23 = arith.constant 0 : index
      %31 = vector.load %arg8[%c0_22, %c0_23] : memref<32x1xf32, #tpu.memory_space<vmem>>, vector<32x1xf32>
      %32 = math.log %31 : vector<32x1xf32>
      %33 = arith.addf %30, %32 : vector<32x1xf32>
      %c0_24 = arith.constant 0 : index
      %c0_25 = arith.constant 0 : index
      %34 = vector.load %arg6[%c0_24, %c0_25] : memref<32x1xf32, #tpu.memory_space<vmem>>, vector<32x1xf32>
      tpu.vector_store %arg6[%c0_24, %c0_25], %33 {strides = array<i32>} : memref<32x1xf32, #tpu.memory_space<vmem>>, vector<32x1xf32>,
    } else {
    }
    return
  }
  func.func @transform_0(%arg0: i32, %arg1: i32) -> (i32, i32) {
    %c0_i32 = arith.constant 0 : i32
    %c0_i32_0 = arith.constant 0 : i32
    return %arg0, %c0_i32 : i32, i32
  }
  func.func @transform_1(%arg0: i32, %arg1: i32) -> (i32, i32) {
    %c0_i32 = arith.constant 0 : i32
    %c0_i32_0 = arith.constant 0 : i32
    return %c0_i32, %arg1 : i32, i32
  }
  func.func @transform_2(%arg0: i32, %arg1: i32) -> (i32, i32) {
    %c0_i32 = arith.constant 0 : i32
    %c0_i32_0 = arith.constant 0 : i32
    return %c0_i32, %arg1 : i32, i32
  }
  func.func @transform_3(%arg0: i32, %arg1: i32) -> (i32, i32) {
    %c0_i32 = arith.constant 0 : i32
    return %arg0, %arg1 : i32, i32
  }
  func.func @transform_4(%arg0: i32, %arg1: i32) -> (i32, i32) {
    %c0_i32 = arith.constant 0 : i32
    %c0_i32_0 = arith.constant 0 : i32
    return %arg0, %c0_i32 : i32, i32
  }
}

module attributes {stable_mosaic.version = 11 : i64} {
  func.func @enc_lstm_kernel(%arg0: i32, %arg1: memref<4x8x128xbf16, #tpu.memory_space<vmem>>, %arg2: memref<4x8xf32, #tpu.memory_space<vmem>>, %arg3: memref<128x256xbf16, #tpu.memory_space<vmem>>, %arg4: memref<1x256xf32, #tpu.memory_space<vmem>>, %arg5: memref<32x128xbf16, #tpu.memory_space<vmem>>, %arg6: memref<128x512xbf16, #tpu.memory_space<vmem>>, %arg7: memref<1x512xf32, #tpu.memory_space<vmem>>, %arg8: memref<128x512xbf16, #tpu.memory_space<vmem>>, %arg9: memref<4x8x128xf32, #tpu.memory_space<vmem>>, %arg10: memref<4x128xf32, #tpu.memory_space<vmem>>, %arg11: memref<4x128xf32, #tpu.memory_space<vmem>>) attributes {dimension_semantics = [#tpu.dimension_semantics<arbitrary>], iteration_bounds = array<i64: 3>, scalar_prefetch = 0 : i64, scratch_operands = 2 : i64, tpu.core_type = #tpu.core_type<tc>, window_params = [{pipeline_mode = #tpu.pipeline_mode<synchronous>, transform_indices = @transform_0, window_bounds = array<i64: 4, 8, 128>}, {pipeline_mode = #tpu.pipeline_mode<synchronous>, transform_indices = @transform_1, window_bounds = array<i64: 4, 8>}, {pipeline_mode = #tpu.pipeline_mode<synchronous>, transform_indices = @transform_2, window_bounds = array<i64: 128, 256>}, {pipeline_mode = #tpu.pipeline_mode<synchronous>, transform_indices = @transform_3, window_bounds = array<i64: 1, 256>}, {transform_indices = @transform_4, window_bounds = array<i64: 32, 128>}, {pipeline_mode = #tpu.pipeline_mode<synchronous>, transform_indices = @transform_5, window_bounds = array<i64: 128, 512>}, {pipeline_mode = #tpu.pipeline_mode<synchronous>, transform_indices = @transform_6, window_bounds = array<i64: 1, 512>}, {pipeline_mode = #tpu.pipeline_mode<synchronous>, transform_indices = @transform_7, window_bounds = array<i64: 128, 512>}, {transform_indices = @transform_8, window_bounds = array<i64: 4, 8, 128>}]} {
    %c0_i32 = arith.constant 0 : i32
    %0 = arith.cmpi eq, %arg0, %c0_i32 : i32
    %1 = arith.extui %0 : i1 to i32
    %c0_i32_0 = arith.constant 0 : i32
    %2 = arith.cmpi ne, %1, %c0_i32_0 : i32
    scf.if %2 {
      %c0_65 = arith.constant 0 : index
      %c0_66 = arith.constant 0 : index
      %c0_67 = arith.constant 0 : index
      %262 = vector.load %arg1[%c0_65, %c0_66, %c0_67] : memref<4x8x128xbf16, #tpu.memory_space<vmem>>, vector<4x8x128xbf16>
      %263 = arith.extf %262 : vector<4x8x128xbf16> to vector<4x8x128xf32>
      %c0_68 = arith.constant 0 : index
      %c0_69 = arith.constant 0 : index
      %264 = vector.load %arg2[%c0_68, %c0_69] : memref<4x8xf32, #tpu.memory_space<vmem>>, vector<4x8xf32>
      %265 = vector.shape_cast %264 : vector<4x8xf32> to vector<4x8x1xf32>
      %266 = vector.broadcast %265 : vector<4x8x1xf32> to vector<4x8x128xf32>
      %267 = arith.mulf %263, %266 : vector<4x8x128xf32>
      %cst_70 = arith.constant dense<0.000000e+00> : vector<4x128xf32>
      %268 = vector.multi_reduction <add>, %267, %cst_70 [1] : vector<4x8x128xf32> to vector<4x128xf32>
      %cst_71 = arith.constant dense<0.000000e+00> : vector<4xf32>
      %269 = vector.multi_reduction <add>, %264, %cst_71 [1] : vector<4x8xf32> to vector<4xf32>
      %270 = vector.shape_cast %269 : vector<4xf32> to vector<4x1xf32>
      %271 = vector.broadcast %270 : vector<4x1xf32> to vector<4x128xf32>
      %272 = arith.divf %268, %271 : vector<4x128xf32>
      %c0_72 = arith.constant 0 : index
      %c0_73 = arith.constant 0 : index
      %273 = vector.load %arg3[%c0_72, %c0_73] : memref<128x256xbf16, #tpu.memory_space<vmem>>, vector<128x256xbf16>
      %274 = arith.truncf %272 : vector<4x128xf32> to vector<4x128xbf16>
      %cst_74 = arith.constant dense<0.000000e+00> : vector<4x256xf32>
      %275 = tpu.matmul %274, %273, %cst_74 {dimension_numbers = #tpu.dot_dimension_numbers<[1], [0], [0], [1], [0, 0, 1, 1], [], []>} : vector<4x128xbf16>, vector<128x256xbf16>, vector<4x256xf32> -> vector<4x256xf32>
      %c0_75 = arith.constant 0 : index
      %c0_76 = arith.constant 0 : index
      %276 = vector.load %arg4[%c0_75, %c0_76] : memref<1x256xf32, #tpu.memory_space<vmem>>, vector<1x256xf32>
      %277 = vector.broadcast %276 : vector<1x256xf32> to vector<4x256xf32>
      %278 = arith.addf %275, %277 : vector<4x256xf32>
      %279 = vector.extract_strided_slice %278 {offsets = [0, 0], sizes = [4, 128], strides = [1, 1]} : vector<4x256xf32> to vector<4x128xf32>
      %c0_77 = arith.constant 0 : index
      %c0_78 = arith.constant 0 : index
      %280 = vector.load %arg10[%c0_77, %c0_78] : memref<4x128xf32, #tpu.memory_space<vmem>>, vector<4x128xf32>
      tpu.vector_store %arg10[%c0_77, %c0_78], %279 {strides = array<i32>} : memref<4x128xf32, #tpu.memory_space<vmem>>, vector<4x128xf32>,
      %281 = vector.extract_strided_slice %278 {offsets = [0, 128], sizes = [4, 128], strides = [1, 1]} : vector<4x256xf32> to vector<4x128xf32>
      %c0_79 = arith.constant 0 : index
      %c0_80 = arith.constant 0 : index
      %282 = vector.load %arg11[%c0_79, %c0_80] : memref<4x128xf32, #tpu.memory_space<vmem>>, vector<4x128xf32>
      tpu.vector_store %arg11[%c0_79, %c0_80], %281 {strides = array<i32>} : memref<4x128xf32, #tpu.memory_space<vmem>>, vector<4x128xf32>,
    } else {
    }
    %c0 = arith.constant 0 : index
    %c0_1 = arith.constant 0 : index
    %3 = vector.load %arg5[%c0, %c0_1] : memref<32x128xbf16, #tpu.memory_space<vmem>>, vector<32x128xbf16>
    %c0_2 = arith.constant 0 : index
    %c0_3 = arith.constant 0 : index
    %4 = vector.load %arg6[%c0_2, %c0_3] : memref<128x512xbf16, #tpu.memory_space<vmem>>, vector<128x512xbf16>
    %cst = arith.constant dense<0.000000e+00> : vector<32x512xf32>
    %5 = tpu.matmul %3, %4, %cst {dimension_numbers = #tpu.dot_dimension_numbers<[1], [0], [0], [1], [0, 0, 1, 1], [], []>} : vector<32x128xbf16>, vector<128x512xbf16>, vector<32x512xf32> -> vector<32x512xf32>
    %c0_4 = arith.constant 0 : index
    %c0_5 = arith.constant 0 : index
    %6 = vector.load %arg7[%c0_4, %c0_5] : memref<1x512xf32, #tpu.memory_space<vmem>>, vector<1x512xf32>
    %7 = vector.broadcast %6 : vector<1x512xf32> to vector<32x512xf32>
    %8 = arith.addf %5, %7 : vector<32x512xf32>
    %c0_6 = arith.constant 0 : index
    %c0_7 = arith.constant 0 : index
    %9 = vector.load %arg10[%c0_6, %c0_7] : memref<4x128xf32, #tpu.memory_space<vmem>>, vector<4x128xf32>
    %c0_8 = arith.constant 0 : index
    %c0_9 = arith.constant 0 : index
    %10 = vector.load %arg11[%c0_8, %c0_9] : memref<4x128xf32, #tpu.memory_space<vmem>>, vector<4x128xf32>
    %c0_10 = arith.constant 0 : index
    %c0_11 = arith.constant 0 : index
    %11 = vector.load %arg8[%c0_10, %c0_11] : memref<128x512xbf16, #tpu.memory_space<vmem>>, vector<128x512xbf16>
    %12 = vector.extract_strided_slice %8 {offsets = [0, 0], sizes = [4, 512], strides = [1, 1]} : vector<32x512xf32> to vector<4x512xf32>
    %13 = arith.truncf %9 : vector<4x128xf32> to vector<4x128xbf16>
    %cst_12 = arith.constant dense<0.000000e+00> : vector<4x512xf32>
    %14 = tpu.matmul %13, %11, %cst_12 {dimension_numbers = #tpu.dot_dimension_numbers<[1], [0], [0], [1], [0, 0, 1, 1], [], []>} : vector<4x128xbf16>, vector<128x512xbf16>, vector<4x512xf32> -> vector<4x512xf32>
    %15 = arith.addf %12, %14 : vector<4x512xf32>
    %16 = vector.extract_strided_slice %15 {offsets = [0, 0], sizes = [4, 128], strides = [1, 1]} : vector<4x512xf32> to vector<4x128xf32>
    %17 = arith.negf %16 : vector<4x128xf32>
    %18 = math.exp %17 : vector<4x128xf32>
    %cst_13 = arith.constant 1.000000e+00 : f32
    %19 = vector.broadcast %cst_13 : f32 to vector<4x128xf32>
    %20 = arith.addf %19, %18 : vector<4x128xf32>
    %21 = arith.divf %19, %20 : vector<4x128xf32>
    %22 = vector.extract_strided_slice %15 {offsets = [0, 128], sizes = [4, 128], strides = [1, 1]} : vector<4x512xf32> to vector<4x128xf32>
    %23 = arith.negf %22 : vector<4x128xf32>
    %24 = math.exp %23 : vector<4x128xf32>
    %cst_14 = arith.constant 1.000000e+00 : f32
    %25 = vector.broadcast %cst_14 : f32 to vector<4x128xf32>
    %26 = arith.addf %25, %24 : vector<4x128xf32>
    %27 = arith.divf %25, %26 : vector<4x128xf32>
    %28 = vector.extract_strided_slice %15 {offsets = [0, 256], sizes = [4, 128], strides = [1, 1]} : vector<4x512xf32> to vector<4x128xf32>
    %29 = math.tanh %28 : vector<4x128xf32>
    %30 = vector.extract_strided_slice %15 {offsets = [0, 384], sizes = [4, 128], strides = [1, 1]} : vector<4x512xf32> to vector<4x128xf32>
    %31 = arith.negf %30 : vector<4x128xf32>
    %32 = math.exp %31 : vector<4x128xf32>
    %cst_15 = arith.constant 1.000000e+00 : f32
    %33 = vector.broadcast %cst_15 : f32 to vector<4x128xf32>
    %34 = arith.addf %33, %32 : vector<4x128xf32>
    %35 = arith.divf %33, %34 : vector<4x128xf32>
    %36 = arith.mulf %27, %10 : vector<4x128xf32>
    %37 = arith.mulf %21, %29 : vector<4x128xf32>
    %38 = arith.addf %36, %37 : vector<4x128xf32>
    %39 = math.tanh %38 : vector<4x128xf32>
    %40 = arith.mulf %35, %39 : vector<4x128xf32>
    %41 = vector.shape_cast %40 : vector<4x128xf32> to vector<4x1x128xf32>
    %c0_16 = arith.constant 0 : index
    %c0_17 = arith.constant 0 : index
    %c0_18 = arith.constant 0 : index
    %42 = vector.load %arg9[%c0_16, %c0_17, %c0_18] : memref<4x8x128xf32, #tpu.memory_space<vmem>>, vector<4x1x128xf32>
    tpu.vector_store %arg9[%c0_16, %c0_17, %c0_18], %41 {strides = array<i32>} : memref<4x8x128xf32, #tpu.memory_space<vmem>>, vector<4x1x128xf32>,
    %43 = vector.extract_strided_slice %8 {offsets = [4, 0], sizes = [4, 512], strides = [1, 1]} : vector<32x512xf32> to vector<4x512xf32>
    %44 = arith.truncf %40 : vector<4x128xf32> to vector<4x128xbf16>
    %cst_19 = arith.constant dense<0.000000e+00> : vector<4x512xf32>
    %45 = tpu.matmul %44, %11, %cst_19 {dimension_numbers = #tpu.dot_dimension_numbers<[1], [0], [0], [1], [0, 0, 1, 1], [], []>} : vector<4x128xbf16>, vector<128x512xbf16>, vector<4x512xf32> -> vector<4x512xf32>
    %46 = arith.addf %43, %45 : vector<4x512xf32>
    %47 = vector.extract_strided_slice %46 {offsets = [0, 0], sizes = [4, 128], strides = [1, 1]} : vector<4x512xf32> to vector<4x128xf32>
    %48 = arith.negf %47 : vector<4x128xf32>
    %49 = math.exp %48 : vector<4x128xf32>
    %cst_20 = arith.constant 1.000000e+00 : f32
    %50 = vector.broadcast %cst_20 : f32 to vector<4x128xf32>
    %51 = arith.addf %50, %49 : vector<4x128xf32>
    %52 = arith.divf %50, %51 : vector<4x128xf32>
    %53 = vector.extract_strided_slice %46 {offsets = [0, 128], sizes = [4, 128], strides = [1, 1]} : vector<4x512xf32> to vector<4x128xf32>
    %54 = arith.negf %53 : vector<4x128xf32>
    %55 = math.exp %54 : vector<4x128xf32>
    %cst_21 = arith.constant 1.000000e+00 : f32
    %56 = vector.broadcast %cst_21 : f32 to vector<4x128xf32>
    %57 = arith.addf %56, %55 : vector<4x128xf32>
    %58 = arith.divf %56, %57 : vector<4x128xf32>
    %59 = vector.extract_strided_slice %46 {offsets = [0, 256], sizes = [4, 128], strides = [1, 1]} : vector<4x512xf32> to vector<4x128xf32>
    %60 = math.tanh %59 : vector<4x128xf32>
    %61 = vector.extract_strided_slice %46 {offsets = [0, 384], sizes = [4, 128], strides = [1, 1]} : vector<4x512xf32> to vector<4x128xf32>
    %62 = arith.negf %61 : vector<4x128xf32>
    %63 = math.exp %62 : vector<4x128xf32>
    %cst_22 = arith.constant 1.000000e+00 : f32
    %64 = vector.broadcast %cst_22 : f32 to vector<4x128xf32>
    %65 = arith.addf %64, %63 : vector<4x128xf32>
    %66 = arith.divf %64, %65 : vector<4x128xf32>
    %67 = arith.mulf %58, %38 : vector<4x128xf32>
    %68 = arith.mulf %52, %60 : vector<4x128xf32>
    %69 = arith.addf %67, %68 : vector<4x128xf32>
    %70 = math.tanh %69 : vector<4x128xf32>
    %71 = arith.mulf %66, %70 : vector<4x128xf32>
    %72 = vector.shape_cast %71 : vector<4x128xf32> to vector<4x1x128xf32>
    %c0_23 = arith.constant 0 : index
    %c1 = arith.constant 1 : index
    %c0_24 = arith.constant 0 : index
    %73 = vector.load %arg9[%c0_23, %c1, %c0_24] : memref<4x8x128xf32, #tpu.memory_space<vmem>>, vector<4x1x128xf32>
    tpu.vector_store %arg9[%c0_23, %c1, %c0_24], %72 {strides = array<i32>} : memref<4x8x128xf32, #tpu.memory_space<vmem>>, vector<4x1x128xf32>,
    %74 = vector.extract_strided_slice %8 {offsets = [8, 0], sizes = [4, 512], strides = [1, 1]} : vector<32x512xf32> to vector<4x512xf32>
    %75 = arith.truncf %71 : vector<4x128xf32> to vector<4x128xbf16>
    %cst_25 = arith.constant dense<0.000000e+00> : vector<4x512xf32>
    %76 = tpu.matmul %75, %11, %cst_25 {dimension_numbers = #tpu.dot_dimension_numbers<[1], [0], [0], [1], [0, 0, 1, 1], [], []>} : vector<4x128xbf16>, vector<128x512xbf16>, vector<4x512xf32> -> vector<4x512xf32>
    %77 = arith.addf %74, %76 : vector<4x512xf32>
    %78 = vector.extract_strided_slice %77 {offsets = [0, 0], sizes = [4, 128], strides = [1, 1]} : vector<4x512xf32> to vector<4x128xf32>
    %79 = arith.negf %78 : vector<4x128xf32>
    %80 = math.exp %79 : vector<4x128xf32>
    %cst_26 = arith.constant 1.000000e+00 : f32
    %81 = vector.broadcast %cst_26 : f32 to vector<4x128xf32>
    %82 = arith.addf %81, %80 : vector<4x128xf32>
    %83 = arith.divf %81, %82 : vector<4x128xf32>
    %84 = vector.extract_strided_slice %77 {offsets = [0, 128], sizes = [4, 128], strides = [1, 1]} : vector<4x512xf32> to vector<4x128xf32>
    %85 = arith.negf %84 : vector<4x128xf32>
    %86 = math.exp %85 : vector<4x128xf32>
    %cst_27 = arith.constant 1.000000e+00 : f32
    %87 = vector.broadcast %cst_27 : f32 to vector<4x128xf32>
    %88 = arith.addf %87, %86 : vector<4x128xf32>
    %89 = arith.divf %87, %88 : vector<4x128xf32>
    %90 = vector.extract_strided_slice %77 {offsets = [0, 256], sizes = [4, 128], strides = [1, 1]} : vector<4x512xf32> to vector<4x128xf32>
    %91 = math.tanh %90 : vector<4x128xf32>
    %92 = vector.extract_strided_slice %77 {offsets = [0, 384], sizes = [4, 128], strides = [1, 1]} : vector<4x512xf32> to vector<4x128xf32>
    %93 = arith.negf %92 : vector<4x128xf32>
    %94 = math.exp %93 : vector<4x128xf32>
    %cst_28 = arith.constant 1.000000e+00 : f32
    %95 = vector.broadcast %cst_28 : f32 to vector<4x128xf32>
    %96 = arith.addf %95, %94 : vector<4x128xf32>
    %97 = arith.divf %95, %96 : vector<4x128xf32>
    %98 = arith.mulf %89, %69 : vector<4x128xf32>
    %99 = arith.mulf %83, %91 : vector<4x128xf32>
    %100 = arith.addf %98, %99 : vector<4x128xf32>
    %101 = math.tanh %100 : vector<4x128xf32>
    %102 = arith.mulf %97, %101 : vector<4x128xf32>
    %103 = vector.shape_cast %102 : vector<4x128xf32> to vector<4x1x128xf32>
    %c0_29 = arith.constant 0 : index
    %c2 = arith.constant 2 : index
    %c0_30 = arith.constant 0 : index
    %104 = vector.load %arg9[%c0_29, %c2, %c0_30] : memref<4x8x128xf32, #tpu.memory_space<vmem>>, vector<4x1x128xf32>
    tpu.vector_store %arg9[%c0_29, %c2, %c0_30], %103 {strides = array<i32>} : memref<4x8x128xf32, #tpu.memory_space<vmem>>, vector<4x1x128xf32>,
    %105 = vector.extract_strided_slice %8 {offsets = [12, 0], sizes = [4, 512], strides = [1, 1]} : vector<32x512xf32> to vector<4x512xf32>
    %106 = arith.truncf %102 : vector<4x128xf32> to vector<4x128xbf16>
    %cst_31 = arith.constant dense<0.000000e+00> : vector<4x512xf32>
    %107 = tpu.matmul %106, %11, %cst_31 {dimension_numbers = #tpu.dot_dimension_numbers<[1], [0], [0], [1], [0, 0, 1, 1], [], []>} : vector<4x128xbf16>, vector<128x512xbf16>, vector<4x512xf32> -> vector<4x512xf32>
    %108 = arith.addf %105, %107 : vector<4x512xf32>
    %109 = vector.extract_strided_slice %108 {offsets = [0, 0], sizes = [4, 128], strides = [1, 1]} : vector<4x512xf32> to vector<4x128xf32>
    %110 = arith.negf %109 : vector<4x128xf32>
    %111 = math.exp %110 : vector<4x128xf32>
    %cst_32 = arith.constant 1.000000e+00 : f32
    %112 = vector.broadcast %cst_32 : f32 to vector<4x128xf32>
    %113 = arith.addf %112, %111 : vector<4x128xf32>
    %114 = arith.divf %112, %113 : vector<4x128xf32>
    %115 = vector.extract_strided_slice %108 {offsets = [0, 128], sizes = [4, 128], strides = [1, 1]} : vector<4x512xf32> to vector<4x128xf32>
    %116 = arith.negf %115 : vector<4x128xf32>
    %117 = math.exp %116 : vector<4x128xf32>
    %cst_33 = arith.constant 1.000000e+00 : f32
    %118 = vector.broadcast %cst_33 : f32 to vector<4x128xf32>
    %119 = arith.addf %118, %117 : vector<4x128xf32>
    %120 = arith.divf %118, %119 : vector<4x128xf32>
    %121 = vector.extract_strided_slice %108 {offsets = [0, 256], sizes = [4, 128], strides = [1, 1]} : vector<4x512xf32> to vector<4x128xf32>
    %122 = math.tanh %121 : vector<4x128xf32>
    %123 = vector.extract_strided_slice %108 {offsets = [0, 384], sizes = [4, 128], strides = [1, 1]} : vector<4x512xf32> to vector<4x128xf32>
    %124 = arith.negf %123 : vector<4x128xf32>
    %125 = math.exp %124 : vector<4x128xf32>
    %cst_34 = arith.constant 1.000000e+00 : f32
    %126 = vector.broadcast %cst_34 : f32 to vector<4x128xf32>
    %127 = arith.addf %126, %125 : vector<4x128xf32>
    %128 = arith.divf %126, %127 : vector<4x128xf32>
    %129 = arith.mulf %120, %100 : vector<4x128xf32>
    %130 = arith.mulf %114, %122 : vector<4x128xf32>
    %131 = arith.addf %129, %130 : vector<4x128xf32>
    %132 = math.tanh %131 : vector<4x128xf32>
    %133 = arith.mulf %128, %132 : vector<4x128xf32>
    %134 = vector.shape_cast %133 : vector<4x128xf32> to vector<4x1x128xf32>
    %c0_35 = arith.constant 0 : index
    %c3 = arith.constant 3 : index
    %c0_36 = arith.constant 0 : index
    %135 = vector.load %arg9[%c0_35, %c3, %c0_36] : memref<4x8x128xf32, #tpu.memory_space<vmem>>, vector<4x1x128xf32>
    tpu.vector_store %arg9[%c0_35, %c3, %c0_36], %134 {strides = array<i32>} : memref<4x8x128xf32, #tpu.memory_space<vmem>>, vector<4x1x128xf32>,
    %136 = vector.extract_strided_slice %8 {offsets = [16, 0], sizes = [4, 512], strides = [1, 1]} : vector<32x512xf32> to vector<4x512xf32>
    %137 = arith.truncf %133 : vector<4x128xf32> to vector<4x128xbf16>
    %cst_37 = arith.constant dense<0.000000e+00> : vector<4x512xf32>
    %138 = tpu.matmul %137, %11, %cst_37 {dimension_numbers = #tpu.dot_dimension_numbers<[1], [0], [0], [1], [0, 0, 1, 1], [], []>} : vector<4x128xbf16>, vector<128x512xbf16>, vector<4x512xf32> -> vector<4x512xf32>
    %139 = arith.addf %136, %138 : vector<4x512xf32>
    %140 = vector.extract_strided_slice %139 {offsets = [0, 0], sizes = [4, 128], strides = [1, 1]} : vector<4x512xf32> to vector<4x128xf32>
    %141 = arith.negf %140 : vector<4x128xf32>
    %142 = math.exp %141 : vector<4x128xf32>
    %cst_38 = arith.constant 1.000000e+00 : f32
    %143 = vector.broadcast %cst_38 : f32 to vector<4x128xf32>
    %144 = arith.addf %143, %142 : vector<4x128xf32>
    %145 = arith.divf %143, %144 : vector<4x128xf32>
    %146 = vector.extract_strided_slice %139 {offsets = [0, 128], sizes = [4, 128], strides = [1, 1]} : vector<4x512xf32> to vector<4x128xf32>
    %147 = arith.negf %146 : vector<4x128xf32>
    %148 = math.exp %147 : vector<4x128xf32>
    %cst_39 = arith.constant 1.000000e+00 : f32
    %149 = vector.broadcast %cst_39 : f32 to vector<4x128xf32>
    %150 = arith.addf %149, %148 : vector<4x128xf32>
    %151 = arith.divf %149, %150 : vector<4x128xf32>
    %152 = vector.extract_strided_slice %139 {offsets = [0, 256], sizes = [4, 128], strides = [1, 1]} : vector<4x512xf32> to vector<4x128xf32>
    %153 = math.tanh %152 : vector<4x128xf32>
    %154 = vector.extract_strided_slice %139 {offsets = [0, 384], sizes = [4, 128], strides = [1, 1]} : vector<4x512xf32> to vector<4x128xf32>
    %155 = arith.negf %154 : vector<4x128xf32>
    %156 = math.exp %155 : vector<4x128xf32>
    %cst_40 = arith.constant 1.000000e+00 : f32
    %157 = vector.broadcast %cst_40 : f32 to vector<4x128xf32>
    %158 = arith.addf %157, %156 : vector<4x128xf32>
    %159 = arith.divf %157, %158 : vector<4x128xf32>
    %160 = arith.mulf %151, %131 : vector<4x128xf32>
    %161 = arith.mulf %145, %153 : vector<4x128xf32>
    %162 = arith.addf %160, %161 : vector<4x128xf32>
    %163 = math.tanh %162 : vector<4x128xf32>
    %164 = arith.mulf %159, %163 : vector<4x128xf32>
    %165 = vector.shape_cast %164 : vector<4x128xf32> to vector<4x1x128xf32>
    %c0_41 = arith.constant 0 : index
    %c4 = arith.constant 4 : index
    %c0_42 = arith.constant 0 : index
    %166 = vector.load %arg9[%c0_41, %c4, %c0_42] : memref<4x8x128xf32, #tpu.memory_space<vmem>>, vector<4x1x128xf32>
    tpu.vector_store %arg9[%c0_41, %c4, %c0_42], %165 {strides = array<i32>} : memref<4x8x128xf32, #tpu.memory_space<vmem>>, vector<4x1x128xf32>,
    %167 = vector.extract_strided_slice %8 {offsets = [20, 0], sizes = [4, 512], strides = [1, 1]} : vector<32x512xf32> to vector<4x512xf32>
    %168 = arith.truncf %164 : vector<4x128xf32> to vector<4x128xbf16>
    %cst_43 = arith.constant dense<0.000000e+00> : vector<4x512xf32>
    %169 = tpu.matmul %168, %11, %cst_43 {dimension_numbers = #tpu.dot_dimension_numbers<[1], [0], [0], [1], [0, 0, 1, 1], [], []>} : vector<4x128xbf16>, vector<128x512xbf16>, vector<4x512xf32> -> vector<4x512xf32>
    %170 = arith.addf %167, %169 : vector<4x512xf32>
    %171 = vector.extract_strided_slice %170 {offsets = [0, 0], sizes = [4, 128], strides = [1, 1]} : vector<4x512xf32> to vector<4x128xf32>
    %172 = arith.negf %171 : vector<4x128xf32>
    %173 = math.exp %172 : vector<4x128xf32>
    %cst_44 = arith.constant 1.000000e+00 : f32
    %174 = vector.broadcast %cst_44 : f32 to vector<4x128xf32>
    %175 = arith.addf %174, %173 : vector<4x128xf32>
    %176 = arith.divf %174, %175 : vector<4x128xf32>
    %177 = vector.extract_strided_slice %170 {offsets = [0, 128], sizes = [4, 128], strides = [1, 1]} : vector<4x512xf32> to vector<4x128xf32>
    %178 = arith.negf %177 : vector<4x128xf32>
    %179 = math.exp %178 : vector<4x128xf32>
    %cst_45 = arith.constant 1.000000e+00 : f32
    %180 = vector.broadcast %cst_45 : f32 to vector<4x128xf32>
    %181 = arith.addf %180, %179 : vector<4x128xf32>
    %182 = arith.divf %180, %181 : vector<4x128xf32>
    %183 = vector.extract_strided_slice %170 {offsets = [0, 256], sizes = [4, 128], strides = [1, 1]} : vector<4x512xf32> to vector<4x128xf32>
    %184 = math.tanh %183 : vector<4x128xf32>
    %185 = vector.extract_strided_slice %170 {offsets = [0, 384], sizes = [4, 128], strides = [1, 1]} : vector<4x512xf32> to vector<4x128xf32>
    %186 = arith.negf %185 : vector<4x128xf32>
    %187 = math.exp %186 : vector<4x128xf32>
    %cst_46 = arith.constant 1.000000e+00 : f32
    %188 = vector.broadcast %cst_46 : f32 to vector<4x128xf32>
    %189 = arith.addf %188, %187 : vector<4x128xf32>
    %190 = arith.divf %188, %189 : vector<4x128xf32>
    %191 = arith.mulf %182, %162 : vector<4x128xf32>
    %192 = arith.mulf %176, %184 : vector<4x128xf32>
    %193 = arith.addf %191, %192 : vector<4x128xf32>
    %194 = math.tanh %193 : vector<4x128xf32>
    %195 = arith.mulf %190, %194 : vector<4x128xf32>
    %196 = vector.shape_cast %195 : vector<4x128xf32> to vector<4x1x128xf32>
    %c0_47 = arith.constant 0 : index
    %c5 = arith.constant 5 : index
    %c0_48 = arith.constant 0 : index
    %197 = vector.load %arg9[%c0_47, %c5, %c0_48] : memref<4x8x128xf32, #tpu.memory_space<vmem>>, vector<4x1x128xf32>
    tpu.vector_store %arg9[%c0_47, %c5, %c0_48], %196 {strides = array<i32>} : memref<4x8x128xf32, #tpu.memory_space<vmem>>, vector<4x1x128xf32>,
    %198 = vector.extract_strided_slice %8 {offsets = [24, 0], sizes = [4, 512], strides = [1, 1]} : vector<32x512xf32> to vector<4x512xf32>
    %199 = arith.truncf %195 : vector<4x128xf32> to vector<4x128xbf16>
    %cst_49 = arith.constant dense<0.000000e+00> : vector<4x512xf32>
    %200 = tpu.matmul %199, %11, %cst_49 {dimension_numbers = #tpu.dot_dimension_numbers<[1], [0], [0], [1], [0, 0, 1, 1], [], []>} : vector<4x128xbf16>, vector<128x512xbf16>, vector<4x512xf32> -> vector<4x512xf32>
    %201 = arith.addf %198, %200 : vector<4x512xf32>
    %202 = vector.extract_strided_slice %201 {offsets = [0, 0], sizes = [4, 128], strides = [1, 1]} : vector<4x512xf32> to vector<4x128xf32>
    %203 = arith.negf %202 : vector<4x128xf32>
    %204 = math.exp %203 : vector<4x128xf32>
    %cst_50 = arith.constant 1.000000e+00 : f32
    %205 = vector.broadcast %cst_50 : f32 to vector<4x128xf32>
    %206 = arith.addf %205, %204 : vector<4x128xf32>
    %207 = arith.divf %205, %206 : vector<4x128xf32>
    %208 = vector.extract_strided_slice %201 {offsets = [0, 128], sizes = [4, 128], strides = [1, 1]} : vector<4x512xf32> to vector<4x128xf32>
    %209 = arith.negf %208 : vector<4x128xf32>
    %210 = math.exp %209 : vector<4x128xf32>
    %cst_51 = arith.constant 1.000000e+00 : f32
    %211 = vector.broadcast %cst_51 : f32 to vector<4x128xf32>
    %212 = arith.addf %211, %210 : vector<4x128xf32>
    %213 = arith.divf %211, %212 : vector<4x128xf32>
    %214 = vector.extract_strided_slice %201 {offsets = [0, 256], sizes = [4, 128], strides = [1, 1]} : vector<4x512xf32> to vector<4x128xf32>
    %215 = math.tanh %214 : vector<4x128xf32>
    %216 = vector.extract_strided_slice %201 {offsets = [0, 384], sizes = [4, 128], strides = [1, 1]} : vector<4x512xf32> to vector<4x128xf32>
    %217 = arith.negf %216 : vector<4x128xf32>
    %218 = math.exp %217 : vector<4x128xf32>
    %cst_52 = arith.constant 1.000000e+00 : f32
    %219 = vector.broadcast %cst_52 : f32 to vector<4x128xf32>
    %220 = arith.addf %219, %218 : vector<4x128xf32>
    %221 = arith.divf %219, %220 : vector<4x128xf32>
    %222 = arith.mulf %213, %193 : vector<4x128xf32>
    %223 = arith.mulf %207, %215 : vector<4x128xf32>
    %224 = arith.addf %222, %223 : vector<4x128xf32>
    %225 = math.tanh %224 : vector<4x128xf32>
    %226 = arith.mulf %221, %225 : vector<4x128xf32>
    %227 = vector.shape_cast %226 : vector<4x128xf32> to vector<4x1x128xf32>
    %c0_53 = arith.constant 0 : index
    %c6 = arith.constant 6 : index
    %c0_54 = arith.constant 0 : index
    %228 = vector.load %arg9[%c0_53, %c6, %c0_54] : memref<4x8x128xf32, #tpu.memory_space<vmem>>, vector<4x1x128xf32>
    tpu.vector_store %arg9[%c0_53, %c6, %c0_54], %227 {strides = array<i32>} : memref<4x8x128xf32, #tpu.memory_space<vmem>>, vector<4x1x128xf32>,
    %229 = vector.extract_strided_slice %8 {offsets = [28, 0], sizes = [4, 512], strides = [1, 1]} : vector<32x512xf32> to vector<4x512xf32>
    %230 = arith.truncf %226 : vector<4x128xf32> to vector<4x128xbf16>
    %cst_55 = arith.constant dense<0.000000e+00> : vector<4x512xf32>
    %231 = tpu.matmul %230, %11, %cst_55 {dimension_numbers = #tpu.dot_dimension_numbers<[1], [0], [0], [1], [0, 0, 1, 1], [], []>} : vector<4x128xbf16>, vector<128x512xbf16>, vector<4x512xf32> -> vector<4x512xf32>
    %232 = arith.addf %229, %231 : vector<4x512xf32>
    %233 = vector.extract_strided_slice %232 {offsets = [0, 0], sizes = [4, 128], strides = [1, 1]} : vector<4x512xf32> to vector<4x128xf32>
    %234 = arith.negf %233 : vector<4x128xf32>
    %235 = math.exp %234 : vector<4x128xf32>
    %cst_56 = arith.constant 1.000000e+00 : f32
    %236 = vector.broadcast %cst_56 : f32 to vector<4x128xf32>
    %237 = arith.addf %236, %235 : vector<4x128xf32>
    %238 = arith.divf %236, %237 : vector<4x128xf32>
    %239 = vector.extract_strided_slice %232 {offsets = [0, 128], sizes = [4, 128], strides = [1, 1]} : vector<4x512xf32> to vector<4x128xf32>
    %240 = arith.negf %239 : vector<4x128xf32>
    %241 = math.exp %240 : vector<4x128xf32>
    %cst_57 = arith.constant 1.000000e+00 : f32
    %242 = vector.broadcast %cst_57 : f32 to vector<4x128xf32>
    %243 = arith.addf %242, %241 : vector<4x128xf32>
    %244 = arith.divf %242, %243 : vector<4x128xf32>
    %245 = vector.extract_strided_slice %232 {offsets = [0, 256], sizes = [4, 128], strides = [1, 1]} : vector<4x512xf32> to vector<4x128xf32>
    %246 = math.tanh %245 : vector<4x128xf32>
    %247 = vector.extract_strided_slice %232 {offsets = [0, 384], sizes = [4, 128], strides = [1, 1]} : vector<4x512xf32> to vector<4x128xf32>
    %248 = arith.negf %247 : vector<4x128xf32>
    %249 = math.exp %248 : vector<4x128xf32>
    %cst_58 = arith.constant 1.000000e+00 : f32
    %250 = vector.broadcast %cst_58 : f32 to vector<4x128xf32>
    %251 = arith.addf %250, %249 : vector<4x128xf32>
    %252 = arith.divf %250, %251 : vector<4x128xf32>
    %253 = arith.mulf %244, %224 : vector<4x128xf32>
    %254 = arith.mulf %238, %246 : vector<4x128xf32>
    %255 = arith.addf %253, %254 : vector<4x128xf32>
    %256 = math.tanh %255 : vector<4x128xf32>
    %257 = arith.mulf %252, %256 : vector<4x128xf32>
    %258 = vector.shape_cast %257 : vector<4x128xf32> to vector<4x1x128xf32>
    %c0_59 = arith.constant 0 : index
    %c7 = arith.constant 7 : index
    %c0_60 = arith.constant 0 : index
    %259 = vector.load %arg9[%c0_59, %c7, %c0_60] : memref<4x8x128xf32, #tpu.memory_space<vmem>>, vector<4x1x128xf32>
    tpu.vector_store %arg9[%c0_59, %c7, %c0_60], %258 {strides = array<i32>} : memref<4x8x128xf32, #tpu.memory_space<vmem>>, vector<4x1x128xf32>,
    %c0_61 = arith.constant 0 : index
    %c0_62 = arith.constant 0 : index
    %260 = vector.load %arg10[%c0_61, %c0_62] : memref<4x128xf32, #tpu.memory_space<vmem>>, vector<4x128xf32>
    tpu.vector_store %arg10[%c0_61, %c0_62], %257 {strides = array<i32>} : memref<4x128xf32, #tpu.memory_space<vmem>>, vector<4x128xf32>,
    %c0_63 = arith.constant 0 : index
    %c0_64 = arith.constant 0 : index
    %261 = vector.load %arg11[%c0_63, %c0_64] : memref<4x128xf32, #tpu.memory_space<vmem>>, vector<4x128xf32>
    tpu.vector_store %arg11[%c0_63, %c0_64], %255 {strides = array<i32>} : memref<4x128xf32, #tpu.memory_space<vmem>>, vector<4x128xf32>,
    return
  }
  func.func @transform_0(%arg0: i32) -> (i32, i32, i32) {
    %c0_i32 = arith.constant 0 : i32
    %c0_i32_0 = arith.constant 0 : i32
    %c0_i32_1 = arith.constant 0 : i32
    %c0_i32_2 = arith.constant 0 : i32
    return %c0_i32, %c0_i32_0, %c0_i32_1 : i32, i32, i32
  }
  func.func @transform_1(%arg0: i32) -> (i32, i32) {
    %c0_i32 = arith.constant 0 : i32
    %c0_i32_0 = arith.constant 0 : i32
    %c0_i32_1 = arith.constant 0 : i32
    return %c0_i32, %c0_i32_0 : i32, i32
  }
  func.func @transform_2(%arg0: i32) -> (i32, i32) {
    %c0_i32 = arith.constant 0 : i32
    %c0_i32_0 = arith.constant 0 : i32
    %c0_i32_1 = arith.constant 0 : i32
    return %c0_i32, %c0_i32_0 : i32, i32
  }
  func.func @transform_3(%arg0: i32) -> (i32, i32) {
    %c0_i32 = arith.constant 0 : i32
    %c0_i32_0 = arith.constant 0 : i32
    %c0_i32_1 = arith.constant 0 : i32
    return %c0_i32, %c0_i32_0 : i32, i32
  }
  func.func @transform_4(%arg0: i32) -> (i32, i32) {
    %c0_i32 = arith.constant 0 : i32
    %c0_i32_0 = arith.constant 0 : i32
    return %arg0, %c0_i32 : i32, i32
  }
  func.func @transform_5(%arg0: i32) -> (i32, i32) {
    %c0_i32 = arith.constant 0 : i32
    %c0_i32_0 = arith.constant 0 : i32
    %c0_i32_1 = arith.constant 0 : i32
    return %c0_i32, %c0_i32_0 : i32, i32
  }
  func.func @transform_6(%arg0: i32) -> (i32, i32) {
    %c0_i32 = arith.constant 0 : i32
    %c0_i32_0 = arith.constant 0 : i32
    %c0_i32_1 = arith.constant 0 : i32
    return %c0_i32, %c0_i32_0 : i32, i32
  }
  func.func @transform_7(%arg0: i32) -> (i32, i32) {
    %c0_i32 = arith.constant 0 : i32
    %c0_i32_0 = arith.constant 0 : i32
    %c0_i32_1 = arith.constant 0 : i32
    return %c0_i32, %c0_i32_0 : i32, i32
  }
  func.func @transform_8(%arg0: i32) -> (i32, i32, i32) {
    %c0_i32 = arith.constant 0 : i32
    %c0_i32_0 = arith.constant 0 : i32
    %c0_i32_1 = arith.constant 0 : i32
    return %c0_i32, %arg0, %c0_i32_0 : i32, i32, i32
  }
}

module attributes {stable_mosaic.version = 11 : i64} {
  func.func @lse_sub_kernel(%arg0: i32, %arg1: i32, %arg2: memref<32x1024xf32, #tpu.memory_space<vmem>>, %arg3: memref<32x1xf32, #tpu.memory_space<vmem>>, %arg4: memref<32x1024xf32, #tpu.memory_space<vmem>>) attributes {dimension_semantics = [#tpu.dimension_semantics<parallel>, #tpu.dimension_semantics<parallel>], iteration_bounds = array<i64: 3, 1>, scalar_prefetch = 0 : i64, scratch_operands = 0 : i64, tpu.core_type = #tpu.core_type<tc>, window_params = [{transform_indices = @transform_0, window_bounds = array<i64: 32, 1024>}, {transform_indices = @transform_1, window_bounds = array<i64: 32, 1>}, {transform_indices = @transform_2, window_bounds = array<i64: 32, 1024>}]} {
    %c0 = arith.constant 0 : index
    %c0_0 = arith.constant 0 : index
    %0 = vector.load %arg2[%c0, %c0_0] : memref<32x1024xf32, #tpu.memory_space<vmem>>, vector<32x1024xf32>
    %c0_1 = arith.constant 0 : index
    %c0_2 = arith.constant 0 : index
    %1 = vector.load %arg3[%c0_1, %c0_2] : memref<32x1xf32, #tpu.memory_space<vmem>>, vector<32x1xf32>
    %2 = vector.broadcast %1 : vector<32x1xf32> to vector<32x1024xf32>
    %3 = arith.subf %0, %2 : vector<32x1024xf32>
    %c0_3 = arith.constant 0 : index
    %c0_4 = arith.constant 0 : index
    %4 = vector.load %arg4[%c0_3, %c0_4] : memref<32x1024xf32, #tpu.memory_space<vmem>>, vector<32x1024xf32>
    tpu.vector_store %arg4[%c0_3, %c0_4], %3 {strides = array<i32>} : memref<32x1024xf32, #tpu.memory_space<vmem>>, vector<32x1024xf32>,
    return
  }
  func.func @transform_0(%arg0: i32, %arg1: i32) -> (i32, i32) {
    %c0_i32 = arith.constant 0 : i32
    return %arg0, %arg1 : i32, i32
  }
  func.func @transform_1(%arg0: i32, %arg1: i32) -> (i32, i32) {
    %c0_i32 = arith.constant 0 : i32
    %c0_i32_0 = arith.constant 0 : i32
    return %arg0, %c0_i32 : i32, i32
  }
  func.func @transform_2(%arg0: i32, %arg1: i32) -> (i32, i32) {
    %c0_i32 = arith.constant 0 : i32
    return %arg0, %arg1 : i32, i32
  }
}

</mosaic_0001>

<bundles_post_ra>
// kernel: forward.5
= control target key start
LH: loop header
LB: loop body
LE: loop exit
PB: predicated region body
PF: predicated region fallthrough
CT: control target
= control target key end

     0   :  { %s519_s9 = smov 0   ;;  %s521_s10 = smov 0   ;;  %s660_s0 = inlined_call_operand.vmem [shape: f32[96,1024], index: 0, kind: input, shape index: {}, may-alias: {0,2}]   ;;  %s661_s1 = inlined_call_operand.vmem [shape: f32[96,1], index: 1, kind: input, shape index: {}]   ;;  %s662_s2 = inlined_call_operand.vmem [shape: f32[96,1024], index: 2, kind: output, shape index: {}, may-alias: {0,2}]  }
   0x1   :  { %s523_s11 = smov 0  }
   0x2 LB: > { %s24_s12 = sadd.s32 1, %s497_s10  ;;  %p439_p0 = scmp.ge.s32.totalorder %s501_s11, 1  ;;  %s501_s11 = sphi %s523_s11, %s12_s11   ;;  %s497_s10 = sphi %s521_s10, %s664_s10   ;;  %s493_s9 = sphi %s519_s9, %s663_s9  }
   0x3   : > { %p26_p1 = scmp.ge.s32.totalorder %s24_s12, 3  ;;  %p146_p2 = scmp.lt.s32.totalorder %s501_s11, 4 }
   0x5   : > { %s666_s12 = smov (%p26_p1, %s24_s12), 0  ;;  %p147_p3 = pnand %p439_p0, %p146_p2 }
   0x6   : > { %s440_s13 = sshll.u32 (!%p147_p3), %s493_s9, 2 }
   0x7   : > { %150 = sbr.rel (%p147_p3) target bundleno = 165 (0xa5), region = 28  ;;  %p185_p4 = scmp.lt.s32.totalorder (!%p147_p3), %s440_s13, 11 }
   0xc   : > { %v503_v0 = vmov 0   ;;  %s668_s13 = smov (!%p185_p4, %s440_s13), 11 }
   0xd   : > { %478 = vset.pattern.permute.xlu1 %v503_v0  ;;  %477 = vset.pattern.permute.xlu0 %v503_v0  ;;  %s444_s14 = sshll.u32 %s668_s13, 3  ;;  %s450_s18 = sshll.u32 %s668_s13, 6 }
   0xe   : > { %s199_s17 = scalar_lea.vmem %s661_s1, %s444_s14  ;;  %s547_s21 = scalar_lea.vmem %s660_s0, %s450_s18 }
   0xf   : > { %v247_v1 = vld [vmem:[%s199_s17 + $0x10] sm:$0xff]  ;;  %v245_v2 = vld [vmem:[%s199_s17] sm:$0xff]  ;;  %v248_v3 = vld [vmem:[%s199_s17 + $0x18] sm:$0xff]  ;;  %s592_s24 = scalar_lea.vmem %s662_s2, %s450_s18 }
  0x10   : > { %261 = vperm.xlu1 %478, %v247_v1   ;;  %251 = vperm.xlu0 %477, %v245_v2   ;;  %v246_v4 = vld [vmem:[%s199_s17 + $0x8] sm:$0xff]  ;;  %v229_v5 = vld [vmem:[%s547_s21 + $0x80] sm:$0xff]  ;;  %v231_v7 = vld [vmem:[%s547_s21 + $0x90] sm:$0xff] }
  0x11   : > { %v230_v6 = vld [vmem:[%s547_s21 + $0x88] sm:$0xff]  ;;  %v232_v8 = vld [vmem:[%s547_s21 + $0x98] sm:$0xff]  ;;  %v554_v9 = vld [vmem:[%s547_s21 + $0x40] sm:$0xff] }
  0x12   : > { %v557_v10 = vld [vmem:[%s547_s21 + $0x48] sm:$0xff]  ;;  %v560_v11 = vld [vmem:[%s547_s21 + $0x50] sm:$0xff]  ;;  %v563_v12 = vld [vmem:[%s547_s21 + $0x58] sm:$0xff] }
  0x13   : > { %v566_v13 = vld [vmem:[%s547_s21 + $0x60] sm:$0xff]  ;;  %v569_v14 = vld [vmem:[%s547_s21 + $0x68] sm:$0xff]  ;;  %v572_v15 = vld [vmem:[%s547_s21 + $0x70] sm:$0xff] }
  0x14   : > { %v575_v16 = vld [vmem:[%s547_s21 + $0x78] sm:$0xff]  ;;  %v233_v17 = vld [vmem:[%s547_s21 + $0xa0] sm:$0xff]  ;;  %v238_v19 = vld [vmem:[%s547_s21 + $0xc8] sm:$0xff] }
  0x15   : > { %v237_v18 = vld [vmem:[%s547_s21 + $0xc0] sm:$0xff]  ;;  %v581_v20 = vld [vmem:[%s547_s21 + $0xd0] sm:$0xff]  ;;  %v584_v21 = vld [vmem:[%s547_s21 + $0xd8] sm:$0xff] }
  0x16   : > { %v587_v22 = vld [vmem:[%s547_s21 + $0xe0] sm:$0xff]  ;;  %v214_v24 = vld [vmem:[%s547_s21 + $0x8] sm:$0xff]  ;;  %v215_v25 = vld [vmem:[%s547_s21 + $0x10] sm:$0xff] }
  0x17   : > { %v213_v23 = vld [vmem:[%s547_s21] sm:$0xff]  ;;  %v216_v26 = vld [vmem:[%s547_s21 + $0x18] sm:$0xff]  ;;  %v242_v28 = vld [vmem:[%s547_s21 + $0xe8] sm:$0xff] }
  0x18   : > { %266 = vperm.xlu1 %478, %v248_v3   ;;  %256 = vperm.xlu0 %477, %v246_v4   ;;  %v217_v27 = vld [vmem:[%s547_s21 + $0x20] sm:$0xff]  ;;  %v243_v29 = vld [vmem:[%s547_s21 + $0xf0] sm:$0xff]  ;;  %v244_v30 = vld [vmem:[%s547_s21 + $0xf8] sm:$0xff] }
  0x19   : > { %v218_v32 = vld [vmem:[%s547_s21 + $0x28] sm:$0xff]  ;;  %v219_v33 = vld [vmem:[%s547_s21 + $0x30] sm:$0xff]  ;;  %v220_v38 = vld [vmem:[%s547_s21 + $0x38] sm:$0xff] }
  0x1a   : > { %v234_v34 = vld [vmem:[%s547_s21 + $0xa8] sm:$0xff]  ;;  %v235_v39 = vld [vmem:[%s547_s21 + $0xb0] sm:$0xff]  ;;  %v236_v40 = vld [vmem:[%s547_s21 + $0xb8] sm:$0xff] }
  0x82   : > { %v262_v31 = vpop.permute.xlu1 %261  ;;  %v252_v46 = vpop.permute.xlu0 %251 }
  0x83   : > { %v285_v35 = vsub.f32 %v229_v5, %v262_v31  ;;  %v286_v36 = vsub.f32 %v230_v6, %v262_v31  ;;  %v287_v37 = vsub.f32 %v231_v7, %v262_v31  ;;  %v288_v41 = vsub.f32 %v232_v8, %v262_v31 }
  0x84   : > { %v289_v42 = vsub.f32 %v233_v17, %v262_v31  ;;  %v290_v43 = vsub.f32 %v234_v34, %v262_v31  ;;  %v291_v44 = vsub.f32 %v235_v39, %v262_v31  ;;  %v292_v45 = vsub.f32 %v236_v40, %v262_v31 }
  0x85   : > { %317 = vst [vmem:[%s592_s24 + $0x80] sm:$0xff] %v285_v35  ;;  %v269_v47 = vsub.f32 %v213_v23, %v252_v46  ;;  %v270_v48 = vsub.f32 %v214_v24, %v252_v46  ;;  %v271_v49 = vsub.f32 %v215_v25, %v252_v46  ;;  %v272_v50 = vsub.f32 %v216_v26, %v252_v46 }
  0x86   : > { %318 = vst [vmem:[%s592_s24 + $0x88] sm:$0xff] %v286_v36  ;;  %v273_v51 = vsub.f32 %v217_v27, %v252_v46  ;;  %v274_v52 = vsub.f32 %v218_v32, %v252_v46  ;;  %v275_v54 = vsub.f32 %v219_v33, %v252_v46  ;;  %v276_v55 = vsub.f32 %v220_v38, %v252_v46 }
  0x87   : > { %319 = vst [vmem:[%s592_s24 + $0x90] sm:$0xff] %v287_v37 }
  0x88   : > { %320 = vst [vmem:[%s592_s24 + $0x98] sm:$0xff] %v288_v41 }
  0x89   : > { %321 = vst [vmem:[%s592_s24 + $0xa0] sm:$0xff] %v289_v42 }
  0x8a   : > { %322 = vst [vmem:[%s592_s24 + $0xa8] sm:$0xff] %v290_v43  ;;  %v267_v53 = vpop.permute.xlu1 %266  ;;  %v257_v62 = vpop.permute.xlu0 %256 }
  0x8b   : > { %323 = vst [vmem:[%s592_s24 + $0xb0] sm:$0xff] %v291_v44  ;;  %v293_v56 = vsub.f32 %v237_v18, %v267_v53  ;;  %v294_v57 = vsub.f32 %v238_v19, %v267_v53  ;;  %v295_v58 = vsub.f32 %v581_v20, %v267_v53  ;;  %v296_v59 = vsub.f32 %v584_v21, %v267_v53 }
  0x8c   : > { %324 = vst [vmem:[%s592_s24 + $0xb8] sm:$0xff] %v292_v45  ;;  %v297_v60 = vsub.f32 %v587_v22, %v267_v53  ;;  %v298_v61 = vsub.f32 %v242_v28, %v267_v53  ;;  %v299_v63 = vsub.f32 %v243_v29, %v267_v53  ;;  %v300_v0 = vsub.f32 %v244_v30, %v267_v53 }
  0x8d   : > { %301 = vst [vmem:[%s592_s24] sm:$0xff] %v269_v47  ;;  %v277_v1 = vsub.f32 %v554_v9, %v257_v62  ;;  %v278_v2 = vsub.f32 %v557_v10, %v257_v62  ;;  %v279_v3 = vsub.f32 %v560_v11, %v257_v62  ;;  %v280_v4 = vsub.f32 %v563_v12, %v257_v62 }
  0x8e   : > { %302 = vst [vmem:[%s592_s24 + $0x8] sm:$0xff] %v270_v48  ;;  %v281_v5 = vsub.f32 %v566_v13, %v257_v62  ;;  %v282_v6 = vsub.f32 %v569_v14, %v257_v62  ;;  %v283_v7 = vsub.f32 %v572_v15, %v257_v62  ;;  %v284_v8 = vsub.f32 %v575_v16, %v257_v62 }
  0x8f   : > { %303 = vst [vmem:[%s592_s24 + $0x10] sm:$0xff] %v271_v49 }
  0x90   : > { %304 = vst [vmem:[%s592_s24 + $0x18] sm:$0xff] %v272_v50 }
  0x91   : > { %305 = vst [vmem:[%s592_s24 + $0x20] sm:$0xff] %v273_v51 }
  0x92   : > { %306 = vst [vmem:[%s592_s24 + $0x28] sm:$0xff] %v274_v52 }
  0x93   : > { %307 = vst [vmem:[%s592_s24 + $0x30] sm:$0xff] %v275_v54 }
  0x94   : > { %308 = vst [vmem:[%s592_s24 + $0x38] sm:$0xff] %v276_v55 }
  0x95   : > { %325 = vst [vmem:[%s592_s24 + $0xc0] sm:$0xff] %v293_v56 }
  0x96   : > { %326 = vst [vmem:[%s592_s24 + $0xc8] sm:$0xff] %v294_v57 }
  0x97   : > { %327 = vst [vmem:[%s592_s24 + $0xd0] sm:$0xff] %v295_v58 }
  0x98   : > { %328 = vst [vmem:[%s592_s24 + $0xd8] sm:$0xff] %v296_v59 }
  0x99   : > { %329 = vst [vmem:[%s592_s24 + $0xe0] sm:$0xff] %v297_v60 }
  0x9a   : > { %330 = vst [vmem:[%s592_s24 + $0xe8] sm:$0xff] %v298_v61 }
  0x9b   : > { %331 = vst [vmem:[%s592_s24 + $0xf0] sm:$0xff] %v299_v63 }
  0x9c   : > { %332 = vst [vmem:[%s592_s24 + $0xf8] sm:$0xff] %v300_v0 }
  0x9d   : > { %309 = vst [vmem:[%s592_s24 + $0x40] sm:$0xff] %v277_v1 }
  0x9e   : > { %310 = vst [vmem:[%s592_s24 + $0x48] sm:$0xff] %v278_v2 }
  0x9f   : > { %311 = vst [vmem:[%s592_s24 + $0x50] sm:$0xff] %v279_v3 }
  0xa0   : > { %312 = vst [vmem:[%s592_s24 + $0x58] sm:$0xff] %v280_v4 }
  0xa1   : > { %313 = vst [vmem:[%s592_s24 + $0x60] sm:$0xff] %v281_v5 }
  0xa2   : > { %314 = vst [vmem:[%s592_s24 + $0x68] sm:$0xff] %v282_v6 }
  0xa3   : > { %315 = vst [vmem:[%s592_s24 + $0x70] sm:$0xff] %v283_v7 }
  0xa4   : > { %316 = vst [vmem:[%s592_s24 + $0x78] sm:$0xff] %v284_v8 }
  0xa5 PF: > { %s12_s11 = sadd.s32 1, %s501_s11   ;;  %s663_s9 = smov %s497_s10 }
  0xa6   : > { %p9_p5 = scmp.ge.s32.totalorder %s12_s11, 5   ;;  %s664_s10 = smov %s666_s12 }
  0xa8   :  { %11 = sbr.rel (!%p9_p5) target bundleno = 2 (0x2), region = 61 }

// kernel: forward.4
= control target key start
LH: loop header
LB: loop body
LE: loop exit
PB: predicated region body
PF: predicated region fallthrough
CT: control target
= control target key end

     0   :  { %s1786_s15 = smov 0   ;;  %s1788_s16 = smov 0   ;;  %s2548_s0 = inlined_call_operand.vmem [shape: f32[96,128], index: 0, kind: input, shape index: {}]   ;;  %s2549_s1 = inlined_call_operand.vmem [shape: bf16[128,1024], index: 1, kind: input, shape index: {}]   ;;  %s2550_s2 = inlined_call_operand.vmem [shape: f32[1,1024], index: 2, kind: input, shape index: {}]   ;;  %s2551_s3 = inlined_call_operand.vmem [shape: f32[96,1024], index: 3, kind: output, shape index: {0}]   ;;  %s2552_s4 = inlined_call_operand.vmem [shape: f32[96,1], index: 4, kind: output, shape index: {1}]  }
   0x1   :  { %s1790_s17 = smov 0  }
   0x2 LB: > { %s27_s18 = sadd.s32 1, %s1752_s16  ;;  %p1293_p0 = scmp.ge.s32.totalorder %s1756_s17, 1  ;;  %s1756_s17 = sphi %s1790_s17, %s15_s17   ;;  %s1752_s16 = sphi %s1788_s16, %s2554_s16   ;;  %s1748_s15 = sphi %s1786_s15, %s2553_s15  }
   0x3   : > { %p29_p1 = scmp.ge.s32.totalorder %s27_s18, 3  ;;  %p201_p2 = scmp.lt.s32.totalorder %s1756_s17, 4 }
   0x5   : > { %s2556_s18 = smov (%p29_p1, %s27_s18), 0  ;;  %p202_p3 = pnand %p1293_p0, %p201_p2 }
   0x6   : > { %s1294_s13 = sshll.u32 (!%p202_p3), %s1748_s15, 2 }
   0x7   : > { %205 = sbr.rel (%p202_p3) target bundleno = 639 (0x27f), region = 32  ;;  %p247_p4 = scmp.lt.s32.totalorder (!%p202_p3), %s1294_s13, 11 }
   0xc   : > { %v1527_v0 = vld [vmem:[%s2549_s1 + $0x1c0] sm:$0xf]  ;;  %v1616_v2 = vld [vmem:[%s2549_s1 + $0x1c4] sm:$0xf]  ;;  %v1535_v5 = vld [vmem:[%s2549_s1 + $0x1c8] sm:$0xf] }
   0xd   : > { %v1620_v1 = vld [vmem:[%s2549_s1 + $0x1dc] sm:$0xf0]  ;;  %v1529_v4 = vld [vmem:[%s2549_s1 + $0x1e0] sm:$0xf0]  ;;  %v1621_v6 = vld [vmem:[%s2549_s1 + $0x1e4] sm:$0xf0] }
   0xe   : > { %v1528_v3 = vor.u32 %v1620_v1, %v1527_v0  ;;  %v1532_v7 = vor.u32 %v1616_v2, %v1529_v4  ;;  %v1536_v8 = vor.u32 %v1621_v6, %v1535_v5  ;;  %v1617_v9 = vld [vmem:[%s2549_s1 + $0x1cc] sm:$0xf]  ;;  %v1495_v11 = vld [vmem:[%s2549_s1 + $0x180] sm:$0xf]  ;;  %v1608_v14 = vld [vmem:[%s2549_s1 + $0x184] sm:$0xf] }
   0xf   : > { %v1537_v10 = vld [vmem:[%s2549_s1 + $0x1e8] sm:$0xf0]  ;;  %v1612_v13 = vld [vmem:[%s2549_s1 + $0x19c] sm:$0xf0]  ;;  %v1497_v15 = vld [vmem:[%s2549_s1 + $0x1a0] sm:$0xf0] }
  0x10   : > { %702 = vmatpush.bf16.msra.mxu0 %v1528_v3  ;;  %v1540_v12 = vor.u32 %v1617_v9, %v1537_v10  ;;  %721 = vmatpush.bf16.msra.mxu1 %v1532_v7  ;;  %v1496_v16 = vor.u32 %v1612_v13, %v1495_v11  ;;  %v1500_v17 = vor.u32 %v1608_v14, %v1497_v15  ;;  %v1503_v18 = vld [vmem:[%s2549_s1 + $0x188] sm:$0xf]  ;;  %v1609_v20 = vld [vmem:[%s2549_s1 + $0x18c] sm:$0xf]  ;;  %v1463_v23 = vld [vmem:[%s2549_s1 + $0x140] sm:$0xf] }
  0x11   : > { %740 = vmatpush.bf16.msra.mxu2 %v1536_v8  ;;  %v1613_v19 = vld [vmem:[%s2549_s1 + $0x1a4] sm:$0xf0]  ;;  %v1505_v22 = vld [vmem:[%s2549_s1 + $0x1a8] sm:$0xf0]  ;;  %v1604_v24 = vld [vmem:[%s2549_s1 + $0x15c] sm:$0xf0] }
  0x12   : > { %759 = vmatpush.bf16.msra.mxu3 %v1540_v12  ;;  %v1504_v21 = vor.u32 %v1613_v19, %v1503_v18  ;;  %v1508_v25 = vor.u32 %v1609_v20, %v1505_v22  ;;  %v1600_v26 = vld [vmem:[%s2549_s1 + $0x144] sm:$0xf]  ;;  %v1471_v28 = vld [vmem:[%s2549_s1 + $0x148] sm:$0xf]  ;;  %v1464_v29 = vor.u32 %v1604_v24, %v1463_v23  ;;  %v1601_v31 = vld [vmem:[%s2549_s1 + $0x14c] sm:$0xf] }
  0x13   : > { %v1465_v27 = vld [vmem:[%s2549_s1 + $0x160] sm:$0xf0]  ;;  %v1605_v30 = vld [vmem:[%s2549_s1 + $0x164] sm:$0xf0]  ;;  %v1473_v32 = vld [vmem:[%s2549_s1 + $0x168] sm:$0xf0] }
  0x14   : > { %703 = vmatpush.bf16.msra.mxu0 %v1496_v16  ;;  %722 = vmatpush.bf16.msra.mxu1 %v1500_v17  ;;  %v1468_v33 = vor.u32 %v1600_v26, %v1465_v27  ;;  %v1472_v34 = vor.u32 %v1605_v30, %v1471_v28  ;;  %v1431_v35 = vld [vmem:[%s2549_s1 + $0x100] sm:$0xf]  ;;  %v1592_v37 = vld [vmem:[%s2549_s1 + $0x104] sm:$0xf]  ;;  %v1476_v38 = vor.u32 %v1601_v31, %v1473_v32  ;;  %v1439_v40 = vld [vmem:[%s2549_s1 + $0x108] sm:$0xf] }
  0x15   : > { %741 = vmatpush.bf16.msra.mxu2 %v1504_v21  ;;  %v1596_v36 = vld [vmem:[%s2549_s1 + $0x11c] sm:$0xf0]  ;;  %v1433_v39 = vld [vmem:[%s2549_s1 + $0x120] sm:$0xf0]  ;;  %v1597_v41 = vld [vmem:[%s2549_s1 + $0x124] sm:$0xf0] }
  0x16   : > { %760 = vmatpush.bf16.msra.mxu3 %v1508_v25  ;;  %v1593_v42 = vld [vmem:[%s2549_s1 + $0x10c] sm:$0xf]  ;;  %v1432_v44 = vor.u32 %v1596_v36, %v1431_v35  ;;  %v1436_v45 = vor.u32 %v1592_v37, %v1433_v39  ;;  %v1440_v46 = vor.u32 %v1597_v41, %v1439_v40  ;;  %v1399_v47 = vld [vmem:[%s2549_s1 + $0xc0] sm:$0xf]  ;;  %v1584_v49 = vld [vmem:[%s2549_s1 + $0xc4] sm:$0xf] }
  0x17   : > { %v1441_v43 = vld [vmem:[%s2549_s1 + $0x128] sm:$0xf0]  ;;  %v1588_v48 = vld [vmem:[%s2549_s1 + $0xdc] sm:$0xf0]  ;;  %v1401_v51 = vld [vmem:[%s2549_s1 + $0xe0] sm:$0xf0] }
  0x18   : > { %704 = vmatpush.bf16.msra.mxu0 %v1464_v29  ;;  %723 = vmatpush.bf16.msra.mxu1 %v1468_v33  ;;  %v1444_v50 = vor.u32 %v1593_v42, %v1441_v43  ;;  %v1407_v52 = vld [vmem:[%s2549_s1 + $0xc8] sm:$0xf]  ;;  %v1585_v54 = vld [vmem:[%s2549_s1 + $0xcc] sm:$0xf]  ;;  %v1400_v56 = vor.u32 %v1588_v48, %v1399_v47  ;;  %v1404_v57 = vor.u32 %v1584_v49, %v1401_v51  ;;  %v1367_v59 = vld [vmem:[%s2549_s1 + $0x80] sm:$0xf] }
  0x19   : > { %742 = vmatpush.bf16.msra.mxu2 %v1472_v34  ;;  %v1589_v53 = vld [vmem:[%s2549_s1 + $0xe4] sm:$0xf0]  ;;  %v1409_v55 = vld [vmem:[%s2549_s1 + $0xe8] sm:$0xf0]  ;;  %v1580_v60 = vld [vmem:[%s2549_s1 + $0x9c] sm:$0xf0] }
  0x1a   : > { %761 = vmatpush.bf16.msra.mxu3 %v1476_v38  ;;  %v1408_v58 = vor.u32 %v1589_v53, %v1407_v52  ;;  %v1576_v61 = vld [vmem:[%s2549_s1 + $0x84] sm:$0xf]  ;;  %v1412_v62 = vor.u32 %v1585_v54, %v1409_v55  ;;  %v1375_v0 = vld [vmem:[%s2549_s1 + $0x88] sm:$0xf]  ;;  %v1577_v2 = vld [vmem:[%s2549_s1 + $0x8c] sm:$0xf]  ;;  %v1368_v4 = vor.u32 %v1580_v60, %v1367_v59 }
  0x1b   : > { %v1369_v63 = vld [vmem:[%s2549_s1 + $0xa0] sm:$0xf0]  ;;  %v1581_v1 = vld [vmem:[%s2549_s1 + $0xa4] sm:$0xf0]  ;;  %v1377_v3 = vld [vmem:[%s2549_s1 + $0xa8] sm:$0xf0] }
  0x1c   : > { %705 = vmatpush.bf16.msra.mxu0 %v1432_v44  ;;  %724 = vmatpush.bf16.msra.mxu1 %v1436_v45  ;;  %v1335_v5 = vld [vmem:[%s2549_s1 + $0x40] sm:$0xf]  ;;  %v1372_v6 = vor.u32 %v1576_v61, %v1369_v63  ;;  %v1376_v7 = vor.u32 %v1581_v1, %v1375_v0  ;;  %v1568_v9 = vld [vmem:[%s2549_s1 + $0x44] sm:$0xf]  ;;  %v1380_v11 = vor.u32 %v1577_v2, %v1377_v3  ;;  %v1343_v12 = vld [vmem:[%s2549_s1 + $0x48] sm:$0xf] }
  0x1d   : > { %743 = vmatpush.bf16.msra.mxu2 %v1440_v46  ;;  %v1572_v8 = vld [vmem:[%s2549_s1 + $0x5c] sm:$0xf0]  ;;  %v1337_v10 = vld [vmem:[%s2549_s1 + $0x60] sm:$0xf0]  ;;  %v1573_v13 = vld [vmem:[%s2549_s1 + $0x64] sm:$0xf0] }
  0x1e   : > { %762 = vmatpush.bf16.msra.mxu3 %v1444_v50  ;;  %v1569_v14 = vld [vmem:[%s2549_s1 + $0x4c] sm:$0xf]  ;;  %v1336_v16 = vor.u32 %v1572_v8, %v1335_v5  ;;  %v1303_v17 = vld [vmem:[%s2549_s1] sm:$0xf]  ;;  %v1560_v19 = vld [vmem:[%s2549_s1 + $0x4] sm:$0xf]  ;;  %v1340_v20 = vor.u32 %v1568_v9, %v1337_v10  ;;  %v1344_v21 = vor.u32 %v1573_v13, %v1343_v12 }
  0x1f   : > { %v1345_v15 = vld [vmem:[%s2549_s1 + $0x68] sm:$0xf0]  ;;  %v1564_v18 = vld [vmem:[%s2549_s1 + $0x1c] sm:$0xf0]  ;;  %v1305_v22 = vld [vmem:[%s2549_s1 + $0x20] sm:$0xf0] }
  0x20   : > { %706 = vmatpush.bf16.msra.mxu0 %v1400_v56  ;;  %725 = vmatpush.bf16.msra.mxu1 %v1404_v57  ;;  %v1311_v23 = vld [vmem:[%s2549_s1 + $0x8] sm:$0xf]  ;;  %s2558_s13 = smov (!%p247_p4, %s1294_s13), 11  ;;  %v1348_v24 = vor.u32 %v1569_v14, %v1345_v15  ;;  %v1561_v26 = vld [vmem:[%s2549_s1 + $0xc] sm:$0xf]  ;;  %v1304_v30 = vor.u32 %v1564_v18, %v1303_v17  ;;  %v1308_v33 = vor.u32 %v1560_v19, %v1305_v22  ;;  %vm285_vm0 = vcmask 7168  }
  0x21   : > { %744 = vmatpush.bf16.msra.mxu2 %v1408_v58  ;;  %v1565_v25 = vld [vmem:[%s2549_s1 + $0x24] sm:$0xf0]  ;;  %v1313_v27 = vld [vmem:[%s2549_s1 + $0x28] sm:$0xf0]  ;;  %s1295_s11 = sshll.u32 %s2558_s13, 3  ;;  %s1559_s26 = sshll.u32 %s2558_s13, 6 }
  0x22   : > { %763 = vmatpush.bf16.msra.mxu3 %v1412_v62  ;;  %v1551_v28 = vld [vmem:[%s2549_s1 + $0x1d8] sm:$0xf]  ;;  %s2013_s23 = scalar_lea.vmem %s2548_s0, %s1295_s11  ;;  %v1618_v31 = vld [vmem:[%s2549_s1 + $0x1d4] sm:$0xf]  ;;  %v1312_v34 = vor.u32 %v1565_v25, %v1311_v23  ;;  %v1316_v37 = vor.u32 %v1561_v26, %v1313_v27  ;;  %v1543_v39 = vld [vmem:[%s2549_s1 + $0x1d0] sm:$0xf]  ;;  %s2236_s29 = scalar_lea.vmem %s2551_s3, %s1559_s26 }
  0x23   : > { %v1623_v29 = vld [vmem:[%s2549_s1 + $0x1f4] sm:$0xf0]  ;;  %v1545_v32 = vld [vmem:[%s2549_s1 + $0x1f0] sm:$0xf0]  ;;  %v294_v35 = vld [vmem:[%s2013_s23] sm:$0xff]  ;;  %s2521_s6 = scalar_lea.vmem %s2552_s4, %s1295_s11 }
  0x24   : > { %707 = vmatpush.bf16.msra.mxu0 %v1368_v4  ;;  %726 = vmatpush.bf16.msra.mxu1 %v1372_v6  ;;  %v295_v36 = vld [vmem:[%s2013_s23 + $0x8] sm:$0xff]  ;;  %v1552_v38 = vor.u32 %v1623_v29, %v1551_v28  ;;  %v1622_v40 = vld [vmem:[%s2549_s1 + $0x1ec] sm:$0xf0]  ;;  %v1619_v41 = vld [vmem:[%s2549_s1 + $0x1dc] sm:$0xf]  ;;  %v1548_v43 = vor.u32 %v1618_v31, %v1545_v32 }
  0x25   : > { %745 = vmatpush.bf16.msra.mxu2 %v1376_v7  ;;  %v2032_v42 = vpack.c.bf16 %v295_v36, %v294_v35  ;;  %v1553_v44 = vld [vmem:[%s2549_s1 + $0x1f8] sm:$0xf0]  ;;  %v1519_v45 = vld [vmem:[%s2549_s1 + $0x198] sm:$0xf]  ;;  %v1610_v47 = vld [vmem:[%s2549_s1 + $0x194] sm:$0xf]  ;;  %v1544_v49 = vor.u32 %v1622_v40, %v1543_v39 }
  0x26   : > { %764 = vmatpush.bf16.msra.mxu3 %v1380_v11  ;;  %v1615_v46 = vld [vmem:[%s2549_s1 + $0x1b4] sm:$0xf0]  ;;  %v1513_v48 = vld [vmem:[%s2549_s1 + $0x1b0] sm:$0xf0]  ;;  %v1556_v50 = vor.u32 %v1619_v41, %v1553_v44  ;;  %v1511_v52 = vld [vmem:[%s2549_s1 + $0x190] sm:$0xf] }
  0x27   : > { %v1520_v51 = vor.u32 %v1615_v46, %v1519_v45  ;;  %v1614_v53 = vld [vmem:[%s2549_s1 + $0x1ac] sm:$0xf0]  ;;  %v1611_v54 = vld [vmem:[%s2549_s1 + $0x19c] sm:$0xf]  ;;  %v1516_v55 = vor.u32 %v1610_v47, %v1513_v48  ;;  %v1487_v57 = vld [vmem:[%s2549_s1 + $0x158] sm:$0xf] }
  0x28   : > { %708 = vmatpush.bf16.msra.mxu0 %v1336_v16  ;;  %727 = vmatpush.bf16.msra.mxu1 %v1340_v20  ;;  %v1521_v56 = vld [vmem:[%s2549_s1 + $0x1b8] sm:$0xf0]  ;;  %v1607_v58 = vld [vmem:[%s2549_s1 + $0x174] sm:$0xf0]  ;;  %v1602_v59 = vld [vmem:[%s2549_s1 + $0x154] sm:$0xf]  ;;  %v1512_v61 = vor.u32 %v1614_v53, %v1511_v52 }
  0x29   : > { %746 = vmatpush.bf16.msra.mxu2 %v1344_v21  ;;  %v1481_v60 = vld [vmem:[%s2549_s1 + $0x170] sm:$0xf0]  ;;  %v1524_v62 = vor.u32 %v1611_v54, %v1521_v56  ;;  %v1488_v63 = vor.u32 %v1607_v58, %v1487_v57  ;;  %v1479_v0 = vld [vmem:[%s2549_s1 + $0x150] sm:$0xf]  ;;  %v1603_v2 = vld [vmem:[%s2549_s1 + $0x15c] sm:$0xf] }
  0x2a   : > { %765 = vmatpush.bf16.msra.mxu3 %v1348_v24  ;;  %v1606_v1 = vld [vmem:[%s2549_s1 + $0x16c] sm:$0xf0]  ;;  %v1484_v3 = vor.u32 %v1602_v59, %v1481_v60  ;;  %v1489_v4 = vld [vmem:[%s2549_s1 + $0x178] sm:$0xf0]  ;;  %v1455_v5 = vld [vmem:[%s2549_s1 + $0x118] sm:$0xf] }
  0x2b   : > { %v1599_v6 = vld [vmem:[%s2549_s1 + $0x134] sm:$0xf0]  ;;  %v1594_v7 = vld [vmem:[%s2549_s1 + $0x114] sm:$0xf]  ;;  %v1480_v9 = vor.u32 %v1606_v1, %v1479_v0  ;;  %v1447_v10 = vld [vmem:[%s2549_s1 + $0x110] sm:$0xf]  ;;  %v1492_v11 = vor.u32 %v1603_v2, %v1489_v4 }
  0x2c   : > { %709 = vmatpush.bf16.msra.mxu0 %v1304_v30  ;;  %728 = vmatpush.bf16.msra.mxu1 %v1308_v33  ;;  %v1449_v8 = vld [vmem:[%s2549_s1 + $0x130] sm:$0xf0]  ;;  %v1456_v12 = vor.u32 %v1599_v6, %v1455_v5  ;;  %v1598_v13 = vld [vmem:[%s2549_s1 + $0x12c] sm:$0xf0]  ;;  %v1595_v14 = vld [vmem:[%s2549_s1 + $0x11c] sm:$0xf] }
  0x2d   : > { %747 = vmatpush.bf16.msra.mxu2 %v1312_v34  ;;  %v1457_v15 = vld [vmem:[%s2549_s1 + $0x138] sm:$0xf0]  ;;  %v1452_v16 = vor.u32 %v1594_v7, %v1449_v8  ;;  %v296_v17 = vld [vmem:[%s2013_s23 + $0x10] sm:$0xff]  ;;  %v1423_v18 = vld [vmem:[%s2549_s1 + $0xd8] sm:$0xf]  ;;  %v1448_v23 = vor.u32 %v1598_v13, %v1447_v10 }
  0x2e   : > { %766 = vmatpush.bf16.msra.mxu3 %v1316_v37  ;;  %v1591_v19 = vld [vmem:[%s2549_s1 + $0xf4] sm:$0xf0]  ;;  %v1586_v21 = vld [vmem:[%s2549_s1 + $0xd4] sm:$0xf]  ;;  %v1460_v24 = vor.u32 %v1595_v14, %v1457_v15  ;;  %v1415_v26 = vld [vmem:[%s2549_s1 + $0xd0] sm:$0xf] }
  0x2f   : > { %710 = vmatmul.bf16.vlgmr.msra.gmra.mxu0 %v2032_v42  ;;  %729 = vmatmul.bf16.vlgmr.msra.gmra.mxu1 %v2032_v42  ;;  %v297_v20 = vld [vmem:[%s2013_s23 + $0x18] sm:$0xff]  ;;  %v1417_v22 = vld [vmem:[%s2549_s1 + $0xf0] sm:$0xf0]  ;;  %v1424_v25 = vor.u32 %v1591_v19, %v1423_v18  ;;  %v1590_v27 = vld [vmem:[%s2549_s1 + $0xec] sm:$0xf0] }
  0x30   : > { %797 = vmatpush.bf16.msrb.mxu1 %v1548_v43  ;;  %748 = vmatmul.bf16.vlgmr.msra.gmra.mxu2 %v2032_v42  ;;  %v1587_v28 = vld [vmem:[%s2549_s1 + $0xdc] sm:$0xf]  ;;  %v2136_v29 = vpack.c.bf16 %v297_v20, %v296_v17  ;;  %v1420_v30 = vor.u32 %v1586_v21, %v1417_v22  ;;  %v1391_v32 = vld [vmem:[%s2549_s1 + $0x98] sm:$0xf]  ;;  %v1578_v34 = vld [vmem:[%s2549_s1 + $0x94] sm:$0xf]  ;;  %v1416_v36 = vor.u32 %v1590_v27, %v1415_v26 }
  0x31   : > { %816 = vmatpush.bf16.msrb.mxu2 %v1552_v38  ;;  %767 = vmatmul.bf16.vlgmr.msra.gmra.mxu3 %v2032_v42  ;;  %v1425_v31 = vld [vmem:[%s2549_s1 + $0xf8] sm:$0xf0]  ;;  %v1583_v33 = vld [vmem:[%s2549_s1 + $0xb4] sm:$0xf0]  ;;  %v1385_v35 = vld [vmem:[%s2549_s1 + $0xb0] sm:$0xf0] }
  0x32   : > { %778 = vmatpush.bf16.msrb.mxu0 %v1544_v49  ;;  %835 = vmatpush.bf16.msrb.mxu3 %v1556_v50  ;;  %v1428_v37 = vor.u32 %v1587_v28, %v1425_v31  ;;  %v1392_v38 = vor.u32 %v1583_v33, %v1391_v32  ;;  %v1383_v39 = vld [vmem:[%s2549_s1 + $0x90] sm:$0xf]  ;;  %v1579_v41 = vld [vmem:[%s2549_s1 + $0x9c] sm:$0xf]  ;;  %v1388_v43 = vor.u32 %v1578_v34, %v1385_v35  ;;  %v1359_v45 = vld [vmem:[%s2549_s1 + $0x58] sm:$0xf] }
  0x33   : > { %v1582_v40 = vld [vmem:[%s2549_s1 + $0xac] sm:$0xf0]  ;;  %v1393_v44 = vld [vmem:[%s2549_s1 + $0xb8] sm:$0xf0]  ;;  %v1575_v46 = vld [vmem:[%s2549_s1 + $0x74] sm:$0xf0] }
  0x34   : > { %798 = vmatpush.bf16.msrb.mxu1 %v1516_v55  ;;  %v1570_v47 = vld [vmem:[%s2549_s1 + $0x54] sm:$0xf]  ;;  %v1384_v49 = vor.u32 %v1582_v40, %v1383_v39  ;;  %v1396_v50 = vor.u32 %v1579_v41, %v1393_v44  ;;  %v1351_v52 = vld [vmem:[%s2549_s1 + $0x50] sm:$0xf]  ;;  %v1571_v54 = vld [vmem:[%s2549_s1 + $0x5c] sm:$0xf] }
  0x35   : > { %817 = vmatpush.bf16.msrb.mxu2 %v1520_v51  ;;  %v1353_v48 = vld [vmem:[%s2549_s1 + $0x70] sm:$0xf0]  ;;  %v1360_v51 = vor.u32 %v1575_v46, %v1359_v45  ;;  %v1574_v53 = vld [vmem:[%s2549_s1 + $0x6c] sm:$0xf0]  ;;  %v1361_v56 = vld [vmem:[%s2549_s1 + $0x78] sm:$0xf0] }
  0x36   : > { %779 = vmatpush.bf16.msrb.mxu0 %v1512_v61  ;;  %836 = vmatpush.bf16.msrb.mxu3 %v1524_v62  ;;  %v1356_v55 = vor.u32 %v1570_v47, %v1353_v48  ;;  %v1327_v57 = vld [vmem:[%s2549_s1 + $0x18] sm:$0xf]  ;;  %v1562_v59 = vld [vmem:[%s2549_s1 + $0x14] sm:$0xf]  ;;  %v1352_v61 = vor.u32 %v1574_v53, %v1351_v52  ;;  %v1364_v62 = vor.u32 %v1571_v54, %v1361_v56  ;;  %v1319_v0 = vld [vmem:[%s2549_s1 + $0x10] sm:$0xf] }
  0x37   : > { %v1567_v58 = vld [vmem:[%s2549_s1 + $0x34] sm:$0xf0]  ;;  %v1321_v60 = vld [vmem:[%s2549_s1 + $0x30] sm:$0xf0]  ;;  %v1566_v1 = vld [vmem:[%s2549_s1 + $0x2c] sm:$0xf0] }
  0x38   : > { %799 = vmatpush.bf16.msrb.mxu1 %v1484_v3  ;;  %v1324_v2 = vor.u32 %v1562_v59, %v1321_v60  ;;  %v1563_v3 = vld [vmem:[%s2549_s1 + $0x1c] sm:$0xf]  ;;  %v1320_v5 = vor.u32 %v1566_v1, %v1319_v0  ;;  %v2228_v7 = vld [vmem:[%s2550_s2] sm:$0xff]  ;;  %v1758_v60 = vmov -inf  }
  0x39   : > { %818 = vmatpush.bf16.msrb.mxu2 %v1488_v63  ;;  %v1328_v63 = vor.u32 %v1567_v58, %v1327_v57  ;;  %v1329_v4 = vld [vmem:[%s2549_s1 + $0x38] sm:$0xf0]  ;;  %v366_v8 = vperm.slane %v2228_v7, 0  ;;  %v368_v13 = vperm.slane %v2228_v7, 2  ;;  %v369_v14 = vperm.slane %v2228_v7, 3  ;;  %286 = vst.msk [vmem:[#allocation2] sm:$0xff] %vm285_vm0, %v1758_v60 }
  0x3a   : > { %780 = vmatpush.bf16.msrb.mxu0 %v1480_v9  ;;  %837 = vmatpush.bf16.msrb.mxu3 %v1492_v11  ;;  %v1332_v6 = vor.u32 %v1563_v3, %v1329_v4  ;;  %v367_v9 = vperm.slane %v2228_v7, 1  ;;  %v2299_v40 = vperm.slane %v2228_v7, 4  ;;  %v2303_v44 = vperm.slane %v2228_v7, 5  ;;  %287 = vst.msk [vmem:[#allocation2 + $0x8] sm:$0xff] %vm285_vm0, %v1758_v60 }
  0x3b   : > { %v2331_v56 = vperm.slane %v2228_v7, 7  ;;  %288 = vst.msk [vmem:[#allocation2 + $0x10] sm:$0xff] %vm285_vm0, %v1758_v60 }
  0x3c   : > { %800 = vmatpush.bf16.msrb.mxu1 %v1452_v16  ;;  %289 = vst.msk [vmem:[#allocation2 + $0x18] sm:$0xff] %vm285_vm0, %v1758_v60 }
  0x3d   : > { %819 = vmatpush.bf16.msrb.mxu2 %v1456_v12 }
  0x3e   : > { %781 = vmatpush.bf16.msrb.mxu0 %v1448_v23  ;;  %838 = vmatpush.bf16.msrb.mxu3 %v1460_v24 }
  0x3f   : > { %715 = vmatmul.bf16.gmra.mxu0 %v2136_v29  ;;  %734 = vmatmul.bf16.gmra.mxu1 %v2136_v29 }
  0x40   : > { %801 = vmatpush.bf16.msrb.mxu1 %v1420_v30  ;;  %753 = vmatmul.bf16.gmra.mxu2 %v2136_v29 }
  0x41   : > { %820 = vmatpush.bf16.msrb.mxu2 %v1424_v25  ;;  %772 = vmatmul.bf16.gmra.mxu3 %v2136_v29 }
  0x42   : > { %782 = vmatpush.bf16.msrb.mxu0 %v1416_v36  ;;  %839 = vmatpush.bf16.msrb.mxu3 %v1428_v37 }
  0x44   : > { %802 = vmatpush.bf16.msrb.mxu1 %v1388_v43 }
  0x45   : > { %821 = vmatpush.bf16.msrb.mxu2 %v1392_v38 }
  0x46   : > { %783 = vmatpush.bf16.msrb.mxu0 %v1384_v49  ;;  %840 = vmatpush.bf16.msrb.mxu3 %v1396_v50 }
  0x48   : > { %803 = vmatpush.bf16.msrb.mxu1 %v1356_v55  ;;  %v2328_v55 = vperm.slane %v2228_v7, 6 }
  0x49   : > { %822 = vmatpush.bf16.msrb.mxu2 %v1360_v51 }
  0x4a   : > { %784 = vmatpush.bf16.msrb.mxu0 %v1352_v61  ;;  %841 = vmatpush.bf16.msrb.mxu3 %v1364_v62 }
  0x4c   : > { %804 = vmatpush.bf16.msrb.mxu1 %v1324_v2 }
  0x4d   : > { %823 = vmatpush.bf16.msrb.mxu2 %v1328_v63 }
  0x4e   : > { %785 = vmatpush.bf16.msrb.mxu0 %v1320_v5  ;;  %842 = vmatpush.bf16.msrb.mxu3 %v1332_v6 }
  0x4f   : > { %805 = vmatmul.bf16.vlgmr.msrb.gmra.mxu1 %v2032_v42 }
  0x50   : > { %824 = vmatmul.bf16.vlgmr.msrb.gmra.mxu2 %v2032_v42 }
  0x51   : > { %786 = vmatmul.bf16.vlgmr.msrb.gmra.mxu0 %v2032_v42  ;;  %843 = vmatmul.bf16.vlgmr.msrb.gmra.mxu3 %v2032_v42 }
  0x5f   : > { %810 = vmatmul.bf16.gmra.mxu1 %v2136_v29 }
  0x60   : > { %829 = vmatmul.bf16.gmra.mxu2 %v2136_v29 }
  0x61   : > { %791 = vmatmul.bf16.gmra.mxu0 %v2136_v29  ;;  %848 = vmatmul.bf16.gmra.mxu3 %v2136_v29 }
  0xac   : > { %v711_v42 = vpop.f32.mrf.mxu0  ;;  %v730_v11 = vpop.f32.mrf.mxu1 }
  0xad   : > { %v2238_v10 = vadd.f32 %v711_v42, %v366_v8  ;;  %v2240_v12 = vadd.f32 %v730_v11, %v367_v9 }
  0xaf   : > { %854 = vst [vmem:[%s2236_s29] sm:$0xff] %v2238_v10  ;;  %v890_v39 = vmax.f32 %v2238_v10, %v2240_v12 }
  0xb0   : > { %855 = vst [vmem:[%s2236_s29 + $0x8] sm:$0xff] %v2240_v12 }
  0xb3   : > { %v749_v15 = vpop.f32.mrf.mxu2 }
  0xb4   : > { %v2248_v16 = vadd.f32 %v749_v15, %v368_v13  ;;  %v768_v17 = vpop.f32.mrf.mxu3  ;;  %v713_v18 = vpop.f32.mrf.mxu0 }
  0xb5   : > { %v2250_v19 = vadd.f32 %v768_v17, %v369_v14  ;;  %v2252_v20 = vadd.f32 %v713_v18, %v366_v8  ;;  %v732_v21 = vpop.f32.mrf.mxu1 }
  0xb6   : > { %856 = vst [vmem:[%s2236_s29 + $0x10] sm:$0xff] %v2248_v16  ;;  %v2256_v22 = vadd.f32 %v732_v21, %v367_v9  ;;  %v891_v41 = vmax.f32 %v890_v39, %v2248_v16 }
  0xb7   : > { %857 = vst [vmem:[%s2236_s29 + $0x18] sm:$0xff] %v2250_v19 }
  0xb8   : > { %862 = vst [vmem:[%s2236_s29 + $0x40] sm:$0xff] %v2252_v20  ;;  %v892_v51 = vmax.f32 %v891_v41, %v2250_v19  ;;  %v899_v53 = vmax.f32 %v2252_v20, %v2256_v22 }
  0xb9   : > { %863 = vst [vmem:[%s2236_s29 + $0x48] sm:$0xff] %v2256_v22 }
  0xbb   : > { %v751_v23 = vpop.f32.mrf.mxu2 }
  0xbc   : > { %v2264_v24 = vadd.f32 %v751_v23, %v368_v13  ;;  %v770_v25 = vpop.f32.mrf.mxu3  ;;  %v716_v26 = vpop.f32.mrf.mxu0 }
  0xbd   : > { %v2266_v27 = vadd.f32 %v770_v25, %v369_v14  ;;  %v2268_v28 = vadd.f32 %v716_v26, %v366_v8  ;;  %v735_v29 = vpop.f32.mrf.mxu1 }
  0xbe   : > { %864 = vst [vmem:[%s2236_s29 + $0x50] sm:$0xff] %v2264_v24  ;;  %v2274_v30 = vadd.f32 %v735_v29, %v367_v9  ;;  %v900_v57 = vmax.f32 %v899_v53, %v2264_v24 }
  0xbf   : > { %865 = vst [vmem:[%s2236_s29 + $0x58] sm:$0xff] %v2266_v27 }
  0xc0   : > { %870 = vst [vmem:[%s2236_s29 + $0x80] sm:$0xff] %v2268_v28  ;;  %v901_v4 = vmax.f32 %v900_v57, %v2266_v27  ;;  %v908_v6 = vmax.f32 %v2268_v28, %v2274_v30 }
  0xc1   : > { %871 = vst [vmem:[%s2236_s29 + $0x88] sm:$0xff] %v2274_v30 }
  0xc3   : > { %v754_v31 = vpop.f32.mrf.mxu2 }
  0xc4   : > { %v2280_v32 = vadd.f32 %v754_v31, %v368_v13  ;;  %v773_v33 = vpop.f32.mrf.mxu3  ;;  %v718_v34 = vpop.f32.mrf.mxu0 }
  0xc5   : > { %v2282_v35 = vadd.f32 %v773_v33, %v369_v14  ;;  %v2284_v36 = vadd.f32 %v718_v34, %v366_v8  ;;  %v737_v37 = vpop.f32.mrf.mxu1 }
  0xc6   : > { %872 = vst [vmem:[%s2236_s29 + $0x90] sm:$0xff] %v2280_v32  ;;  %v2288_v38 = vadd.f32 %v737_v37, %v367_v9  ;;  %v909_v9 = vmax.f32 %v908_v6, %v2280_v32  ;;  %v1760_v6 = vmov 0.0  }
  0xc7   : > { %873 = vst [vmem:[%s2236_s29 + $0x98] sm:$0xff] %v2282_v35 }
  0xc8   : > { %878 = vst [vmem:[%s2236_s29 + $0xc0] sm:$0xff] %v2284_v36  ;;  %v910_v23 = vmax.f32 %v909_v9, %v2282_v35  ;;  %v917_v29 = vmax.f32 %v2284_v36, %v2288_v38  ;;  %v2446_v9 = vld [vmem:[#allocation2 + $0x8] sm:$0xff] }
  0xc9   : > { %879 = vst [vmem:[%s2236_s29 + $0xc8] sm:$0xff] %v2288_v38 }
  0xca   : > { %290 = vst.msk [vmem:[#allocation3] sm:$0xff] %vm285_vm0, %v1760_v6 }
  0xcb   : > { %v756_v43 = vpop.f32.mrf.mxu2  ;;  %291 = vst.msk [vmem:[#allocation3 + $0x8] sm:$0xff] %vm285_vm0, %v1760_v6 }
  0xcc   : > { %v2305_v45 = vadd.f32 %v756_v43, %v368_v13  ;;  %v775_v46 = vpop.f32.mrf.mxu3  ;;  %292 = vst.msk [vmem:[#allocation3 + $0x10] sm:$0xff] %vm285_vm0, %v1760_v6 }
  0xcd   : > { %v2307_v47 = vadd.f32 %v775_v46, %v369_v14  ;;  %v806_v49 = vpop.f32.mrf.mxu1  ;;  %293 = vst.msk [vmem:[#allocation3 + $0x18] sm:$0xff] %vm285_vm0, %v1760_v6 }
  0xce   : > { %v787_v48 = vpop.f32.mrf.mxu0  ;;  %880 = vst [vmem:[%s2236_s29 + $0xd0] sm:$0xff] %v2305_v45  ;;  %v2318_v52 = vadd.f32 %v806_v49, %v2303_v44  ;;  %v918_v34 = vmax.f32 %v917_v29, %v2305_v45  ;;  %v2466_v29 = vld [vmem:[#allocation2 + $0x18] sm:$0xff] }
  0xcf   : > { %v2312_v50 = vadd.f32 %v787_v48, %v2299_v40  ;;  %881 = vst [vmem:[%s2236_s29 + $0xd8] sm:$0xff] %v2307_v47 }
  0xd0   : > { %859 = vst [vmem:[%s2236_s29 + $0x28] sm:$0xff] %v2318_v52 }
  0xd1   : > { %858 = vst [vmem:[%s2236_s29 + $0x20] sm:$0xff] %v2312_v50  ;;  %v893_v54 = vmax.f32 %v892_v51, %v2312_v50 }
  0xd3   : > { %v825_v58 = vpop.f32.mrf.mxu2  ;;  %v894_v1 = vmax.f32 %v893_v54, %v2318_v52  ;;  %v919_v54 = vmax.f32 %v918_v34, %v2307_v47 }
  0xd4   : > { %v844_v59 = vpop.f32.mrf.mxu3  ;;  %v2336_v61 = vadd.f32 %v825_v58, %v2328_v55 }
  0xd5   : > { %v2339_v62 = vadd.f32 %v844_v59, %v2331_v56  ;;  %v808_v0 = vpop.f32.mrf.mxu1 }
  0xd6   : > { %v789_v63 = vpop.f32.mrf.mxu0  ;;  %v2347_v3 = vadd.f32 %v808_v0, %v2303_v44  ;;  %860 = vst [vmem:[%s2236_s29 + $0x30] sm:$0xff] %v2336_v61  ;;  %v895_v5 = vmax.f32 %v894_v1, %v2336_v61 }
  0xd7   : > { %v2344_v2 = vadd.f32 %v789_v63, %v2299_v40  ;;  %861 = vst [vmem:[%s2236_s29 + $0x38] sm:$0xff] %v2339_v62 }
  0xd8   : > { %v896_v8 = vmax.f32 %v895_v5, %v2339_v62  ;;  %867 = vst [vmem:[%s2236_s29 + $0x68] sm:$0xff] %v2347_v3  ;;  %v1759_v5 = vmov 0  }
  0xd9   : > { %866 = vst [vmem:[%s2236_s29 + $0x60] sm:$0xff] %v2344_v2  ;;  %v902_v7 = vmax.f32 %v901_v4, %v2344_v2  ;;  %1651 = vset.pattern.permute.xlu2 %v1759_v5  ;;  %1652 = vset.pattern.permute.xlu0 %v1759_v5 }
  0xda   : > { %897 = vmax.xlane.f32.xlu0 %v896_v8  ;;  %1653 = vset.pattern.permute.xlu1 %v1759_v5 }
  0xdb   : > { %v827_v42 = vpop.f32.mrf.mxu2  ;;  %v903_v13 = vmax.f32 %v902_v7, %v2347_v3 }
  0xdc   : > { %v846_v11 = vpop.f32.mrf.mxu3  ;;  %v2368_v14 = vadd.f32 %v827_v42, %v2328_v55 }
  0xdd   : > { %v2371_v15 = vadd.f32 %v846_v11, %v2331_v56  ;;  %v811_v18 = vpop.f32.mrf.mxu1 }
  0xde   : > { %v792_v17 = vpop.f32.mrf.mxu0  ;;  %868 = vst [vmem:[%s2236_s29 + $0x70] sm:$0xff] %v2368_v14  ;;  %v904_v25 = vmax.f32 %v903_v13, %v2368_v14  ;;  %v2383_v26 = vadd.f32 %v811_v18, %v2303_v44 }
  0xdf   : > { %v2374_v21 = vadd.f32 %v792_v17, %v2299_v40  ;;  %869 = vst [vmem:[%s2236_s29 + $0x78] sm:$0xff] %v2371_v15  ;;  %v2456_v17 = vld [vmem:[#allocation2 + $0x10] sm:$0xff] }
  0xe0   : > { %v905_v33 = vmax.f32 %v904_v25, %v2371_v15  ;;  %875 = vst [vmem:[%s2236_s29 + $0xa8] sm:$0xff] %v2383_v26 }
  0xe1   : > { %874 = vst [vmem:[%s2236_s29 + $0xa0] sm:$0xff] %v2374_v21  ;;  %v911_v31 = vmax.f32 %v910_v23, %v2374_v21 }
  0xe2   : > { %906 = vmax.xlane.f32.xlu0 %v905_v33 }
  0xe3   : > { %v830_v37 = vpop.f32.mrf.mxu2  ;;  %v912_v49 = vmax.f32 %v911_v31, %v2383_v26 }
  0xe4   : > { %v849_v39 = vpop.f32.mrf.mxu3  ;;  %v2395_v41 = vadd.f32 %v830_v37, %v2328_v55 }
  0xe5   : > { %v2398_v43 = vadd.f32 %v849_v39, %v2331_v56  ;;  %v813_v48 = vpop.f32.mrf.mxu1 }
  0xe6   : > { %v794_v46 = vpop.f32.mrf.mxu0  ;;  %v2405_v53 = vadd.f32 %v813_v48, %v2303_v44  ;;  %876 = vst [vmem:[%s2236_s29 + $0xb0] sm:$0xff] %v2395_v41  ;;  %v913_v57 = vmax.f32 %v912_v49, %v2395_v41 }
  0xe7   : > { %v2402_v51 = vadd.f32 %v794_v46, %v2299_v40  ;;  %877 = vst [vmem:[%s2236_s29 + $0xb8] sm:$0xff] %v2398_v43 }
  0xe8   : > { %v914_v40 = vmax.f32 %v913_v57, %v2398_v43  ;;  %883 = vst [vmem:[%s2236_s29 + $0xe8] sm:$0xff] %v2405_v53 }
  0xe9   : > { %882 = vst [vmem:[%s2236_s29 + $0xe0] sm:$0xff] %v2402_v51  ;;  %v920_v58 = vmax.f32 %v919_v54, %v2402_v51 }
  0xea   : > { %915 = vmax.xlane.f32.xlu1 %v914_v40 }
  0xeb   : > { %v832_v44 = vpop.f32.mrf.mxu2  ;;  %v921_v60 = vmax.f32 %v920_v58, %v2405_v53 }
  0xec   : > { %v851_v59 = vpop.f32.mrf.mxu3  ;;  %v2421_v63 = vadd.f32 %v832_v44, %v2328_v55  ;;  %v2436_v55 = vld [vmem:[#allocation2] sm:$0xff] }
  0xed   : > { %v2424_v0 = vadd.f32 %v851_v59, %v2331_v56 }
  0xee   : > { %884 = vst [vmem:[%s2236_s29 + $0xf0] sm:$0xff] %v2421_v63  ;;  %v922_v1 = vmax.f32 %v921_v60, %v2421_v63 }
  0xef   : > { %885 = vst [vmem:[%s2236_s29 + $0xf8] sm:$0xff] %v2424_v0 }
  0xf0   : > { %v923_v4 = vmax.f32 %v922_v1, %v2424_v0 }
  0xf2   : > { %924 = vmax.xlane.f32.xlu1 %v923_v4 }
 0x14d   : > { %v898_v56 = vpop.xlane.xlu0 %897 }
 0x14e   : > { %v2439_v7 = vmax.f32 %v2436_v55, %v898_v56 }
 0x150   : > { %v934_v8 = vsub.f32 %v2436_v55, %v2439_v7  ;;  %1111 = vst.msk [vmem:[#allocation2] sm:$0xff] %vm285_vm0, %v2439_v7  ;;  %952 = vperm.xlu2 %1651, %v2439_v7  }
 0x155   : > { %v907_v42 = vpop.xlane.xlu0 %906 }
 0x156   : > { %v2449_v11 = vmax.f32 %v2446_v9, %v907_v42 }
 0x158   : > { %v935_v13 = vsub.f32 %v2446_v9, %v2449_v11  ;;  %1112 = vst.msk [vmem:[#allocation2 + $0x8] sm:$0xff] %vm285_vm0, %v2449_v11  ;;  %957 = vperm.xlu2 %1651, %v2449_v11  }
 0x15d   : > { %v916_v18 = vpop.xlane.xlu1 %915 }
 0x15e   : > { %v2459_v23 = vmax.f32 %v2456_v17, %v916_v18 }
 0x160   : > { %v936_v25 = vsub.f32 %v2456_v17, %v2459_v23  ;;  %1113 = vst.msk [vmem:[#allocation2 + $0x10] sm:$0xff] %vm285_vm0, %v2459_v23  ;;  %962 = vperm.xlu0 %1652, %v2459_v23   ;;  %v933_v23 = vld [vmem:[#allocation3 + $0x18] sm:$0xff] }
 0x165   : > { %v925_v31 = vpop.xlane.xlu1 %924 }
 0x166   : > { %v2469_v33 = vmax.f32 %v2466_v29, %v925_v31 }
 0x168   : > { %v937_v34 = vsub.f32 %v2466_v29, %v2469_v33  ;;  %1114 = vst.msk [vmem:[#allocation2 + $0x18] sm:$0xff] %vm285_vm0, %v2469_v33  ;;  %967 = vperm.xlu1 %1653, %v2469_v33  }
 0x1aa   : > { %v953_v37 = vpop.permute.xlu2 %952 }
 0x1ab   : > { %v970_v39 = vsub.f32 %v2238_v10, %v953_v37  ;;  %v971_v46 = vsub.f32 %v2240_v12, %v953_v37  ;;  %v972_v48 = vsub.f32 %v2248_v16, %v953_v37  ;;  %v973_v49 = vsub.f32 %v2250_v19, %v953_v37 }
 0x1ac   : > { %v974_v58 = vsub.f32 %v2312_v50, %v953_v37  ;;  %v975_v40 = vsub.f32 %v2318_v52, %v953_v37  ;;  %v976_v60 = vsub.f32 %v2336_v61, %v953_v37  ;;  %v977_v4 = vsub.f32 %v2339_v62, %v953_v37 }
 0x1ad   : > { %v1002_v54 = vmul.f32 1.442695, %v970_v39  ;;  %v1004_v57 = vmul.f32 1.442695, %v971_v46  ;;  %v1006_v44 = vmul.f32 1.442695, %v972_v48 }
 0x1ae   : > { %v1008_v59 = vmul.f32 1.442695, %v973_v49  ;;  %v1010_v1 = vmul.f32 1.442695, %v974_v58  ;;  %v1012_v12 = vmul.f32 1.442695, %v975_v40 }
 0x1af   : > { %1654 = vpow2.f32 %v1002_v54  ;;  %v1014_v61 = vmul.f32 1.442695, %v976_v60 }
 0x1b0   : > { %1656 = vpow2.f32 %v1004_v57 }
 0x1b1   : > { %1658 = vpow2.f32 %v1006_v44 }
 0x1b2   : > { %v958_v10 = vpop.permute.xlu2 %957  ;;  %1660 = vpow2.f32 %v1008_v59 }
 0x1b3   : > { %v978_v16 = vsub.f32 %v2252_v20, %v958_v10  ;;  %v979_v19 = vsub.f32 %v2256_v22, %v958_v10  ;;  %v980_v50 = vsub.f32 %v2264_v24, %v958_v10  ;;  %v981_v52 = vsub.f32 %v2266_v27, %v958_v10 }
 0x1b4   : > { %1662 = vpow2.f32 %v1010_v1  ;;  %v982_v18 = vsub.f32 %v2344_v2, %v958_v10  ;;  %v1016_v20 = vmul.f32 1.442695, %v977_v4  ;;  %v983_v62 = vsub.f32 %v2347_v3, %v958_v10 }
 0x1b5   : > { %v1655_v5 = vpop.eup %1654  ;;  %v1018_v6 = vmul.f32 1.442695, %v978_v16  ;;  %v1020_v56 = vmul.f32 1.442695, %v979_v19  ;;  %1664 = vpow2.f32 %v1012_v12  ;;  %v1022_v31 = vmul.f32 1.442695, %v980_v50 }
 0x1b6   : > { %v1657_v42 = vpop.eup %1656  ;;  %v1024_v24 = vmul.f32 1.442695, %v981_v52  ;;  %v984_v46 = vsub.f32 %v2368_v14, %v958_v10  ;;  %v1026_v48 = vmul.f32 1.442695, %v982_v18  ;;  %v985_v57 = vsub.f32 %v2371_v15, %v958_v10 }
 0x1b7   : > { %v1066_v39 = vadd.f32 %v1657_v42, %v1655_v5  ;;  %1666 = vpow2.f32 %v1018_v6  ;;  %v1659_v22 = vpop.eup %1658  ;;  %v1028_v58 = vmul.f32 1.442695, %v983_v62 }
 0x1b8   : > { %1668 = vpow2.f32 %v1020_v56  ;;  %v1661_v37 = vpop.eup %1660  ;;  %v1030_v59 = vmul.f32 1.442695, %v984_v46  ;;  %v1032_v14 = vmul.f32 1.442695, %v985_v57 }
 0x1b9   : > { %1670 = vpow2.f32 %v1014_v61  ;;  %v1067_v27 = vadd.f32 %v1659_v22, %v1066_v39 }
 0x1ba   : > { %1672 = vpow2.f32 %v1022_v31  ;;  %v1663_v49 = vpop.eup %1662 }
 0x1bb   : > { %1674 = vpow2.f32 %v1016_v20  ;;  %v1068_v54 = vadd.f32 %v1661_v37, %v1067_v27  ;;  %v1665_v2 = vpop.eup %1664 }
 0x1bc   : > { %1676 = vpow2.f32 %v1024_v24 }
 0x1bd   : > { %v1667_v40 = vpop.eup %1666  ;;  %v1069_v44 = vadd.f32 %v1663_v49, %v1068_v54  ;;  %1678 = vpow2.f32 %v1026_v48 }
 0x1be   : > { %v1669_v3 = vpop.eup %1668  ;;  %1680 = vpow2.f32 %v1028_v58 }
 0x1bf   : > { %v1671_v60 = vpop.eup %1670  ;;  %v1070_v1 = vadd.f32 %v1665_v2, %v1069_v44  ;;  %v1075_v12 = vadd.f32 %v1669_v3, %v1667_v40  ;;  %1682 = vpow2.f32 %v1030_v59 }
 0x1c0   : > { %v1673_v16 = vpop.eup %1672  ;;  %1684 = vpow2.f32 %v1032_v14 }
 0x1c1   : > { %v1675_v19 = vpop.eup %1674  ;;  %v1071_v4 = vadd.f32 %v1671_v60, %v1070_v1  ;;  %v1076_v50 = vadd.f32 %v1673_v16, %v1075_v12 }
 0x1c2   : > { %v1677_v52 = vpop.eup %1676 }
 0x1c3   : > { %v1072_v5 = vadd.f32 %v1675_v19, %v1071_v4  ;;  %v1077_v15 = vadd.f32 %v1677_v52, %v1076_v50  ;;  %v1679_v10 = vpop.eup %1678 }
 0x1c4   : > { %v1681_v56 = vpop.eup %1680 }
 0x1c5   : > { %1073 = vadd.xlane.f32.xlu2 %v1072_v5  ;;  %v1078_v6 = vadd.f32 %v1679_v10, %v1077_v15  ;;  %v1683_v42 = vpop.eup %1682 }
 0x1c6   : > { %v1685_v31 = vpop.eup %1684 }
 0x1c7   : > { %v1079_v61 = vadd.f32 %v1681_v56, %v1078_v6 }
 0x1c9   : > { %v1080_v18 = vadd.f32 %v1683_v42, %v1079_v61 }
 0x1cb   : > { %v1081_v20 = vadd.f32 %v1685_v31, %v1080_v18 }
 0x1cd   : > { %1082 = vadd.xlane.f32.xlu1 %v1081_v20 }
 0x1d2   : > { %v963_v39 = vpop.permute.xlu0 %962 }
 0x1d3   : > { %v986_v22 = vsub.f32 %v2268_v28, %v963_v39  ;;  %v987_v62 = vsub.f32 %v2274_v30, %v963_v39  ;;  %v988_v24 = vsub.f32 %v2280_v32, %v963_v39  ;;  %v989_v27 = vsub.f32 %v2282_v35, %v963_v39 }
 0x1d4   : > { %v990_v48 = vsub.f32 %v2374_v21, %v963_v39  ;;  %v991_v49 = vsub.f32 %v2383_v26, %v963_v39  ;;  %v992_v57 = vsub.f32 %v2395_v41, %v963_v39  ;;  %v993_v40 = vsub.f32 %v2398_v43, %v963_v39 }
 0x1d5   : > { %v1034_v37 = vmul.f32 1.442695, %v986_v22  ;;  %v1036_v46 = vmul.f32 1.442695, %v987_v62  ;;  %v1038_v54 = vmul.f32 1.442695, %v988_v24 }
 0x1d6   : > { %v1040_v2 = vmul.f32 1.442695, %v989_v27  ;;  %v1042_v58 = vmul.f32 1.442695, %v990_v48  ;;  %v1044_v30 = vmul.f32 1.442695, %v991_v49 }
 0x1d7   : > { %1686 = vpow2.f32 %v1034_v37  ;;  %v1046_v41 = vmul.f32 1.442695, %v992_v57 }
 0x1d8   : > { %1688 = vpow2.f32 %v1036_v46 }
 0x1d9   : > { %1690 = vpow2.f32 %v1038_v54 }
 0x1da   : > { %v968_v28 = vpop.permute.xlu1 %967  ;;  %1692 = vpow2.f32 %v1040_v2 }
 0x1db   : > { %v994_v32 = vsub.f32 %v2284_v36, %v968_v28  ;;  %v995_v35 = vsub.f32 %v2288_v38, %v968_v28  ;;  %v996_v21 = vsub.f32 %v2305_v45, %v968_v28  ;;  %v997_v26 = vsub.f32 %v2307_v47, %v968_v28 }
 0x1dc   : > { %1694 = vpow2.f32 %v1042_v58  ;;  %v998_v1 = vsub.f32 %v2402_v51, %v968_v28  ;;  %v1048_v36 = vmul.f32 1.442695, %v993_v40  ;;  %v999_v43 = vsub.f32 %v2405_v53, %v968_v28 }
 0x1dd   : > { %v1687_v44 = vpop.eup %1686  ;;  %v1050_v3 = vmul.f32 1.442695, %v994_v32  ;;  %v1052_v59 = vmul.f32 1.442695, %v995_v35  ;;  %1696 = vpow2.f32 %v1044_v30  ;;  %v1054_v12 = vmul.f32 1.442695, %v996_v21 }
 0x1de   : > { %v1689_v60 = vpop.eup %1688  ;;  %v1056_v45 = vmul.f32 1.442695, %v997_v26  ;;  %v1000_v19 = vsub.f32 %v2421_v63, %v968_v28  ;;  %v1058_v4 = vmul.f32 1.442695, %v998_v1  ;;  %v1001_v5 = vsub.f32 %v2424_v0, %v968_v28  ;;  %v930_v32 = vld [vmem:[#allocation3] sm:$0xff] }
 0x1df   : > { %v1084_v16 = vadd.f32 %v1689_v60, %v1687_v44  ;;  %1698 = vpow2.f32 %v1050_v3  ;;  %v1691_v38 = vpop.eup %1690  ;;  %v1060_v15 = vmul.f32 1.442695, %v999_v43  ;;  %v938_v58 = vmul.f32 1.442695, %v934_v8  ;;  %v931_v44 = vld [vmem:[#allocation3 + $0x8] sm:$0xff] }
 0x1e0   : > { %1700 = vpow2.f32 %v1052_v59  ;;  %v1693_v14 = vpop.eup %1692  ;;  %v1062_v56 = vmul.f32 1.442695, %v1000_v19  ;;  %v1064_v63 = vmul.f32 1.442695, %v1001_v5  ;;  %v940_v28 = vmul.f32 1.442695, %v935_v13 }
 0x1e1   : > { %1702 = vpow2.f32 %v1046_v41  ;;  %v1085_v47 = vadd.f32 %v1691_v38, %v1084_v16  ;;  %v1118_v13 = vld [vmem:[#allocation2] sm:$0xff]  ;;  %v942_v1 = vmul.f32 1.442695, %v936_v25  ;;  %v944_v38 = vmul.f32 1.442695, %v937_v34 }
 0x1e2   : > { %1704 = vpow2.f32 %v1054_v12  ;;  %v1695_v50 = vpop.eup %1694 }
 0x1e3   : > { %1706 = vpow2.f32 %v1048_v36  ;;  %v1086_v52 = vadd.f32 %v1693_v14, %v1085_v47  ;;  %v1697_v51 = vpop.eup %1696  ;;  %v1119_v36 = vld [vmem:[#allocation2 + $0x8] sm:$0xff] }
 0x1e4   : > { %1708 = vpow2.f32 %v1056_v45  ;;  %v932_v45 = vld [vmem:[#allocation3 + $0x10] sm:$0xff] }
 0x1e5   : > { %v1699_v10 = vpop.eup %1698  ;;  %v1087_v6 = vadd.f32 %v1695_v50, %v1086_v52  ;;  %1710 = vpow2.f32 %v1058_v4 }
 0x1e6   : > { %v1701_v53 = vpop.eup %1700  ;;  %1712 = vpow2.f32 %v1060_v15 }
 0x1e7   : > { %v1703_v61 = vpop.eup %1702  ;;  %v1088_v42 = vadd.f32 %v1697_v51, %v1087_v6  ;;  %v1093_v18 = vadd.f32 %v1701_v53, %v1699_v10  ;;  %1714 = vpow2.f32 %v1062_v56  ;;  %v1120_v51 = vld [vmem:[#allocation2 + $0x10] sm:$0xff]  ;;  %v1121_v6 = vld [vmem:[#allocation2 + $0x18] sm:$0xff] }
 0x1e8   : > { %v1705_v31 = vpop.eup %1704  ;;  %1716 = vpow2.f32 %v1064_v63 }
 0x1e9   : > { %v1707_v20 = vpop.eup %1706  ;;  %v1089_v39 = vadd.f32 %v1703_v61, %v1088_v42  ;;  %v1094_v22 = vadd.f32 %v1705_v31, %v1093_v18  ;;  %1718 = vpow2.f32 %v938_v58 }
 0x1ea   : > { %v1709_v62 = vpop.eup %1708  ;;  %1720 = vpow2.f32 %v940_v28 }
 0x1eb   : > { %v1090_v24 = vadd.f32 %v1707_v20, %v1089_v39  ;;  %v1095_v0 = vadd.f32 %v1709_v62, %v1094_v22  ;;  %v1711_v27 = vpop.eup %1710 }
 0x1ec   : > { %v1713_v46 = vpop.eup %1712 }
 0x1ed   : > { %1091 = vadd.xlane.f32.xlu0 %v1090_v24  ;;  %v1096_v37 = vadd.f32 %v1711_v27, %v1095_v0  ;;  %v1715_v49 = vpop.eup %1714 }
 0x1ee   : > { %v1717_v2 = vpop.eup %1716 }
 0x1ef   : > { %v1097_v48 = vadd.f32 %v1713_v46, %v1096_v37  ;;  %v1719_v30 = vpop.eup %1718 }
 0x1f0   : > { %v946_v35 = vmul.f32 %v1719_v30, %v930_v32  ;;  %v1721_v26 = vpop.eup %1720 }
 0x1f1   : > { %v1098_v54 = vadd.f32 %v1715_v49, %v1097_v48  ;;  %v947_v3 = vmul.f32 %v1721_v26, %v931_v44 }
 0x1f3   : > { %v1099_v57 = vadd.f32 %v1717_v2, %v1098_v54 }
 0x1f5   : > { %1100 = vadd.xlane.f32.xlu2 %v1099_v57 }
 0x238   : > { %v1074_v40 = vpop.xlane.xlu2 %1073 }
 0x239   : > { %v1102_v21 = vadd.f32 %v1074_v40, %v946_v35 }
 0x23b   : > { %1107 = vst.msk [vmem:[#allocation3] sm:$0xff] %vm285_vm0, %v1102_v21 }
 0x240   : > { %v1083_v59 = vpop.xlane.xlu1 %1082 }
 0x241   : > { %v1103_v55 = vadd.f32 %v1083_v59, %v947_v3 }
 0x242   : > { %v1122_v7 = vld [vmem:[#allocation3] sm:$0xff] }
 0x243   : > { %1722 = vlog2.f32 %v1122_v7  ;;  %1108 = vst.msk [vmem:[#allocation3 + $0x8] sm:$0xff] %vm285_vm0, %v1103_v55 }
 0x249   : > { %v1723_v8 = vpop.eup %1722 }
 0x24a   : > { %v1127_v9 = vmul.f32 0.6931472, %v1723_v8  ;;  %v1123_v11 = vld [vmem:[#allocation3 + $0x8] sm:$0xff] }
 0x24b   : > { %1724 = vlog2.f32 %v1123_v11 }
 0x24c   : > { %v1134_v41 = vadd.f32 %v1127_v9, %v1118_v13  ;;  %1726 = vpow2.f32 %v942_v1 }
 0x24d   : > { %1728 = vpow2.f32 %v944_v38 }
 0x24e   : > { %1138 = vst.msk [vmem:[%s2521_s6] sm:$0xff] %vm285_vm0, %v1134_v41 }
 0x251   : > { %v1725_v60 = vpop.eup %1724 }
 0x252   : > { %v1129_v12 = vmul.f32 0.6931472, %v1725_v60  ;;  %v1727_v43 = vpop.eup %1726 }
 0x253   : > { %v948_v47 = vmul.f32 %v1727_v43, %v932_v45  ;;  %v1729_v17 = vpop.eup %1728 }
 0x254   : > { %v1135_v16 = vadd.f32 %v1129_v12, %v1119_v36  ;;  %v949_v25 = vmul.f32 %v1729_v17, %v933_v23 }
 0x256   : > { %1139 = vst.msk [vmem:[%s2521_s6 + $0x8] sm:$0xff] %vm285_vm0, %v1135_v16 }
 0x260   : > { %v1092_v14 = vpop.xlane.xlu0 %1091 }
 0x261   : > { %v1104_v19 = vadd.f32 %v1092_v14, %v948_v47 }
 0x263   : > { %1109 = vst.msk [vmem:[#allocation3 + $0x10] sm:$0xff] %vm285_vm0, %v1104_v19 }
 0x268   : > { %v1101_v4 = vpop.xlane.xlu2 %1100 }
 0x269   : > { %v1105_v50 = vadd.f32 %v1101_v4, %v949_v25 }
 0x26a   : > { %v1124_v52 = vld [vmem:[#allocation3 + $0x10] sm:$0xff] }
 0x26b   : > { %1730 = vlog2.f32 %v1124_v52  ;;  %1110 = vst.msk [vmem:[#allocation3 + $0x18] sm:$0xff] %vm285_vm0, %v1105_v50 }
 0x271   : > { %v1731_v29 = vpop.eup %1730 }
 0x272   : > { %v1131_v33 = vmul.f32 0.6931472, %v1731_v29  ;;  %v1125_v34 = vld [vmem:[#allocation3 + $0x18] sm:$0xff] }
 0x273   : > { %1732 = vlog2.f32 %v1125_v34 }
 0x274   : > { %v1136_v5 = vadd.f32 %v1131_v33, %v1120_v51 }
 0x276   : > { %1140 = vst.msk [vmem:[%s2521_s6 + $0x10] sm:$0xff] %vm285_vm0, %v1136_v5 }
 0x279   : > { %v1733_v15 = vpop.eup %1732 }
 0x27a   : > { %v1133_v10 = vmul.f32 0.6931472, %v1733_v15 }
 0x27c   : > { %v1137_v53 = vadd.f32 %v1133_v10, %v1121_v6 }
 0x27e   : > { %1141 = vst.msk [vmem:[%s2521_s6 + $0x18] sm:$0xff] %vm285_vm0, %v1137_v53 }
 0x27f PF: > { %s15_s17 = sadd.s32 1, %s1756_s17   ;;  %s2553_s15 = smov %s1752_s16 }
 0x280   : > { %p12_p5 = scmp.ge.s32.totalorder %s15_s17, 5   ;;  %s2554_s16 = smov %s2556_s18 }
 0x282   :  { %14 = sbr.rel (!%p12_p5) target bundleno = 2 (0x2), region = 88 }

// kernel: forward.3
= control target key start
LH: loop header
LB: loop body
LE: loop exit
PB: predicated region body
PF: predicated region fallthrough
CT: control target
= control target key end

     0   :  { %13 = vsyncpa [#allocation5], 0  ;;  %s3919_s0 = inlined_call_operand.vmem [shape: bf16[4,8,128], index: 0, kind: input, shape index: {}]   ;;  %s3920_s1 = inlined_call_operand.vmem [shape: f32[4,8], index: 1, kind: input, shape index: {}]   ;;  %s3921_s2 = inlined_call_operand.vmem [shape: bf16[128,256], index: 2, kind: input, shape index: {}]   ;;  %s3922_s3 = inlined_call_operand.vmem [shape: f32[1,256], index: 3, kind: input, shape index: {}]   ;;  %s3923_s4 = inlined_call_operand.vmem [shape: bf16[96,128], index: 4, kind: input, shape index: {}]   ;;  %s3924_s5 = inlined_call_operand.hbm [shape: bf16[128,512], index: 5, kind: input, shape index: {}]   ;;  %s3925_s6 = inlined_call_operand.vmem [shape: f32[1,512], index: 6, kind: input, shape index: {}]   ;;  %s3926_s7 = inlined_call_operand.hbm [shape: bf16[128,512], index: 7, kind: input, shape index: {}]   ;;  %s3927_s8 = inlined_call_operand.vmem [shape: f32[4,24,128], index: 8, kind: output, shape index: {}]  }
   0x1   :  { %14 = vsyncpa [#allocation7], 0  ;;  %s3187_s27 = smov 0   ;;  %s3189_s28 = smov 0  }
   0x2   :  { %s3191_s29 = smov 0  }
   0x3 LB: > { %s3200_s30 = sadd.s32 4294967295, %s3136_s29   ;;  %s3202_s9 = sadd.s32 1, %s3136_s29   ;;  %s3136_s29 = sphi %s3191_s29, %s3968_s29   ;;  %s3132_s28 = sphi %s3189_s28, %s3967_s28   ;;  %s3128_s27 = sphi %s3187_s27, %s3966_s27  }
   0x4   : > { %s197_s10 = ssub.s32 %s3136_s29, %s3202_s9  ;;  %s200_s11 = sadd.s32 1, %s3132_s28 }
   0x5   : > { %p198_p0 = scmp.eq.s32.totalorder %s197_s10, 0  ;;  %p210_p1 = scmp.ne.s32.totalorder %s3132_s28, %s3128_s27 }
   0x6   : > { %p211_p2 = scmp.eq.s32.totalorder %s3200_s30, 2  ;;  %p2402_p3 = scmp.ge.s32.totalorder %s3136_s29, 1 }
   0x7   : > { %s3210_s12 = scalar_select %p198_p0, %s3132_s28, %s200_s11  }
   0x8   : > { %p3212_p4 = por %p211_p2, %p210_p1  ;;  %p224_p5 = scmp.lt.s32.totalorder %s3136_s29, 4 }
   0x9   : > { %p2403_p6 = scmp.ne.s32.totalorder %s3200_s30, 0  ;;  %p2875_p7 = scmp.eq.s32.totalorder %s3200_s30, 0 }
   0xa   : > { %p3218_p8 = pnand %p2402_p3, %p224_p5  ;;  %s247_s17 = sshll.u32 %s3924_s5, 4  ;;  %s248_s17 = int_to_ptr.hbm [resolvable:$true] %s247_s17 }
   0xb   : > { %s3138_s18 = smov [#allocation4]   ;;  %s264_s22 = sshll.u32 %s3926_s7, 4  ;;  %s265_s22 = int_to_ptr.hbm [resolvable:$true] %s264_s22 }
   0xc   : > { %p2868_p9 = pneg %p3218_p8  ;;  %s249_s19 = sshll.u32 %s3138_s18, 4  ;;  %s250_s19 = int_to_ptr.vmem [resolvable:$true] %s249_s19 }
   0xd   : > { %s3139_s23 = smov 256   ;;  %s3140_s24 = smov 16  }
   0xe   : > { %p2869_p10 = pnand %p2875_p7, %p2868_p9  ;;  %s3141_s25 = smov [#allocation6]  }
   0xf   : > { %s266_s26 = sshll.u32 %s3141_s25, 4  ;;  %291 = sbr.rel (%p3218_p8) target bundleno = 1803 (0x70b), region = 52  ;;  %s267_s26 = int_to_ptr.vmem [resolvable:$true] %s266_s26 }
  0x10   : > { %2871 = dma.hbm_to_vmem [thread:$0]  (!%p2869_p10), %s248_s17, 4096, %s250_s19, [#allocation5], %s3139_s23, %s3139_s23, %s3140_s24  }
  0x11   : > { %2874 = dma.hbm_to_vmem [thread:$0]  (!%p2869_p10), %s265_s22, 4096, %s267_s26, [#allocation7], %s3139_s23, %s3139_s23, %s3140_s24  }
  0x14   : > { %3119 = dma.done.wait (%p2875_p7), [#allocation5], 4096  }
  0x15   : > { %3121 = vsyncadd (%p2875_p7), [#allocation5], 4294963200 }
  0x16   : > { %3123 = dma.done.wait (%p2875_p7), [#allocation7], 4096  }
  0x17   : > { %3125 = vsyncadd (%p2875_p7), [#allocation7], 4294963200  ;;  %s327_s29 = sand.u32 1, %s3128_s27   ;;  %s2410_s10 = sshll.u32 %s3200_s30, 2 }
  0x18   : > { %s2409_s11 = sshll.u32 %s327_s29, 5  ;;  %p331_p11 = scmp.lt.s32.totalorder %s2410_s10, 11 }
  0x19   : > { %s3249_s18 = scalar_lea.vmem [#allocation8], %s2409_s11  ;;  %339 = sbr.rel (%p2403_p6) target bundleno = 328 (0x148), region = 64 }
  0x1a   : > { %s3970_s10 = smov (!%p331_p11, %s2410_s10), 11 }
  0x1b   : > { %s2411_s14 = sshll.u32 %s3970_s10, 2 }
  0x1c   : > { %s3247_s17 = scalar_lea.vmem %s3923_s4, %s2411_s14 }
  0x1e   : > { %v348_v0 = vld [vmem:[%s3920_s1] sm:$0xf]  ;;  %vm405_vm0 = vcmask 60416   ;;  %v350_v1 = vlaneseq  ;;  %v2471_v8 = vld [vmem:[%s3921_s2 + $0x70] sm:$0xf]  ;;  %v3271_v14 = vld [vmem:[%s3919_s0 + $0x8] sm:$0xff]  }
  0x1f   : > { %v406_v2 = vsel %vm405_vm0, %v348_v0, 0.0  ;;  %v363_v4 = vperm.slane %v348_v0, 2  ;;  %v370_v5 = vperm.slane %v348_v0, 3  ;;  %v349_v6 = vperm.slane %v348_v0, 0  ;;  %v2784_v9 = vld [vmem:[%s3921_s2 + $0x74] sm:$0xf0] }
  0x20   : > { %407 = vadd.xlane.f32.xlu0 %v406_v2  ;;  %v351_v3 = vshrl.u32 %v350_v1, 7  ;;  %v356_v7 = vperm.slane %v348_v0, 1  ;;  %v2783_v10 = vld [vmem:[%s3921_s2 + $0x74] sm:$0xf]  ;;  %v2472_v11 = vor.u32 %v2784_v9, %v2471_v8  ;;  %v2473_v12 = vld [vmem:[%s3921_s2 + $0x78] sm:$0xf0]  ;;  %v2858_v18 = vunpack.c.h.bf16 %v3271_v14 }
  0x21   : > { %v2476_v13 = vor.u32 %v2783_v10, %v2473_v12  ;;  %v2463_v15 = vld [vmem:[%s3921_s2 + $0x60] sm:$0xf]  ;;  %v2782_v16 = vld [vmem:[%s3921_s2 + $0x64] sm:$0xf0]  ;;  %v2781_v17 = vld [vmem:[%s3921_s2 + $0x64] sm:$0xf]  ;;  %v2857_v51 = vunpack.c.l.bf16 %v3271_v14 }
  0x22   : > { %2908 = vset.pattern.permute.xlu1 %v351_v3  ;;  %2907 = vset.pattern.permute.xlu0 %v351_v3  ;;  %v2464_v19 = vor.u32 %v2782_v16, %v2463_v15  ;;  %v2465_v20 = vld [vmem:[%s3921_s2 + $0x68] sm:$0xf0]  ;;  %v2455_v23 = vld [vmem:[%s3921_s2 + $0x50] sm:$0xf]  ;;  %v2780_v24 = vld [vmem:[%s3921_s2 + $0x54] sm:$0xf0] }
  0x23   : > { %2909 = vset.pattern.permute.xlu2 %v351_v3  ;;  %602 = vmatpush.bf16.msra.mxu0 %v2472_v11  ;;  %v2468_v22 = vor.u32 %v2781_v17, %v2465_v20  ;;  %v2779_v25 = vld [vmem:[%s3921_s2 + $0x54] sm:$0xf]  ;;  %v2456_v27 = vor.u32 %v2780_v24, %v2455_v23  ;;  %v2457_v28 = vld [vmem:[%s3921_s2 + $0x58] sm:$0xf0]  ;;  %v2447_v30 = vld [vmem:[%s3921_s2 + $0x40] sm:$0xf] }
  0x24   : > { %615 = vmatpush.bf16.msra.mxu1 %v2476_v13  ;;  %v2460_v29 = vor.u32 %v2779_v25, %v2457_v28  ;;  %v2778_v31 = vld [vmem:[%s3921_s2 + $0x44] sm:$0xf0]  ;;  %v2777_v32 = vld [vmem:[%s3921_s2 + $0x44] sm:$0xf]  ;;  %v2449_v35 = vld [vmem:[%s3921_s2 + $0x48] sm:$0xf0] }
  0x25   : > { %v2448_v34 = vor.u32 %v2778_v31, %v2447_v30  ;;  %v2452_v36 = vor.u32 %v2777_v32, %v2449_v35  ;;  %v2439_v38 = vld [vmem:[%s3921_s2 + $0x30] sm:$0xf]  ;;  %v2776_v39 = vld [vmem:[%s3921_s2 + $0x34] sm:$0xf0]  ;;  %v2775_v45 = vld [vmem:[%s3921_s2 + $0x34] sm:$0xf] }
  0x26   : > { %v2440_v44 = vor.u32 %v2776_v39, %v2439_v38  ;;  %v2441_v46 = vld [vmem:[%s3921_s2 + $0x38] sm:$0xf0]  ;;  %v2431_v47 = vld [vmem:[%s3921_s2 + $0x20] sm:$0xf]  ;;  %v2774_v48 = vld [vmem:[%s3921_s2 + $0x24] sm:$0xf0] }
  0x27   : > { %603 = vmatpush.bf16.msra.mxu0 %v2464_v19  ;;  %v2773_v50 = vld [vmem:[%s3921_s2 + $0x24] sm:$0xf]  ;;  %v2444_v52 = vor.u32 %v2775_v45, %v2441_v46  ;;  %v2432_v53 = vor.u32 %v2774_v48, %v2431_v47  ;;  %v2433_v54 = vld [vmem:[%s3921_s2 + $0x28] sm:$0xf0]  ;;  %v2423_v57 = vld [vmem:[%s3921_s2 + $0x10] sm:$0xf] }
  0x28   : > { %616 = vmatpush.bf16.msra.mxu1 %v2468_v22  ;;  %v2436_v56 = vor.u32 %v2773_v50, %v2433_v54  ;;  %v2772_v58 = vld [vmem:[%s3921_s2 + $0x14] sm:$0xf0]  ;;  %v2771_v63 = vld [vmem:[%s3921_s2 + $0x14] sm:$0xf]  ;;  %v2425_v0 = vld [vmem:[%s3921_s2 + $0x18] sm:$0xf0] }
  0x29   : > { %v2424_v62 = vor.u32 %v2772_v58, %v2423_v57  ;;  %v2415_v3 = vld [vmem:[%s3921_s2] sm:$0xf]  ;;  %v2428_v10 = vor.u32 %v2771_v63, %v2425_v0  ;;  %v2769_v14 = vld [vmem:[%s3921_s2 + $0x4] sm:$0xf]  ;;  %v2417_v15 = vld [vmem:[%s3921_s2 + $0x8] sm:$0xf0] }
  0x2a   : > { %368 = vperm.xlu1 %2908, %v363_v4   ;;  %v2770_v4 = vld [vmem:[%s3921_s2 + $0x4] sm:$0xf0]  ;;  %v2852_v8 = vld [vmem:[%s3919_s0] sm:$0xff]   ;;  %v2420_v24 = vor.u32 %v2769_v14, %v2417_v15 }
  0x2b   : > { %375 = vperm.xlu2 %2909, %v370_v5   ;;  %604 = vmatpush.bf16.msra.mxu0 %v2456_v27  ;;  %v2416_v11 = vor.u32 %v2770_v4, %v2415_v3  ;;  %v2854_v23 = vunpack.c.h.bf16 %v2852_v8 }
  0x2c   : > { %617 = vmatpush.bf16.msra.mxu1 %v2460_v29 }
  0x2f   : > { %605 = vmatpush.bf16.msra.mxu0 %v2448_v34 }
  0x30   : > { %618 = vmatpush.bf16.msra.mxu1 %v2452_v36 }
  0x32   : > { %354 = vperm.xlu1 %2908, %v349_v6  }
  0x33   : > { %606 = vmatpush.bf16.msra.mxu0 %v2440_v44 }
  0x34   : > { %361 = vperm.xlu0 %2907, %v356_v7   ;;  %619 = vmatpush.bf16.msra.mxu1 %v2444_v52 }
  0x37   : > { %607 = vmatpush.bf16.msra.mxu0 %v2432_v53 }
  0x38   : > { %620 = vmatpush.bf16.msra.mxu1 %v2436_v56 }
  0x3b   : > { %608 = vmatpush.bf16.msra.mxu0 %v2424_v62 }
  0x3c   : > { %621 = vmatpush.bf16.msra.mxu1 %v2428_v10 }
  0x3f   : > { %609 = vmatpush.bf16.msra.mxu0 %v2416_v11 }
  0x40   : > { %622 = vmatpush.bf16.msra.mxu1 %v2420_v24 }
  0x85   : > { %v376_v21 = vpop.permute.xlu2 %375 }
  0x86   : > { %v380_v26 = vmul.f32 %v2858_v18, %v376_v21  ;;  %v2853_v18 = vunpack.c.l.bf16 %v2852_v8 }
  0x88   : > { %v399_v33 = vrot.slane %v380_v26, 4 }
  0x8a   : > { %v400_v43 = vadd.f32 %v399_v33, %v380_v26 }
  0x8c   : > { %v401_v49 = vrot.slane %v400_v43, 2 }
  0x8e   : > { %v402_v60 = vadd.f32 %v401_v49, %v400_v43 }
  0x90   : > { %v403_v12 = vrot.slane %v402_v60, 1 }
  0x92   : > { %v404_v25 = vadd.f32 %v403_v12, %v402_v60 }
  0x93   : > { %v3310_v37 = vpop.xlane.xlu0 %407 }
  0x94   : > { %v3319_v40 = vrot.slane %v3310_v37, 1  ;;  %v3322_v41 = vrot.slane %v3310_v37, 2  ;;  %v3325_v42 = vrot.slane %v3310_v37, 3  ;;  %2910 = vrcp.f32 %v3310_v37 }
  0x95   : > { %v426_v27 = vand.u32 2147483647, %v3310_v37  ;;  %vm422_vm1 = vweird.f32 %v3310_v37  ;;  %v428_v31 = vand.u32 2147483648, %v3310_v37 }
  0x96   : > { %2912 = vrcp.f32 %v3319_v40  ;;  %vm452_vm2 = vweird.f32 %v3322_v41  ;;  %v458_v34 = vand.u32 2147483648, %v3322_v41  ;;  %v471_v38 = vand.u32 2147483647, %v3325_v42 }
  0x97   : > { %2914 = vrcp.f32 %v3322_v41  ;;  %v473_v47 = vand.u32 2147483648, %v3325_v42  ;;  %vm467_vm5 = vweird.f32 %v3325_v42  ;;  %vm437_vm7 = vweird.f32 %v3319_v40 }
  0x98   : > { %2916 = vrcp.f32 %v3325_v42  ;;  %v459_v52 = vor.u32 1.1754944e-38, %v458_v34  ;;  %vm472_vm10 = vcmp.eq.f32.partialorder %v471_v38, 8.507059e+37  ;;  %v443_v3 = vand.u32 2147483648, %v3319_v40 }
  0x99   : > { %v474_v62 = vor.u32 1.1754944e-38, %v473_v47  ;;  %vm427_vm14 = vcmp.eq.f32.partialorder %v426_v27, 8.507059e+37  ;;  %v429_v10 = vor.u32 1.1754944e-38, %v428_v31 }
  0x9a   : > { %v3350_v55 = vpop.eup %2910  ;;  %v444_v15 = vor.u32 1.1754944e-38, %v443_v3 }
  0x9b   : > { %v418_v6 = vmul.f32 %v3350_v55, %v3310_v37  ;;  %vm423_vm6 = vweird.f32 %v3350_v55 }
  0x9c   : > { %v3358_v59 = vpop.eup %2912  ;;  %v369_v61 = vpop.permute.xlu1 %368  ;;  %vm3435_vm13 = vmor %vm422_vm1, %vm423_vm6  ;;  %vm512_vm1 = vcmask 1041409  }
  0x9d   : > { %v3366_v1 = vpop.eup %2914  ;;  %v379_v2 = vmul.f32 %v2857_v51, %v369_v61  ;;  %v433_v19 = vmul.f32 %v3358_v59, %v3319_v40  ;;  %v419_v20 = vsub.f32 1.0, %v418_v6  ;;  %v456_v51 = vand.u32 2147483647, %v3322_v41 }
  0x9e   : > { %v3374_v5 = vpop.eup %2916  ;;  %v448_v7 = vmul.f32 %v3366_v1, %v3322_v41  ;;  %vm453_vm4 = vweird.f32 %v3366_v1  ;;  %vm438_vm11 = vweird.f32 %v3358_v59 }
  0x9f   : > { %v393_v9 = vrot.slane %v379_v2, 4  ;;  %v463_v16 = vmul.f32 %v3374_v5, %v3325_v42  ;;  %v434_v33 = vsub.f32 1.0, %v433_v19  ;;  %v420_v35 = vmul.f32 %v3350_v55, %v419_v20  ;;  %vm3418_vm9 = vmor %vm452_vm2, %vm453_vm4 }
  0xa0   : > { %v449_v13 = vsub.f32 1.0, %v448_v7  ;;  %vm468_vm3 = vweird.f32 %v3374_v5  ;;  %vm457_vm12 = vcmp.eq.f32.partialorder %v456_v51, 8.507059e+37  ;;  %vm439_vm15 = vmor %vm437_vm7, %vm438_vm11  ;;  %vm515_vm2 = vcmask 1042434  }
  0xa1   : > { %v394_v17 = vadd.f32 %v393_v9, %v379_v2  ;;  %v464_v21 = vsub.f32 1.0, %v463_v16  ;;  %v435_v49 = vmul.f32 %v3358_v59, %v434_v33  ;;  %vm3412_vm8 = vmor %vm467_vm5, %vm468_vm3  ;;  %v421_v56 = vadd.f32 %v3350_v55, %v420_v35 }
  0xa2   : > { %v450_v26 = vmul.f32 %v3366_v1, %v449_v13  ;;  %vm518_vm3 = vcmask 1043459  }
  0xa3   : > { %v395_v22 = vrot.slane %v394_v17, 2  ;;  %v465_v29 = vmul.f32 %v3374_v5, %v464_v21  ;;  %v436_v63 = vadd.f32 %v3358_v59, %v435_v49  ;;  %v425_v6 = vsel %vm3435_vm13, %v3350_v55, %v421_v56 }
  0xa4   : > { %v355_v28 = vpop.permute.xlu1 %354  ;;  %v451_v45 = vadd.f32 %v3366_v1, %v450_v26  ;;  %v430_v14 = vsel %vm427_vm14, %v429_v10, %v425_v6 }
  0xa5   : > { %v396_v30 = vadd.f32 %v395_v22, %v394_v17  ;;  %v377_v32 = vmul.f32 %v2853_v18, %v355_v28  ;;  %v466_v44 = vadd.f32 %v3374_v5, %v465_v29  ;;  %v440_v11 = vsel %vm439_vm15, %v3358_v59, %v436_v63 }
  0xa6   : > { %v362_v36 = vpop.permute.xlu0 %361  ;;  %v455_v60 = vsel %vm3418_vm9, %v3366_v1, %v451_v45  ;;  %v441_v1 = vand.u32 2147483647, %v3319_v40 }
  0xa7   : > { %v381_v39 = vrot.slane %v377_v32, 4  ;;  %v378_v43 = vmul.f32 %v2854_v23, %v362_v36  ;;  %v397_v46 = vrot.slane %v396_v30, 1  ;;  %v470_v58 = vsel %vm3412_vm8, %v3374_v5, %v466_v44 }
  0xa8   : > { %v475_v4 = vsel %vm472_vm10, %v474_v62, %v470_v58  ;;  %v460_v5 = vsel %vm457_vm12, %v459_v52, %v455_v60  ;;  %vm442_vm0 = vcmp.eq.f32.partialorder %v441_v1, 8.507059e+37 }
  0xa9   : > { %v382_v48 = vadd.f32 %v381_v39, %v377_v32  ;;  %v387_v50 = vrot.slane %v378_v43, 4  ;;  %v398_v61 = vadd.f32 %v397_v46, %v396_v30  ;;  %v476_v13 = vmul.f32 %v475_v4, %v404_v25  ;;  %v497_v32 = vld [vmem:[%s3922_s3] sm:$0x3] }
  0xaa   : > { %v445_v55 = vsel %vm442_vm0, %v444_v15, %v440_v11  ;;  %v499_v33 = vperm.slane %v497_v32, 0  ;;  %v500_v34 = vperm.slane %v497_v32, 1 }
  0xab   : > { %v383_v42 = vrot.slane %v382_v48, 2  ;;  %v388_v57 = vadd.f32 %v387_v50, %v378_v43  ;;  %v461_v9 = vmul.f32 %v460_v5, %v398_v61  ;;  %v496_v20 = vpack.c.bf16 %v476_v13, %v476_v13 }
  0xad   : > { %v384_v41 = vadd.f32 %v383_v42, %v382_v48  ;;  %v389_v0 = vrot.slane %v388_v57, 2  ;;  %v495_v18 = vpack.c.bf16 %v461_v9, %v461_v9  ;;  %v510_v40 = vunpack.c.l.b16 %v496_v20 }
  0xaf   : > { %v385_v7 = vrot.slane %v384_v41, 1  ;;  %v390_v8 = vadd.f32 %v389_v0, %v388_v57  ;;  %v509_v23 = vunpack.c.l.b16 %v495_v18  ;;  %v517_v28 = vrot.slane %v510_v40, 5 }
  0xb1   : > { %v386_v37 = vadd.f32 %v385_v7, %v384_v41  ;;  %v391_v12 = vrot.slane %v390_v8, 1  ;;  %v514_v59 = vrot.slane %v509_v23, 6 }
  0xb3   : > { %v431_v16 = vmul.f32 %v430_v14, %v386_v37  ;;  %v392_v17 = vadd.f32 %v391_v12, %v390_v8 }
  0xb5   : > { %v446_v19 = vmul.f32 %v445_v55, %v392_v17  ;;  %v493_v21 = vpack.c.bf16 %v431_v16, %v431_v16 }
  0xb7   : > { %v494_v22 = vpack.c.bf16 %v446_v19, %v446_v19  ;;  %v507_v26 = vunpack.c.l.b16 %v493_v21 }
  0xb9   : > { %v508_v24 = vunpack.c.l.b16 %v494_v22 }
  0xbb   : > { %v511_v27 = vrot.slane %v508_v24, 7 }
  0xbd   : > { %v513_v25 = vsel %vm512_vm1, %v511_v27, %v507_v26 }
  0xbe   : > { %v516_v29 = vsel %vm515_vm2, %v514_v59, %v513_v25 }
  0xbf   : > { %v519_v30 = vsel %vm518_vm3, %v517_v28, %v516_v29 }
  0xc0   : > { %v520_v31 = vpack.c.b16 %v519_v30, %v519_v30 }
  0xc2   : > { %610 = vmatmul.bf16.vlgmr.msra.gmra.mxu0 %v520_v31  ;;  %623 = vmatmul.bf16.vlgmr.msra.gmra.mxu1 %v520_v31 }
 0x13f   : > { %v611_v35 = vpop.f32.mrf.mxu0  ;;  %v624_v36 = vpop.f32.mrf.mxu1 }
 0x140   : > { %v612_v38 = vadd.f32 %v611_v35, %v499_v33  ;;  %v625_v39 = vadd.f32 %v624_v36, %v500_v34 }
 0x142   : > { %628 = vst [vmem:[#allocation2] sm:$0xf] %v612_v38 }
 0x143   : > { %629 = vst [vmem:[#allocation3] sm:$0xf] %v625_v39 }
 0x147   : > { %v613_v43 = vpop.f32.mrf.mxu0  ;;  %v626_v44 = vpop.f32.mrf.mxu1 }
 0x148 PF: > { %v2599_v45 = vld [vmem:[#allocation4 + $0xe0] sm:$0xf]  ;;  %v2817_v46 = vld [vmem:[#allocation4 + $0xec] sm:$0xf0]  ;;  %v2815_v47 = vld [vmem:[#allocation4 + $0xe4] sm:$0xf] }
 0x149   : > { %v2600_v48 = vor.u32 %v2817_v46, %v2599_v45  ;;  %v2601_v49 = vld [vmem:[#allocation4 + $0xf0] sm:$0xf0]  ;;  %v2607_v50 = vld [vmem:[#allocation4 + $0xe8] sm:$0xf]  ;;  %v2818_v51 = vld [vmem:[#allocation4 + $0xf4] sm:$0xf0] }
 0x14a   : > { %v2604_v52 = vor.u32 %v2815_v47, %v2601_v49  ;;  %v2608_v53 = vor.u32 %v2818_v51, %v2607_v50  ;;  %v2816_v54 = vld [vmem:[#allocation4 + $0xec] sm:$0xf]  ;;  %v2609_v56 = vld [vmem:[#allocation4 + $0xf8] sm:$0xf0]  ;;  %v2583_v42 = vld [vmem:[#allocation4 + $0xc0] sm:$0xf] }
 0x14b   : > { %848 = vmatpush.bf16.msra.mxu0 %v2600_v48  ;;  %v2612_v57 = vor.u32 %v2816_v54, %v2609_v56  ;;  %v2813_v58 = vld [vmem:[#allocation4 + $0xcc] sm:$0xf0]  ;;  %v2811_v60 = vld [vmem:[#allocation4 + $0xc4] sm:$0xf]  ;;  %v2585_v61 = vld [vmem:[#allocation4 + $0xd0] sm:$0xf0] }
 0x14c   : > { %867 = vmatpush.bf16.msra.mxu1 %v2604_v52  ;;  %886 = vmatpush.bf16.msra.mxu2 %v2608_v53  ;;  %v2584_v62 = vor.u32 %v2813_v58, %v2583_v42  ;;  %v2588_v41 = vor.u32 %v2811_v60, %v2585_v61  ;;  %v2591_v63 = vld [vmem:[#allocation4 + $0xc8] sm:$0xf]  ;;  %v2814_v0 = vld [vmem:[#allocation4 + $0xd4] sm:$0xf0]  ;;  %v2812_v2 = vld [vmem:[#allocation4 + $0xcc] sm:$0xf] }
 0x14d   : > { %905 = vmatpush.bf16.msra.mxu3 %v2612_v57  ;;  %v2592_v1 = vor.u32 %v2814_v0, %v2591_v63  ;;  %v2593_v3 = vld [vmem:[#allocation4 + $0xd8] sm:$0xf0]  ;;  %v2567_v4 = vld [vmem:[#allocation4 + $0xa0] sm:$0xf]  ;;  %v2809_v5 = vld [vmem:[#allocation4 + $0xac] sm:$0xf0] }
 0x14e   : > { %v2596_v6 = vor.u32 %v2812_v2, %v2593_v3  ;;  %v2807_v7 = vld [vmem:[#allocation4 + $0xa4] sm:$0xf]  ;;  %v2569_v8 = vld [vmem:[#allocation4 + $0xb0] sm:$0xf0]  ;;  %v2575_v9 = vld [vmem:[#allocation4 + $0xa8] sm:$0xf]  ;;  %v2568_v10 = vor.u32 %v2809_v5, %v2567_v4 }
 0x14f   : > { %849 = vmatpush.bf16.msra.mxu0 %v2584_v62  ;;  %v2810_v37 = vld [vmem:[#allocation4 + $0xb4] sm:$0xf0]  ;;  %v2808_v11 = vld [vmem:[#allocation4 + $0xac] sm:$0xf]  ;;  %v2577_v12 = vld [vmem:[#allocation4 + $0xb8] sm:$0xf0]  ;;  %v2572_v13 = vor.u32 %v2807_v7, %v2569_v8 }
 0x150   : > { %868 = vmatpush.bf16.msra.mxu1 %v2588_v41  ;;  %887 = vmatpush.bf16.msra.mxu2 %v2592_v1  ;;  %v2576_v14 = vor.u32 %v2810_v37, %v2575_v9  ;;  %v2551_v15 = vld [vmem:[#allocation4 + $0x80] sm:$0xf]  ;;  %v2805_v16 = vld [vmem:[#allocation4 + $0x8c] sm:$0xf0]  ;;  %v2803_v17 = vld [vmem:[#allocation4 + $0x84] sm:$0xf]  ;;  %v2580_v18 = vor.u32 %v2808_v11, %v2577_v12 }
 0x151   : > { %906 = vmatpush.bf16.msra.mxu3 %v2596_v6  ;;  %v2553_v55 = vld [vmem:[#allocation4 + $0x90] sm:$0xf0]  ;;  %v2559_v19 = vld [vmem:[#allocation4 + $0x88] sm:$0xf]  ;;  %v2806_v20 = vld [vmem:[#allocation4 + $0x94] sm:$0xf0]  ;;  %v2552_v23 = vor.u32 %v2805_v16, %v2551_v15 }
 0x152   : > { %v2804_v21 = vld [vmem:[#allocation4 + $0x8c] sm:$0xf]  ;;  %v2561_v22 = vld [vmem:[#allocation4 + $0x98] sm:$0xf0]  ;;  %v2556_v24 = vor.u32 %v2803_v17, %v2553_v55  ;;  %v2560_v40 = vor.u32 %v2806_v20, %v2559_v19  ;;  %v2535_v26 = vld [vmem:[#allocation4 + $0x60] sm:$0xf] }
 0x153   : > { %850 = vmatpush.bf16.msra.mxu0 %v2568_v10  ;;  %v2801_v27 = vld [vmem:[#allocation4 + $0x6c] sm:$0xf0]  ;;  %v2799_v59 = vld [vmem:[#allocation4 + $0x64] sm:$0xf]  ;;  %v2564_v25 = vor.u32 %v2804_v21, %v2561_v22  ;;  %v2537_v28 = vld [vmem:[#allocation4 + $0x70] sm:$0xf0] }
 0x154   : > { %869 = vmatpush.bf16.msra.mxu1 %v2572_v13  ;;  %888 = vmatpush.bf16.msra.mxu2 %v2576_v14  ;;  %v2543_v29 = vld [vmem:[#allocation4 + $0x68] sm:$0xf]  ;;  %v2802_v30 = vld [vmem:[#allocation4 + $0x74] sm:$0xf0]  ;;  %v2800_v31 = vld [vmem:[#allocation4 + $0x6c] sm:$0xf]  ;;  %v2536_v33 = vor.u32 %v2801_v27, %v2535_v26  ;;  %v2540_v34 = vor.u32 %v2799_v59, %v2537_v28 }
 0x155   : > { %907 = vmatpush.bf16.msra.mxu3 %v2580_v18  ;;  %v2545_v32 = vld [vmem:[#allocation4 + $0x78] sm:$0xf0]  ;;  %v2544_v35 = vor.u32 %v2802_v30, %v2543_v29  ;;  %v2519_v36 = vld [vmem:[#allocation4 + $0x40] sm:$0xf]  ;;  %v2797_v38 = vld [vmem:[#allocation4 + $0x4c] sm:$0xf0] }
 0x156   : > { %v2795_v39 = vld [vmem:[#allocation4 + $0x44] sm:$0xf]  ;;  %v2548_v43 = vor.u32 %v2800_v31, %v2545_v32  ;;  %v2521_v44 = vld [vmem:[#allocation4 + $0x50] sm:$0xf0]  ;;  %v2527_v45 = vld [vmem:[#allocation4 + $0x48] sm:$0xf]  ;;  %v2520_v49 = vor.u32 %v2797_v38, %v2519_v36 }
 0x157   : > { %851 = vmatpush.bf16.msra.mxu0 %v2552_v23  ;;  %v2798_v46 = vld [vmem:[#allocation4 + $0x54] sm:$0xf0]  ;;  %v2796_v47 = vld [vmem:[#allocation4 + $0x4c] sm:$0xf]  ;;  %v2529_v48 = vld [vmem:[#allocation4 + $0x58] sm:$0xf0]  ;;  %v2524_v50 = vor.u32 %v2795_v39, %v2521_v44 }
 0x158   : > { %870 = vmatpush.bf16.msra.mxu1 %v2556_v24  ;;  %889 = vmatpush.bf16.msra.mxu2 %v2560_v40  ;;  %v2528_v51 = vor.u32 %v2798_v46, %v2527_v45  ;;  %v2503_v52 = vld [vmem:[#allocation4 + $0x20] sm:$0xf]  ;;  %v2793_v53 = vld [vmem:[#allocation4 + $0x2c] sm:$0xf0]  ;;  %v2791_v54 = vld [vmem:[#allocation4 + $0x24] sm:$0xf]  ;;  %v2532_v56 = vor.u32 %v2796_v47, %v2529_v48 }
 0x159   : > { %908 = vmatpush.bf16.msra.mxu3 %v2564_v25  ;;  %v2505_v42 = vld [vmem:[#allocation4 + $0x30] sm:$0xf0]  ;;  %v2511_v57 = vld [vmem:[#allocation4 + $0x28] sm:$0xf]  ;;  %v2794_v58 = vld [vmem:[#allocation4 + $0x34] sm:$0xf0]  ;;  %v2504_v62 = vor.u32 %v2793_v53, %v2503_v52 }
 0x15a   : > { %v2792_v60 = vld [vmem:[#allocation4 + $0x2c] sm:$0xf]  ;;  %v2513_v61 = vld [vmem:[#allocation4 + $0x38] sm:$0xf0]  ;;  %v2487_v41 = vld [vmem:[#allocation4] sm:$0xf]  ;;  %v2508_v63 = vor.u32 %v2791_v54, %v2505_v42  ;;  %v2512_v0 = vor.u32 %v2794_v58, %v2511_v57 }
 0x15b   : > { %852 = vmatpush.bf16.msra.mxu0 %v2536_v33  ;;  %v2789_v2 = vld [vmem:[#allocation4 + $0xc] sm:$0xf0]  ;;  %v2787_v1 = vld [vmem:[#allocation4 + $0x4] sm:$0xf]  ;;  %v2489_v3 = vld [vmem:[#allocation4 + $0x10] sm:$0xf0]  ;;  %v2516_v4 = vor.u32 %v2792_v60, %v2513_v61 }
 0x15c   : > { %871 = vmatpush.bf16.msra.mxu1 %v2540_v34  ;;  %890 = vmatpush.bf16.msra.mxu2 %v2544_v35  ;;  %v2495_v5 = vld [vmem:[#allocation4 + $0x8] sm:$0xf]  ;;  %v2790_v6 = vld [vmem:[#allocation4 + $0x14] sm:$0xf0]  ;;  %v2788_v7 = vld [vmem:[#allocation4 + $0xc] sm:$0xf]  ;;  %v2488_v37 = vor.u32 %v2789_v2, %v2487_v41  ;;  %v2492_v13 = vor.u32 %v2787_v1, %v2489_v3 }
 0x15d   : > { %909 = vmatpush.bf16.msra.mxu3 %v2548_v43  ;;  %v2497_v8 = vld [vmem:[#allocation4 + $0x18] sm:$0xf0]  ;;  %v2727_v9 = vld [vmem:[#allocation6 + $0xe0] sm:$0xf]  ;;  %v2849_v10 = vld [vmem:[#allocation6 + $0xec] sm:$0xf0]  ;;  %v2496_v14 = vor.u32 %v2790_v6, %v2495_v5 }
 0x15e   : > { %v2847_v11 = vld [vmem:[#allocation6 + $0xe4] sm:$0xf]  ;;  %v2729_v12 = vld [vmem:[#allocation6 + $0xf0] sm:$0xf0]  ;;  %v2500_v16 = vor.u32 %v2788_v7, %v2497_v8  ;;  %v3451_v17 = vor.u32 %v2849_v10, %v2727_v9  ;;  %v2735_v18 = vld [vmem:[#allocation6 + $0xe8] sm:$0xf] }
 0x15f   : > { %853 = vmatpush.bf16.msra.mxu0 %v2520_v49  ;;  %v2785_v15 = vld [vmem:[%s3247_s17] sm:$0xff]  ;;  %v2850_v55 = vld [vmem:[#allocation6 + $0xf4] sm:$0xf0]  ;;  %v2848_v19 = vld [vmem:[#allocation6 + $0xec] sm:$0xf]  ;;  %v3453_v20 = vor.u32 %v2847_v11, %v2729_v12  ;;  %s2766_s15 = sshll.u32 (%p3212_p4), %s3200_s30, 3 }
 0x160   : > { %872 = vmatpush.bf16.msra.mxu1 %v2524_v50  ;;  %891 = vmatpush.bf16.msra.mxu2 %v2528_v51  ;;  %v2737_v21 = vld [vmem:[#allocation6 + $0xf8] sm:$0xf0]  ;;  %v2711_v22 = vld [vmem:[#allocation6 + $0xc0] sm:$0xf]  ;;  %v2845_v23 = vld [vmem:[#allocation6 + $0xcc] sm:$0xf0]  ;;  %v3455_v26 = vor.u32 %v2850_v55, %v2735_v18  ;;  %s2282_s20 = scalar_lea.vmem (%p3212_p4), %s3927_s8, %s2766_s15 }
 0x161   : > { %910 = vmatpush.bf16.msra.mxu3 %v2532_v56  ;;  %v2843_v24 = vld [vmem:[#allocation6 + $0xc4] sm:$0xf]  ;;  %v2713_v40 = vld [vmem:[#allocation6 + $0xd0] sm:$0xf0]  ;;  %v3458_v27 = vor.u32 %v2848_v19, %v2737_v21  ;;  %v3460_v59 = vor.u32 %v2845_v23, %v2711_v22  ;;  %v2719_v25 = vld [vmem:[#allocation6 + $0xc8] sm:$0xf] }
 0x162   : > { %v2846_v28 = vld [vmem:[#allocation6 + $0xd4] sm:$0xf0]  ;;  %v2844_v29 = vld [vmem:[#allocation6 + $0xcc] sm:$0xf]  ;;  %v3463_v30 = vor.u32 %v2843_v24, %v2713_v40  ;;  %v2721_v31 = vld [vmem:[#allocation6 + $0xd8] sm:$0xf0] }
 0x163   : > { %854 = vmatpush.bf16.msra.mxu0 %v2504_v62  ;;  %v2695_v32 = vld [vmem:[#allocation6 + $0xa0] sm:$0xf]  ;;  %v2841_v33 = vld [vmem:[#allocation6 + $0xac] sm:$0xf0]  ;;  %v2839_v34 = vld [vmem:[#allocation6 + $0xa4] sm:$0xf]  ;;  %v3466_v36 = vor.u32 %v2846_v28, %v2719_v25  ;;  %v3470_v38 = vor.u32 %v2844_v29, %v2721_v31 }
 0x164   : > { %873 = vmatpush.bf16.msra.mxu1 %v2508_v63  ;;  %892 = vmatpush.bf16.msra.mxu2 %v2512_v0  ;;  %v2697_v35 = vld [vmem:[#allocation6 + $0xb0] sm:$0xf0]  ;;  %v3472_v39 = vor.u32 %v2841_v33, %v2695_v32  ;;  %v2703_v43 = vld [vmem:[#allocation6 + $0xa8] sm:$0xf]  ;;  %v2842_v44 = vld [vmem:[#allocation6 + $0xb4] sm:$0xf0] }
 0x165   : > { %911 = vmatpush.bf16.msra.mxu3 %v2516_v4  ;;  %v2840_v45 = vld [vmem:[#allocation6 + $0xac] sm:$0xf]  ;;  %v3475_v46 = vor.u32 %v2839_v34, %v2697_v35  ;;  %v2705_v47 = vld [vmem:[#allocation6 + $0xb8] sm:$0xf0]  ;;  %v2679_v48 = vld [vmem:[#allocation6 + $0x80] sm:$0xf]  ;;  %v3478_v52 = vor.u32 %v2842_v44, %v2703_v43 }
 0x166   : > { %v2837_v49 = vld [vmem:[#allocation6 + $0x8c] sm:$0xf0]  ;;  %v2835_v50 = vld [vmem:[#allocation6 + $0x84] sm:$0xf]  ;;  %v2681_v51 = vld [vmem:[#allocation6 + $0x90] sm:$0xf0]  ;;  %v3482_v53 = vor.u32 %v2840_v45, %v2705_v47 }
 0x167   : > { %855 = vmatpush.bf16.msra.mxu0 %v2488_v37  ;;  %v3484_v54 = vor.u32 %v2837_v49, %v2679_v48  ;;  %v2687_v56 = vld [vmem:[#allocation6 + $0x88] sm:$0xf]  ;;  %v2838_v42 = vld [vmem:[#allocation6 + $0x94] sm:$0xf0]  ;;  %v2836_v57 = vld [vmem:[#allocation6 + $0x8c] sm:$0xf]  ;;  %v3487_v58 = vor.u32 %v2835_v50, %v2681_v51 }
 0x168   : > { %874 = vmatpush.bf16.msra.mxu1 %v2492_v13  ;;  %893 = vmatpush.bf16.msra.mxu2 %v2496_v14  ;;  %v2689_v60 = vld [vmem:[#allocation6 + $0x98] sm:$0xf0]  ;;  %v2663_v61 = vld [vmem:[#allocation6 + $0x60] sm:$0xf]  ;;  %v2833_v62 = vld [vmem:[#allocation6 + $0x6c] sm:$0xf0]  ;;  %v3490_v0 = vor.u32 %v2838_v42, %v2687_v56 }
 0x169   : > { %912 = vmatpush.bf16.msra.mxu3 %v2500_v16  ;;  %v2831_v41 = vld [vmem:[#allocation6 + $0x64] sm:$0xf]  ;;  %v2665_v63 = vld [vmem:[#allocation6 + $0x70] sm:$0xf0]  ;;  %v2786_v2 = vld [vmem:[%s3247_s17 + $0x8] sm:$0xff]  ;;  %v3495_v1 = vor.u32 %v2836_v57, %v2689_v60  ;;  %v3497_v3 = vor.u32 %v2833_v62, %v2663_v61 }
 0x16a   : > { %856 = vmatmul.bf16.vlgmr.msra.gmra.mxu0 %v2785_v15  ;;  %v2671_v4 = vld [vmem:[#allocation6 + $0x68] sm:$0xf]  ;;  %v2834_v5 = vld [vmem:[#allocation6 + $0x74] sm:$0xf0]  ;;  %v2832_v6 = vld [vmem:[#allocation6 + $0x6c] sm:$0xf]  ;;  %v3500_v7 = vor.u32 %v2831_v41, %v2665_v63 }
 0x16b   : > { %1119 = vmatpush.bf16.msrb.mxu0 %v3451_v17  ;;  %875 = vmatmul.bf16.vlgmr.msra.gmra.mxu1 %v2785_v15  ;;  %v2673_v8 = vld [vmem:[#allocation6 + $0x78] sm:$0xf0]  ;;  %v2647_v9 = vld [vmem:[#allocation6 + $0x40] sm:$0xf]  ;;  %v2829_v10 = vld [vmem:[#allocation6 + $0x4c] sm:$0xf0]  ;;  %v3503_v12 = vor.u32 %v2834_v5, %v2671_v4 }
 0x16c   : > { %1132 = vmatpush.bf16.msrb.mxu1 %v3453_v20  ;;  %894 = vmatmul.bf16.vlgmr.msra.gmra.mxu2 %v2785_v15  ;;  %v2827_v37 = vld [vmem:[#allocation6 + $0x44] sm:$0xf]  ;;  %v2649_v11 = vld [vmem:[#allocation6 + $0x50] sm:$0xf0]  ;;  %v3507_v13 = vor.u32 %v2832_v6, %v2673_v8  ;;  %v3509_v14 = vor.u32 %v2829_v10, %v2647_v9  ;;  %v2830_v16 = vld [vmem:[#allocation6 + $0x54] sm:$0xf0] }
 0x16d   : > { %913 = vmatmul.bf16.vlgmr.msra.gmra.mxu3 %v2785_v15  ;;  %1145 = vmatpush.bf16.msrb.mxu2 %v3455_v26  ;;  %v2655_v15 = vld [vmem:[#allocation6 + $0x48] sm:$0xf]  ;;  %v2828_v18 = vld [vmem:[#allocation6 + $0x4c] sm:$0xf]  ;;  %v3512_v55 = vor.u32 %v2827_v37, %v2649_v11  ;;  %v2657_v19 = vld [vmem:[#allocation6 + $0x58] sm:$0xf0] }
 0x16e   : > { %1158 = vmatpush.bf16.msrb.mxu3 %v3458_v27  ;;  %v2631_v21 = vld [vmem:[#allocation6 + $0x20] sm:$0xf]  ;;  %v2825_v22 = vld [vmem:[#allocation6 + $0x2c] sm:$0xf0]  ;;  %v2823_v23 = vld [vmem:[#allocation6 + $0x24] sm:$0xf]  ;;  %v3515_v40 = vor.u32 %v2830_v16, %v2655_v15  ;;  %v3519_v25 = vor.u32 %v2828_v18, %v2657_v19 }
 0x16f   : > { %1120 = vmatpush.bf16.msrb.mxu0 %v3460_v59  ;;  %v2633_v24 = vld [vmem:[#allocation6 + $0x30] sm:$0xf0]  ;;  %v3521_v28 = vor.u32 %v2825_v22, %v2631_v21  ;;  %v2639_v29 = vld [vmem:[#allocation6 + $0x28] sm:$0xf]  ;;  %v2826_v31 = vld [vmem:[#allocation6 + $0x34] sm:$0xf0] }
 0x170   : > { %1133 = vmatpush.bf16.msrb.mxu1 %v3463_v30  ;;  %v2824_v32 = vld [vmem:[#allocation6 + $0x2c] sm:$0xf]  ;;  %v3524_v33 = vor.u32 %v2823_v23, %v2633_v24  ;;  %v2641_v34 = vld [vmem:[#allocation6 + $0x38] sm:$0xf0]  ;;  %v2615_v35 = vld [vmem:[#allocation6] sm:$0xf]  ;;  %v3527_v47 = vor.u32 %v2826_v31, %v2639_v29 }
 0x171   : > { %1146 = vmatpush.bf16.msrb.mxu2 %v3466_v36  ;;  %v2821_v43 = vld [vmem:[#allocation6 + $0xc] sm:$0xf0]  ;;  %v2819_v44 = vld [vmem:[#allocation6 + $0x4] sm:$0xf]  ;;  %v2617_v45 = vld [vmem:[#allocation6 + $0x10] sm:$0xf0]  ;;  %v3531_v48 = vor.u32 %v2824_v32, %v2641_v34 }
 0x172   : > { %1159 = vmatpush.bf16.msrb.mxu3 %v3470_v38  ;;  %v3533_v49 = vor.u32 %v2821_v43, %v2615_v35  ;;  %v2623_v50 = vld [vmem:[#allocation6 + $0x8] sm:$0xf]  ;;  %v2822_v51 = vld [vmem:[#allocation6 + $0x14] sm:$0xf0]  ;;  %v3536_v56 = vor.u32 %v2819_v44, %v2617_v45  ;;  %v2820_v42 = vld [vmem:[#allocation6 + $0xc] sm:$0xf] }
 0x173   : > { %1121 = vmatpush.bf16.msrb.mxu0 %v3472_v39  ;;  %v2625_v57 = vld [vmem:[#allocation6 + $0x18] sm:$0xf0]  ;;  %v924_v60 = vld [vmem:[#allocation2] sm:$0xf]  ;;  %v3539_v61 = vor.u32 %v2822_v51, %v2623_v50  ;;  %v666_v4 = vld [vmem:[%s3925_s6] sm:$0xf] }
 0x174   : > { %1134 = vmatpush.bf16.msrb.mxu1 %v3475_v46  ;;  %v3543_v62 = vor.u32 %v2820_v42, %v2625_v57  ;;  %v958_v41 = vpack.c.bf16 %v924_v60, %v924_v60  ;;  %v668_v5 = vperm.slane %v666_v4, 0  ;;  %v669_v8 = vperm.slane %v666_v4, 1 }
 0x175   : > { %1147 = vmatpush.bf16.msrb.mxu2 %v3478_v52  ;;  %v670_v16 = vperm.slane %v666_v4, 2  ;;  %v671_v18 = vperm.slane %v666_v4, 3 }
 0x176   : > { %1160 = vmatpush.bf16.msrb.mxu3 %v3482_v53 }
 0x177   : > { %1122 = vmatpush.bf16.msrb.mxu0 %v3484_v54 }
 0x178   : > { %1135 = vmatpush.bf16.msrb.mxu1 %v3487_v58 }
 0x179   : > { %1148 = vmatpush.bf16.msrb.mxu2 %v3490_v0 }
 0x17a   : > { %1161 = vmatpush.bf16.msrb.mxu3 %v3495_v1  ;;  %861 = vmatmul.bf16.gmra.mxu0 %v2786_v2 }
 0x17b   : > { %1123 = vmatpush.bf16.msrb.mxu0 %v3497_v3  ;;  %880 = vmatmul.bf16.gmra.mxu1 %v2786_v2 }
 0x17c   : > { %1136 = vmatpush.bf16.msrb.mxu1 %v3500_v7  ;;  %899 = vmatmul.bf16.gmra.mxu2 %v2786_v2 }
 0x17d   : > { %918 = vmatmul.bf16.gmra.mxu3 %v2786_v2  ;;  %1149 = vmatpush.bf16.msrb.mxu2 %v3503_v12 }
 0x17e   : > { %1162 = vmatpush.bf16.msrb.mxu3 %v3507_v13 }
 0x17f   : > { %1124 = vmatpush.bf16.msrb.mxu0 %v3509_v14 }
 0x180   : > { %1137 = vmatpush.bf16.msrb.mxu1 %v3512_v55 }
 0x181   : > { %1150 = vmatpush.bf16.msrb.mxu2 %v3515_v40 }
 0x182   : > { %1163 = vmatpush.bf16.msrb.mxu3 %v3519_v25 }
 0x183   : > { %1125 = vmatpush.bf16.msrb.mxu0 %v3521_v28 }
 0x184   : > { %1138 = vmatpush.bf16.msrb.mxu1 %v3524_v33 }
 0x185   : > { %1151 = vmatpush.bf16.msrb.mxu2 %v3527_v47 }
 0x186   : > { %1164 = vmatpush.bf16.msrb.mxu3 %v3531_v48 }
 0x187   : > { %1126 = vmatpush.bf16.msrb.mxu0 %v3533_v49 }
 0x188   : > { %1139 = vmatpush.bf16.msrb.mxu1 %v3536_v56 }
 0x189   : > { %1152 = vmatpush.bf16.msrb.mxu2 %v3539_v61 }
 0x18a   : > { %1165 = vmatpush.bf16.msrb.mxu3 %v3543_v62  ;;  %1127 = vmatmul.bf16.vlgmr.msrb.gmra.mxu0 %v958_v41 }
 0x18b   : > { %1250 = vmatpush.bf16.msra.mxu0 %v3451_v17  ;;  %1140 = vmatmul.bf16.vlgmr.msrb.gmra.mxu1 %v958_v41 }
 0x18c   : > { %1263 = vmatpush.bf16.msra.mxu1 %v3453_v20  ;;  %1153 = vmatmul.bf16.vlgmr.msrb.gmra.mxu2 %v958_v41 }
 0x18d   : > { %1276 = vmatpush.bf16.msra.mxu2 %v3455_v26  ;;  %1166 = vmatmul.bf16.vlgmr.msrb.gmra.mxu3 %v958_v41 }
 0x18e   : > { %1289 = vmatpush.bf16.msra.mxu3 %v3458_v27 }
 0x18f   : > { %1251 = vmatpush.bf16.msra.mxu0 %v3460_v59 }
 0x190   : > { %1264 = vmatpush.bf16.msra.mxu1 %v3463_v30 }
 0x191   : > { %1277 = vmatpush.bf16.msra.mxu2 %v3466_v36 }
 0x192   : > { %1290 = vmatpush.bf16.msra.mxu3 %v3470_v38 }
 0x193   : > { %1252 = vmatpush.bf16.msra.mxu0 %v3472_v39 }
 0x194   : > { %1265 = vmatpush.bf16.msra.mxu1 %v3475_v46 }
 0x195   : > { %1278 = vmatpush.bf16.msra.mxu2 %v3478_v52 }
 0x196   : > { %1291 = vmatpush.bf16.msra.mxu3 %v3482_v53 }
 0x197   : > { %1253 = vmatpush.bf16.msra.mxu0 %v3484_v54 }
 0x198   : > { %1266 = vmatpush.bf16.msra.mxu1 %v3487_v58 }
 0x199   : > { %1279 = vmatpush.bf16.msra.mxu2 %v3490_v0 }
 0x19a   : > { %1292 = vmatpush.bf16.msra.mxu3 %v3495_v1 }
 0x19b   : > { %1254 = vmatpush.bf16.msra.mxu0 %v3497_v3 }
 0x19c   : > { %1267 = vmatpush.bf16.msra.mxu1 %v3500_v7 }
 0x19d   : > { %1280 = vmatpush.bf16.msra.mxu2 %v3503_v12 }
 0x19e   : > { %1293 = vmatpush.bf16.msra.mxu3 %v3507_v13 }
 0x19f   : > { %1255 = vmatpush.bf16.msra.mxu0 %v3509_v14 }
 0x1a0   : > { %1268 = vmatpush.bf16.msra.mxu1 %v3512_v55 }
 0x1a1   : > { %1281 = vmatpush.bf16.msra.mxu2 %v3515_v40 }
 0x1a2   : > { %1294 = vmatpush.bf16.msra.mxu3 %v3519_v25 }
 0x1a3   : > { %1256 = vmatpush.bf16.msra.mxu0 %v3521_v28 }
 0x1a4   : > { %1269 = vmatpush.bf16.msra.mxu1 %v3524_v33 }
 0x1a5   : > { %1282 = vmatpush.bf16.msra.mxu2 %v3527_v47 }
 0x1a6   : > { %1295 = vmatpush.bf16.msra.mxu3 %v3531_v48 }
 0x1a7   : > { %1257 = vmatpush.bf16.msra.mxu0 %v3533_v49 }
 0x1a8   : > { %1270 = vmatpush.bf16.msra.mxu1 %v3536_v56 }
 0x1a9   : > { %1283 = vmatpush.bf16.msra.mxu2 %v3539_v61 }
 0x1aa   : > { %1296 = vmatpush.bf16.msra.mxu3 %v3543_v62 }
 0x1ab   : > { %1406 = vmatpush.bf16.msrb.mxu0 %v3451_v17 }
 0x1ac   : > { %1419 = vmatpush.bf16.msrb.mxu1 %v3453_v20 }
 0x1ad   : > { %1432 = vmatpush.bf16.msrb.mxu2 %v3455_v26 }
 0x1ae   : > { %1445 = vmatpush.bf16.msrb.mxu3 %v3458_v27 }
 0x1af   : > { %1407 = vmatpush.bf16.msrb.mxu0 %v3460_v59 }
 0x1b0   : > { %1420 = vmatpush.bf16.msrb.mxu1 %v3463_v30 }
 0x1b1   : > { %1433 = vmatpush.bf16.msrb.mxu2 %v3466_v36 }
 0x1b2   : > { %1446 = vmatpush.bf16.msrb.mxu3 %v3470_v38 }
 0x1b3   : > { %1408 = vmatpush.bf16.msrb.mxu0 %v3472_v39 }
 0x1b4   : > { %1421 = vmatpush.bf16.msrb.mxu1 %v3475_v46 }
 0x1b5   : > { %1434 = vmatpush.bf16.msrb.mxu2 %v3478_v52 }
 0x1b6   : > { %1447 = vmatpush.bf16.msrb.mxu3 %v3482_v53 }
 0x1b7   : > { %1409 = vmatpush.bf16.msrb.mxu0 %v3484_v54 }
 0x1b8   : > { %1422 = vmatpush.bf16.msrb.mxu1 %v3487_v58 }
 0x1b9   : > { %1435 = vmatpush.bf16.msrb.mxu2 %v3490_v0 }
 0x1ba   : > { %1448 = vmatpush.bf16.msrb.mxu3 %v3495_v1 }
 0x1bb   : > { %1410 = vmatpush.bf16.msrb.mxu0 %v3497_v3 }
 0x1bc   : > { %1423 = vmatpush.bf16.msrb.mxu1 %v3500_v7 }
 0x1bd   : > { %1436 = vmatpush.bf16.msrb.mxu2 %v3503_v12 }
 0x1be   : > { %1449 = vmatpush.bf16.msrb.mxu3 %v3507_v13 }
 0x1bf   : > { %1411 = vmatpush.bf16.msrb.mxu0 %v3509_v14 }
 0x1c0   : > { %1424 = vmatpush.bf16.msrb.mxu1 %v3512_v55 }
 0x1c1   : > { %1437 = vmatpush.bf16.msrb.mxu2 %v3515_v40 }
 0x1c2   : > { %1450 = vmatpush.bf16.msrb.mxu3 %v3519_v25 }
 0x1c3   : > { %1412 = vmatpush.bf16.msrb.mxu0 %v3521_v28 }
 0x1c4   : > { %1425 = vmatpush.bf16.msrb.mxu1 %v3524_v33 }
 0x1c5   : > { %1438 = vmatpush.bf16.msrb.mxu2 %v3527_v47 }
 0x1c6   : > { %1451 = vmatpush.bf16.msrb.mxu3 %v3531_v48 }
 0x1c7   : > { %1413 = vmatpush.bf16.msrb.mxu0 %v3533_v49 }
 0x1c8   : > { %1426 = vmatpush.bf16.msrb.mxu1 %v3536_v56 }
 0x1c9   : > { %1439 = vmatpush.bf16.msrb.mxu2 %v3539_v61 }
 0x1ca   : > { %1452 = vmatpush.bf16.msrb.mxu3 %v3543_v62 }
 0x1e7   : > { %v857_v63 = vpop.f32.mrf.mxu0 }
 0x1e8   : > { %v876_v2 = vpop.f32.mrf.mxu1  ;;  %v3635_v57 = vadd.f32 %v857_v63, %v668_v5 }
 0x1e9   : > { %v3637_v41 = vadd.f32 %v876_v2, %v669_v8 }
 0x1ef   : > { %v895_v6 = vpop.f32.mrf.mxu2  ;;  %v859_v10 = vpop.f32.mrf.mxu0 }
 0x1f0   : > { %v914_v9 = vpop.f32.mrf.mxu3  ;;  %v3615_v37 = vadd.f32 %v859_v10, %v668_v5  ;;  %v878_v11 = vpop.f32.mrf.mxu1 }
 0x1f1   : > { %v3617_v15 = vadd.f32 %v878_v11, %v669_v8  ;;  %v3645_v63 = vadd.f32 %v914_v9, %v671_v18 }
 0x1f7   : > { %v897_v19 = vpop.f32.mrf.mxu2  ;;  %v862_v23 = vpop.f32.mrf.mxu0 }
 0x1f8   : > { %v3619_v21 = vadd.f32 %v897_v19, %v670_v16  ;;  %v916_v22 = vpop.f32.mrf.mxu3  ;;  %v3623_v29 = vadd.f32 %v862_v23, %v668_v5  ;;  %v881_v31 = vpop.f32.mrf.mxu1 }
 0x1f9   : > { %v3621_v24 = vadd.f32 %v916_v22, %v671_v18  ;;  %v3625_v32 = vadd.f32 %v881_v31, %v669_v8 }
 0x1fa   : > { %3946 = vst [vmem:[#allocation11_spill] sm:$0xff] %v3619_v21 }
 0x1fb   : > { %3947 = vst [vmem:[#allocation12_spill] sm:$0xff] %v3621_v24 }
 0x1fc   : > { %3948 = vst [vmem:[#allocation13_spill] sm:$0xff] %v3623_v29 }
 0x1fd   : > { %3949 = vst [vmem:[#allocation14_spill] sm:$0xff] %v3625_v32 }
 0x1ff   : > { %v900_v34 = vpop.f32.mrf.mxu2  ;;  %v864_v44 = vpop.f32.mrf.mxu0 }
 0x200   : > { %v3627_v35 = vadd.f32 %v900_v34, %v670_v16  ;;  %v919_v43 = vpop.f32.mrf.mxu3  ;;  %v3631_v50 = vadd.f32 %v864_v44, %v668_v5  ;;  %v883_v51 = vpop.f32.mrf.mxu1 }
 0x201   : > { %v3629_v45 = vadd.f32 %v919_v43, %v671_v18  ;;  %v3633_v42 = vadd.f32 %v883_v51, %v669_v8 }
 0x202   : > { %3950 = vst [vmem:[#allocation15_spill] sm:$0xff] %v3627_v35 }
 0x203   : > { %3951 = vst [vmem:[#allocation16_spill] sm:$0xff] %v3629_v45 }
 0x204   : > { %3952 = vst [vmem:[#allocation17_spill] sm:$0xff] %v3631_v50 }
 0x205   : > { %3953 = vst [vmem:[#allocation18_spill] sm:$0xff] %v3633_v42 }
 0x207   : > { %v902_v60 = vpop.f32.mrf.mxu2  ;;  %v1128_v11 = vpop.f32.mrf.mxu0 }
 0x208   : > { %v3639_v4 = vadd.f32 %v902_v60, %v670_v16  ;;  %v921_v10 = vpop.f32.mrf.mxu3  ;;  %v1171_v22 = vadd.f32 %v1128_v11, %v3635_v57  ;;  %v1141_v23 = vpop.f32.mrf.mxu1 }
 0x209   : > { %v3641_v19 = vadd.f32 %v921_v10, %v671_v18  ;;  %v1172_v31 = vadd.f32 %v1141_v23, %v3637_v41 }
 0x20a   : > { %3954 = vst [vmem:[#allocation19_spill] sm:$0xff] %v3639_v4  ;;  %v2741_v34 = vmul.f32 -1.442695, %v1171_v22 }
 0x20b   : > { %3955 = vst [vmem:[#allocation20_spill] sm:$0xff] %v3641_v19  ;;  %v2742_v43 = vmul.f32 -1.442695, %v1172_v31  ;;  %v3648_v31 = vadd.f32 %v895_v6, %v670_v16 }
 0x20c   : > { %2918 = vpow2.f32 %v2741_v34 }
 0x20d   : > { %2920 = vpow2.f32 %v2742_v43 }
 0x20f   : > { %v1154_v5 = vpop.f32.mrf.mxu2  ;;  %v1130_v8 = vpop.f32.mrf.mxu0 }
 0x210   : > { %v1167_v2 = vpop.f32.mrf.mxu3  ;;  %v1143_v51 = vpop.f32.mrf.mxu1  ;;  %v1173_v34 = vadd.f32 %v1154_v5, %v3648_v31 }
 0x211   : > { %v1174_v44 = vadd.f32 %v1167_v2, %v3645_v63 }
 0x212   : > { %v2919_v60 = vpop.eup %2918 }
 0x213   : > { %v2743_v10 = vmul.f32 -1.442695, %v1174_v44  ;;  %v2921_v4 = vpop.eup %2920  ;;  %v1178_v19 = vadd.f32 1.0, %v2919_v60 }
 0x214   : > { %v1197_v11 = vadd.f32 1.0, %v2921_v4 }
 0x215   : > { %2922 = vpow2.f32 %v2743_v10  ;;  %v1190_v60 = vand.u32 2147483648, %v1178_v19  ;;  %vm1184_vm6 = vweird.f32 %v1178_v19 }
 0x216   : > { %2924 = vrcp.f32 %v1178_v19  ;;  %v1209_v4 = vand.u32 2147483648, %v1197_v11  ;;  %v1207_v6 = vand.u32 2147483647, %v1197_v11  ;;  %vm1203_vm7 = vweird.f32 %v1197_v11 }
 0x217   : > { %2926 = vrcp.f32 %v1197_v11  ;;  %v1156_v22 = vpop.f32.mrf.mxu2  ;;  %v1191_v5 = vor.u32 1.1754944e-38, %v1190_v60 }
 0x218   : > { %v1169_v23 = vpop.f32.mrf.mxu3  ;;  %v1188_v22 = vand.u32 2147483647, %v1178_v19  ;;  %v1210_v35 = vor.u32 1.1754944e-38, %v1209_v4  ;;  %vm1208_vm11 = vcmp.eq.f32.partialorder %v1207_v6, 8.507059e+37 }
 0x21a   : > { %vm1189_vm10 = vcmp.eq.f32.partialorder %v1188_v22, 8.507059e+37 }
 0x21b   : > { %v2923_v9 = vpop.eup %2922 }
 0x21c   : > { %v2925_v18 = vpop.eup %2924  ;;  %v1217_v43 = vadd.f32 1.0, %v2923_v9 }
 0x21d   : > { %v2927_v8 = vpop.eup %2926  ;;  %v1180_v2 = vmul.f32 %v2925_v18, %v1178_v19  ;;  %vm1185_vm4 = vweird.f32 %v2925_v18 }
 0x21e   : > { %v1199_v51 = vmul.f32 %v2927_v8, %v1197_v11  ;;  %2928 = vrcp.f32 %v1217_v43  ;;  %vm1204_vm5 = vweird.f32 %v2927_v8  ;;  %vm1186_vm8 = vmor %vm1184_vm6, %vm1185_vm4  ;;  %vm1223_vm13 = vweird.f32 %v1217_v43 }
 0x21f   : > { %v1181_v44 = vsub.f32 1.0, %v1180_v2  ;;  %2930 = vtanh.f32 %v1173_v34  ;;  %vm1205_vm9 = vmor %vm1203_vm7, %vm1204_vm5  ;;  %v925_v2 = vld [vmem:[#allocation3] sm:$0xf]  ;;  %v1227_v60 = vand.u32 2147483647, %v1217_v43 }
 0x220   : > { %v1200_v42 = vsub.f32 1.0, %v1199_v51 }
 0x221   : > { %v1182_v10 = vmul.f32 %v2925_v18, %v1181_v44  ;;  %vm1228_vm15 = vcmp.eq.f32.partialorder %v1227_v60, 8.507059e+37 }
 0x222   : > { %v1201_v23 = vmul.f32 %v2927_v8, %v1200_v42 }
 0x223   : > { %v1183_v16 = vadd.f32 %v2925_v18, %v1182_v10 }
 0x224   : > { %v2929_v50 = vpop.eup %2928  ;;  %v1202_v9 = vadd.f32 %v2927_v8, %v1201_v23 }
 0x225   : > { %v1187_v51 = vsel %vm1186_vm8, %v2925_v18, %v1183_v16  ;;  %v1219_v34 = vmul.f32 %v2929_v50, %v1217_v43  ;;  %v2931_v45 = vpop.eup %2930  ;;  %vm1224_vm12 = vweird.f32 %v2929_v50  ;;  %v1229_v18 = vand.u32 2147483648, %v1217_v43 }
 0x226   : > { %v1192_v44 = vsel %vm1189_vm10, %v1191_v5, %v1187_v51  ;;  %v1206_v32 = vsel %vm1205_vm9, %v2927_v8, %v1202_v9  ;;  %vm1225_vm14 = vmor %vm1223_vm13, %vm1224_vm12 }
 0x227   : > { %v1211_v42 = vsel %vm1208_vm11, %v1210_v35, %v1206_v32  ;;  %v1234_v29 = vmul.f32 %v2931_v45, %v1192_v44  ;;  %v1220_v21 = vsub.f32 1.0, %v1219_v34  ;;  %v1230_v4 = vor.u32 1.1754944e-38, %v1229_v18 }
 0x228   : > { %v1233_v10 = vmul.f32 %v1211_v42, %v925_v2 }
 0x229   : > { %v1221_v19 = vmul.f32 %v2929_v50, %v1220_v21 }
 0x22a   : > { %v3651_v24 = vadd.f32 %v1234_v29, %v1233_v10 }
 0x22b   : > { %v1222_v11 = vadd.f32 %v2929_v50, %v1221_v19 }
 0x22c   : > { %2932 = vtanh.f32 %v3651_v24 }
 0x22d   : > { %v1226_v8 = vsel %vm1225_vm14, %v2929_v50, %v1222_v11 }
 0x22e   : > { %v1231_v35 = vsel %vm1228_vm15, %v1230_v4, %v1226_v8 }
 0x232   : > { %v2933_v32 = vpop.eup %2932 }
 0x233   : > { %v1237_v21 = vmul.f32 %v2933_v32, %v1231_v35 }
 0x235   : > { %v1239_v29 = vrot.slane %v1237_v21, 1  ;;  %v1240_v45 = vrot.slane %v1237_v21, 2  ;;  %v1241_v22 = vrot.slane %v1237_v21, 3  ;;  %1245 = vst [vmem:[%s3249_s18] sm:$0x1] %v1237_v21  ;;  %v1249_v23 = vpack.c.bf16 %v1237_v21, %v1237_v21 }
 0x237   : > { %1246 = vst [vmem:[%s3249_s18 + $0x8] sm:$0x1] %v1239_v29  ;;  %1258 = vmatmul.bf16.vlgmr.msra.gmra.mxu0 %v1249_v23  ;;  %1271 = vmatmul.bf16.vlgmr.msra.gmra.mxu1 %v1249_v23 }
 0x238   : > { %1247 = vst [vmem:[%s3249_s18 + $0x10] sm:$0x1] %v1240_v45  ;;  %1284 = vmatmul.bf16.vlgmr.msra.gmra.mxu2 %v1249_v23  ;;  %1297 = vmatmul.bf16.vlgmr.msra.gmra.mxu3 %v1249_v23 }
 0x239   : > { %1248 = vst [vmem:[%s3249_s18 + $0x18] sm:$0x1] %v1241_v22  ;;  %1540 = vmatpush.bf16.msra.mxu0 %v3451_v17  ;;  %1553 = vmatpush.bf16.msra.mxu1 %v3453_v20 }
 0x23a   : > { %1566 = vmatpush.bf16.msra.mxu2 %v3455_v26  ;;  %1579 = vmatpush.bf16.msra.mxu3 %v3458_v27 }
 0x23d   : > { %1541 = vmatpush.bf16.msra.mxu0 %v3460_v59  ;;  %1554 = vmatpush.bf16.msra.mxu1 %v3463_v30 }
 0x23e   : > { %1567 = vmatpush.bf16.msra.mxu2 %v3466_v36  ;;  %1580 = vmatpush.bf16.msra.mxu3 %v3470_v38 }
 0x241   : > { %1542 = vmatpush.bf16.msra.mxu0 %v3472_v39  ;;  %1555 = vmatpush.bf16.msra.mxu1 %v3475_v46 }
 0x242   : > { %1568 = vmatpush.bf16.msra.mxu2 %v3478_v52  ;;  %1581 = vmatpush.bf16.msra.mxu3 %v3482_v53 }
 0x245   : > { %1543 = vmatpush.bf16.msra.mxu0 %v3484_v54  ;;  %1556 = vmatpush.bf16.msra.mxu1 %v3487_v58 }
 0x246   : > { %1569 = vmatpush.bf16.msra.mxu2 %v3490_v0  ;;  %1582 = vmatpush.bf16.msra.mxu3 %v3495_v1 }
 0x249   : > { %1544 = vmatpush.bf16.msra.mxu0 %v3497_v3  ;;  %1557 = vmatpush.bf16.msra.mxu1 %v3500_v7 }
 0x24a   : > { %1570 = vmatpush.bf16.msra.mxu2 %v3503_v12  ;;  %1583 = vmatpush.bf16.msra.mxu3 %v3507_v13 }
 0x24d   : > { %1545 = vmatpush.bf16.msra.mxu0 %v3509_v14  ;;  %1558 = vmatpush.bf16.msra.mxu1 %v3512_v55 }
 0x24e   : > { %1571 = vmatpush.bf16.msra.mxu2 %v3515_v40  ;;  %1584 = vmatpush.bf16.msra.mxu3 %v3519_v25 }
 0x251   : > { %1546 = vmatpush.bf16.msra.mxu0 %v3521_v28  ;;  %1559 = vmatpush.bf16.msra.mxu1 %v3524_v33 }
 0x252   : > { %1572 = vmatpush.bf16.msra.mxu2 %v3527_v47  ;;  %1585 = vmatpush.bf16.msra.mxu3 %v3531_v48 }
 0x255   : > { %1547 = vmatpush.bf16.msra.mxu0 %v3533_v49  ;;  %1560 = vmatpush.bf16.msra.mxu1 %v3536_v56 }
 0x256   : > { %1573 = vmatpush.bf16.msra.mxu2 %v3539_v61  ;;  %1586 = vmatpush.bf16.msra.mxu3 %v3543_v62 }
 0x2b4   : > { %v1259_v50 = vpop.f32.mrf.mxu0  ;;  %v1272_v43 = vpop.f32.mrf.mxu1 }
 0x2b5   : > { %v1306_v6 = vrot.slane %v1259_v50, 4  ;;  %v1307_v16 = vrot.slane %v1272_v43, 4 }
 0x2b7   : > { %v1314_v5 = vadd.f32 %v1306_v6, %v3635_v57  ;;  %v1315_v9 = vadd.f32 %v1307_v16, %v3637_v41 }
 0x2b9   : > { %v2744_v2 = vmul.f32 -1.442695, %v1314_v5  ;;  %v2745_v51 = vmul.f32 -1.442695, %v1315_v9 }
 0x2bb   : > { %2934 = vpow2.f32 %v2744_v2  ;;  %v1285_v34 = vpop.f32.mrf.mxu2  ;;  %v1298_v44 = vpop.f32.mrf.mxu3 }
 0x2bc   : > { %2936 = vpow2.f32 %v2745_v51  ;;  %v1309_v42 = vrot.slane %v1298_v44, 4  ;;  %v1261_v10 = vpop.f32.mrf.mxu0  ;;  %v1274_v19 = vpop.f32.mrf.mxu1  ;;  %v1308_v41 = vrot.slane %v1285_v34, 4 }
 0x2be   : > { %v1317_v11 = vadd.f32 %v1309_v42, %v3645_v63  ;;  %v1316_v22 = vadd.f32 %v1308_v41, %v3648_v31 }
 0x2c0   : > { %v2746_v18 = vmul.f32 -1.442695, %v1317_v11  ;;  %v1377_v11 = vrot.slane %v3651_v24, 4 }
 0x2c1   : > { %v2935_v60 = vpop.eup %2934 }
 0x2c2   : > { %v2937_v8 = vpop.eup %2936  ;;  %v1321_v4 = vadd.f32 1.0, %v2935_v60  ;;  %2938 = vpow2.f32 %v2746_v18 }
 0x2c3   : > { %v1340_v32 = vadd.f32 1.0, %v2937_v8  ;;  %v1287_v57 = vpop.f32.mrf.mxu2  ;;  %v1300_v35 = vpop.f32.mrf.mxu3 }
 0x2c4   : > { %2940 = vrcp.f32 %v1321_v4  ;;  %v1333_v16 = vand.u32 2147483648, %v1321_v4  ;;  %v1331_v2 = vand.u32 2147483647, %v1321_v4  ;;  %vm1327_vm2 = vweird.f32 %v1321_v4 }
 0x2c5   : > { %2942 = vrcp.f32 %v1340_v32  ;;  %v1352_v5 = vand.u32 2147483648, %v1340_v32  ;;  %v1350_v34 = vand.u32 2147483647, %v1340_v32  ;;  %vm1346_vm3 = vweird.f32 %v1340_v32 }
 0x2c6   : > { %v1334_v31 = vor.u32 1.1754944e-38, %v1333_v16  ;;  %vm1332_vm6 = vcmp.eq.f32.partialorder %v1331_v2, 8.507059e+37 }
 0x2c7   : > { %v1353_v18 = vor.u32 1.1754944e-38, %v1352_v5  ;;  %vm1351_vm7 = vcmp.eq.f32.partialorder %v1350_v34, 8.507059e+37 }
 0x2c8   : > { %v2939_v21 = vpop.eup %2938 }
 0x2c9   : > { %v1360_v29 = vadd.f32 1.0, %v2939_v21 }
 0x2ca   : > { %v2941_v45 = vpop.eup %2940 }
 0x2cb   : > { %v2943_v23 = vpop.eup %2942  ;;  %v1323_v50 = vmul.f32 %v2941_v45, %v1321_v4  ;;  %2944 = vrcp.f32 %v1360_v29  ;;  %vm1328_vm0 = vweird.f32 %v2941_v45  ;;  %v1372_v24 = vand.u32 2147483648, %v1360_v29 }
 0x2cc   : > { %v1342_v63 = vmul.f32 %v2943_v23, %v1340_v32  ;;  %2946 = vtanh.f32 %v1316_v22  ;;  %vm1347_vm1 = vweird.f32 %v2943_v23  ;;  %vm1329_vm4 = vmor %vm1327_vm2, %vm1328_vm0  ;;  %vm1366_vm9 = vweird.f32 %v1360_v29 }
 0x2cd   : > { %v1324_v43 = vsub.f32 1.0, %v1323_v50  ;;  %vm1348_vm5 = vmor %vm1346_vm3, %vm1347_vm1 }
 0x2ce   : > { %v1343_v6 = vsub.f32 1.0, %v1342_v63 }
 0x2cf   : > { %v1325_v9 = vmul.f32 %v2941_v45, %v1324_v43  ;;  %v1370_v43 = vand.u32 2147483647, %v1360_v29 }
 0x2d0   : > { %v1344_v51 = vmul.f32 %v2943_v23, %v1343_v6  ;;  %v1373_v6 = vor.u32 1.1754944e-38, %v1372_v24 }
 0x2d1   : > { %v2945_v44 = vpop.eup %2944  ;;  %v1326_v42 = vadd.f32 %v2941_v45, %v1325_v9  ;;  %vm1371_vm11 = vcmp.eq.f32.partialorder %v1370_v43, 8.507059e+37 }
 0x2d2   : > { %v1345_v10 = vadd.f32 %v2943_v23, %v1344_v51  ;;  %v1362_v19 = vmul.f32 %v2945_v44, %v1360_v29  ;;  %v2947_v8 = vpop.eup %2946  ;;  %vm1367_vm8 = vweird.f32 %v2945_v44 }
 0x2d3   : > { %v1330_v60 = vsel %vm1329_vm4, %v2941_v45, %v1326_v42  ;;  %vm1368_vm10 = vmor %vm1366_vm9, %vm1367_vm8 }
 0x2d4   : > { %v1335_v57 = vsel %vm1332_vm6, %v1334_v31, %v1330_v60  ;;  %v1349_v35 = vsel %vm1348_vm5, %v2943_v23, %v1345_v10  ;;  %v1363_v41 = vsub.f32 1.0, %v1362_v19 }
 0x2d5   : > { %v1354_v21 = vsel %vm1351_vm7, %v1353_v18, %v1349_v35  ;;  %v1380_v22 = vmul.f32 %v2947_v8, %v1335_v57  ;;  %v3956_v57 = vld [vmem:[#allocation12_spill] sm:$0xff] }
 0x2d6   : > { %v1379_v50 = vmul.f32 %v1377_v11, %v1354_v21  ;;  %v1364_v4 = vmul.f32 %v2945_v44, %v1363_v41 }
 0x2d8   : > { %v3695_v32 = vadd.f32 %v1380_v22, %v1379_v50  ;;  %v1365_v63 = vadd.f32 %v2945_v44, %v1364_v4 }
 0x2da   : > { %2948 = vtanh.f32 %v3695_v32  ;;  %v1369_v45 = vsel %vm1368_vm10, %v2945_v44, %v1365_v63 }
 0x2db   : > { %v1374_v16 = vsel %vm1371_vm11, %v1373_v6, %v1369_v45 }
 0x2e0   : > { %v2949_v23 = vpop.eup %2948 }
 0x2e1   : > { %v1383_v5 = vmul.f32 %v2949_v23, %v1374_v16 }
 0x2e3   : > { %1385 = vst [vmem:[#allocation1] sm:$0xff] %v1383_v5  ;;  %v1402_v9 = vpack.c.bf16 %v1383_v5, %v1383_v5  ;;  %v3957_v5 = vld [vmem:[#allocation11_spill] sm:$0xff] }
 0x2e5   : > { %v1404_v2 = vrot.slane %v1402_v9, 2 }
 0x2e7   : > { %1414 = vmatmul.bf16.vlgmr.msrb.gmra.mxu0 %v1404_v2  ;;  %1427 = vmatmul.bf16.vlgmr.msrb.gmra.mxu1 %v1404_v2 }
 0x2e8   : > { %1440 = vmatmul.bf16.vlgmr.msrb.gmra.mxu2 %v1404_v2  ;;  %1453 = vmatmul.bf16.vlgmr.msrb.gmra.mxu3 %v1404_v2 }
 0x2e9   : > { %1696 = vmatpush.bf16.msrb.mxu0 %v3451_v17  ;;  %1709 = vmatpush.bf16.msrb.mxu1 %v3453_v20 }
 0x2ea   : > { %1722 = vmatpush.bf16.msrb.mxu2 %v3455_v26  ;;  %1735 = vmatpush.bf16.msrb.mxu3 %v3458_v27  ;;  %v1387_v29 = vld [vmem:[#allocation1 + $0x4] ss:$9 sm:$0xff]  ;;  %v1391_v34 = vld [vmem:[#allocation1 + $0x6] ss:$9 sm:$0xff] }
 0x2eb   : > { %v1389_v51 = vld [vmem:[#allocation1 + $0x5] ss:$9 sm:$0xff]  ;;  %v1393_v44 = vld [vmem:[#allocation1 + $0x7] ss:$9 sm:$0xff]  ;;  %1398 = vst [vmem:[%s3249_s18 + $0x1] sm:$0x1] %v1387_v29 }
 0x2ec   : > { %1399 = vst [vmem:[%s3249_s18 + $0x9] sm:$0x1] %v1389_v51 }
 0x2ed   : > { %1697 = vmatpush.bf16.msrb.mxu0 %v3460_v59  ;;  %1710 = vmatpush.bf16.msrb.mxu1 %v3463_v30  ;;  %1400 = vst [vmem:[%s3249_s18 + $0x11] sm:$0x1] %v1391_v34 }
 0x2ee   : > { %1723 = vmatpush.bf16.msrb.mxu2 %v3466_v36  ;;  %1736 = vmatpush.bf16.msrb.mxu3 %v3470_v38  ;;  %1401 = vst [vmem:[%s3249_s18 + $0x19] sm:$0x1] %v1393_v44 }
 0x2f1   : > { %1698 = vmatpush.bf16.msrb.mxu0 %v3472_v39  ;;  %1711 = vmatpush.bf16.msrb.mxu1 %v3475_v46 }
 0x2f2   : > { %1724 = vmatpush.bf16.msrb.mxu2 %v3478_v52  ;;  %1737 = vmatpush.bf16.msrb.mxu3 %v3482_v53 }
 0x2f5   : > { %1699 = vmatpush.bf16.msrb.mxu0 %v3484_v54  ;;  %1712 = vmatpush.bf16.msrb.mxu1 %v3487_v58 }
 0x2f6   : > { %1725 = vmatpush.bf16.msrb.mxu2 %v3490_v0  ;;  %1738 = vmatpush.bf16.msrb.mxu3 %v3495_v1 }
 0x2f9   : > { %1700 = vmatpush.bf16.msrb.mxu0 %v3497_v3  ;;  %1713 = vmatpush.bf16.msrb.mxu1 %v3500_v7 }
 0x2fa   : > { %1726 = vmatpush.bf16.msrb.mxu2 %v3503_v12  ;;  %1739 = vmatpush.bf16.msrb.mxu3 %v3507_v13 }
 0x2fd   : > { %1701 = vmatpush.bf16.msrb.mxu0 %v3509_v14  ;;  %1714 = vmatpush.bf16.msrb.mxu1 %v3512_v55 }
 0x2fe   : > { %1727 = vmatpush.bf16.msrb.mxu2 %v3515_v40  ;;  %1740 = vmatpush.bf16.msrb.mxu3 %v3519_v25 }
 0x301   : > { %1702 = vmatpush.bf16.msrb.mxu0 %v3521_v28  ;;  %1715 = vmatpush.bf16.msrb.mxu1 %v3524_v33 }
 0x302   : > { %1728 = vmatpush.bf16.msrb.mxu2 %v3527_v47  ;;  %1741 = vmatpush.bf16.msrb.mxu3 %v3531_v48 }
 0x305   : > { %1703 = vmatpush.bf16.msrb.mxu0 %v3533_v49  ;;  %1716 = vmatpush.bf16.msrb.mxu1 %v3536_v56 }
 0x306   : > { %1729 = vmatpush.bf16.msrb.mxu2 %v3539_v61  ;;  %1742 = vmatpush.bf16.msrb.mxu3 %v3543_v62 }
 0x364   : > { %v1415_v42 = vpop.f32.mrf.mxu0  ;;  %v1428_v31 = vpop.f32.mrf.mxu1 }
 0x365   : > { %v1458_v10 = vadd.f32 %v1415_v42, %v3615_v37  ;;  %v1459_v19 = vadd.f32 %v1428_v31, %v3617_v15 }
 0x367   : > { %v2747_v11 = vmul.f32 -1.442695, %v1458_v10  ;;  %v2748_v18 = vmul.f32 -1.442695, %v1459_v19 }
 0x369   : > { %2950 = vpow2.f32 %v2747_v11 }
 0x36a   : > { %2952 = vpow2.f32 %v2748_v18 }
 0x36b   : > { %v1441_v60 = vpop.f32.mrf.mxu2  ;;  %v1454_v8 = vpop.f32.mrf.mxu3 }
 0x36c   : > { %v1461_v35 = vadd.f32 %v1454_v8, %v3956_v57  ;;  %v1417_v41 = vpop.f32.mrf.mxu0  ;;  %v1430_v21 = vpop.f32.mrf.mxu1  ;;  %v1460_v9 = vadd.f32 %v1441_v60, %v3957_v5 }
 0x36e   : > { %v2749_v22 = vmul.f32 -1.442695, %v1461_v35 }
 0x36f   : > { %v2951_v50 = vpop.eup %2950 }
 0x370   : > { %v2953_v4 = vpop.eup %2952  ;;  %v1465_v63 = vadd.f32 1.0, %v2951_v50  ;;  %2954 = vpow2.f32 %v2749_v22 }
 0x371   : > { %v1484_v24 = vadd.f32 1.0, %v2953_v4  ;;  %v1521_v4 = vrot.slane %v3695_v32, 4 }
 0x372   : > { %2956 = vrcp.f32 %v1465_v63  ;;  %v1477_v42 = vand.u32 2147483648, %v1465_v63  ;;  %v1475_v19 = vand.u32 2147483647, %v1465_v63  ;;  %vm1471_vm14 = vweird.f32 %v1465_v63 }
 0x373   : > { %2958 = vrcp.f32 %v1484_v24  ;;  %v1443_v43 = vpop.f32.mrf.mxu2  ;;  %v1456_v45 = vpop.f32.mrf.mxu3  ;;  %v1496_v31 = vand.u32 2147483648, %v1484_v24  ;;  %v1494_v18 = vand.u32 2147483647, %v1484_v24  ;;  %vm1490_vm15 = vweird.f32 %v1484_v24 }
 0x374   : > { %v1478_v60 = vor.u32 1.1754944e-38, %v1477_v42  ;;  %vm1476_vm2 = vcmp.eq.f32.partialorder %v1475_v19, 8.507059e+37 }
 0x375   : > { %v1497_v22 = vor.u32 1.1754944e-38, %v1496_v31  ;;  %vm1495_vm3 = vcmp.eq.f32.partialorder %v1494_v18, 8.507059e+37 }
 0x376   : > { %v2955_v6 = vpop.eup %2954 }
 0x377   : > { %v1504_v23 = vadd.f32 1.0, %v2955_v6 }
 0x378   : > { %v2957_v16 = vpop.eup %2956 }
 0x379   : > { %v2959_v2 = vpop.eup %2958  ;;  %v1467_v29 = vmul.f32 %v2957_v16, %v1465_v63  ;;  %2960 = vrcp.f32 %v1504_v23  ;;  %vm1472_vm12 = vweird.f32 %v2957_v16  ;;  %vm1510_vm5 = vweird.f32 %v1504_v23 }
 0x37a   : > { %v1486_v51 = vmul.f32 %v2959_v2, %v1484_v24  ;;  %2962 = vtanh.f32 %v1460_v9  ;;  %vm1491_vm13 = vweird.f32 %v2959_v2  ;;  %vm1473_vm0 = vmor %vm1471_vm14, %vm1472_vm12  ;;  %v1514_v32 = vand.u32 2147483647, %v1504_v23 }
 0x37b   : > { %v1468_v34 = vsub.f32 1.0, %v1467_v29  ;;  %vm1492_vm1 = vmor %vm1490_vm15, %vm1491_vm13 }
 0x37c   : > { %v1487_v44 = vsub.f32 1.0, %v1486_v51  ;;  %vm1515_vm7 = vcmp.eq.f32.partialorder %v1514_v32, 8.507059e+37 }
 0x37d   : > { %v1469_v10 = vmul.f32 %v2957_v16, %v1468_v34 }
 0x37e   : > { %v1488_v11 = vmul.f32 %v2959_v2, %v1487_v44 }
 0x37f   : > { %v2961_v8 = vpop.eup %2960  ;;  %v1470_v35 = vadd.f32 %v2957_v16, %v1469_v10 }
 0x380   : > { %v1489_v41 = vadd.f32 %v2959_v2, %v1488_v11  ;;  %v1506_v21 = vmul.f32 %v2961_v8, %v1504_v23  ;;  %v2963_v43 = vpop.eup %2962  ;;  %vm1511_vm4 = vweird.f32 %v2961_v8 }
 0x381   : > { %v1474_v50 = vsel %vm1473_vm0, %v2957_v16, %v1470_v35  ;;  %v1516_v16 = vand.u32 2147483648, %v1504_v23  ;;  %vm1512_vm6 = vmor %vm1510_vm5, %vm1511_vm4 }
 0x382   : > { %v1479_v45 = vsel %vm1476_vm2, %v1478_v60, %v1474_v50  ;;  %v1493_v6 = vsel %vm1492_vm1, %v2959_v2, %v1489_v41  ;;  %v1507_v9 = vsub.f32 1.0, %v1506_v21 }
 0x383   : > { %v1498_v29 = vsel %vm1495_vm3, %v1497_v22, %v1493_v6  ;;  %v1524_v51 = vmul.f32 %v2963_v43, %v1479_v45  ;;  %v1517_v42 = vor.u32 1.1754944e-38, %v1516_v16 }
 0x384   : > { %v1523_v34 = vmul.f32 %v1521_v4, %v1498_v29  ;;  %v1508_v63 = vmul.f32 %v2961_v8, %v1507_v9 }
 0x386   : > { %v3739_v24 = vadd.f32 %v1524_v51, %v1523_v34  ;;  %v1509_v44 = vadd.f32 %v2961_v8, %v1508_v63 }
 0x388   : > { %2964 = vtanh.f32 %v3739_v24  ;;  %v1513_v2 = vsel %vm1512_vm6, %v2961_v8, %v1509_v44 }
 0x389   : > { %v1518_v10 = vsel %vm1515_vm7, %v1517_v42, %v1513_v2 }
 0x38e   : > { %v2965_v31 = vpop.eup %2964 }
 0x38f   : > { %v1527_v19 = vmul.f32 %v2965_v31, %v1518_v10 }
 0x391   : > { %v1529_v11 = vrot.slane %v1527_v19, 1  ;;  %v1530_v18 = vrot.slane %v1527_v19, 2  ;;  %v1531_v35 = vrot.slane %v1527_v19, 3  ;;  %1535 = vst [vmem:[%s3249_s18 + $0x2] sm:$0x1] %v1527_v19  ;;  %v1539_v60 = vpack.c.bf16 %v1527_v19, %v1527_v19 }
 0x393   : > { %1536 = vst [vmem:[%s3249_s18 + $0xa] sm:$0x1] %v1529_v11  ;;  %1548 = vmatmul.bf16.vlgmr.msra.gmra.mxu0 %v1539_v60  ;;  %1561 = vmatmul.bf16.vlgmr.msra.gmra.mxu1 %v1539_v60 }
 0x394   : > { %1537 = vst [vmem:[%s3249_s18 + $0x12] sm:$0x1] %v1530_v18  ;;  %1574 = vmatmul.bf16.vlgmr.msra.gmra.mxu2 %v1539_v60  ;;  %1587 = vmatmul.bf16.vlgmr.msra.gmra.mxu3 %v1539_v60 }
 0x395   : > { %1538 = vst [vmem:[%s3249_s18 + $0x1a] sm:$0x1] %v1531_v35  ;;  %1830 = vmatpush.bf16.msra.mxu0 %v3451_v17  ;;  %1843 = vmatpush.bf16.msra.mxu1 %v3453_v20 }
 0x396   : > { %1856 = vmatpush.bf16.msra.mxu2 %v3455_v26  ;;  %1869 = vmatpush.bf16.msra.mxu3 %v3458_v27 }
 0x399   : > { %1831 = vmatpush.bf16.msra.mxu0 %v3460_v59  ;;  %1844 = vmatpush.bf16.msra.mxu1 %v3463_v30 }
 0x39a   : > { %1857 = vmatpush.bf16.msra.mxu2 %v3466_v36  ;;  %1870 = vmatpush.bf16.msra.mxu3 %v3470_v38 }
 0x39d   : > { %1832 = vmatpush.bf16.msra.mxu0 %v3472_v39  ;;  %1845 = vmatpush.bf16.msra.mxu1 %v3475_v46 }
 0x39e   : > { %1858 = vmatpush.bf16.msra.mxu2 %v3478_v52  ;;  %1871 = vmatpush.bf16.msra.mxu3 %v3482_v53 }
 0x3a1   : > { %1833 = vmatpush.bf16.msra.mxu0 %v3484_v54  ;;  %1846 = vmatpush.bf16.msra.mxu1 %v3487_v58 }
 0x3a2   : > { %1859 = vmatpush.bf16.msra.mxu2 %v3490_v0  ;;  %1872 = vmatpush.bf16.msra.mxu3 %v3495_v1 }
 0x3a5   : > { %1834 = vmatpush.bf16.msra.mxu0 %v3497_v3  ;;  %1847 = vmatpush.bf16.msra.mxu1 %v3500_v7 }
 0x3a6   : > { %1860 = vmatpush.bf16.msra.mxu2 %v3503_v12  ;;  %1873 = vmatpush.bf16.msra.mxu3 %v3507_v13 }
 0x3a9   : > { %1835 = vmatpush.bf16.msra.mxu0 %v3509_v14  ;;  %1848 = vmatpush.bf16.msra.mxu1 %v3512_v55 }
 0x3aa   : > { %1861 = vmatpush.bf16.msra.mxu2 %v3515_v40  ;;  %1874 = vmatpush.bf16.msra.mxu3 %v3519_v25 }
 0x3ad   : > { %1836 = vmatpush.bf16.msra.mxu0 %v3521_v28  ;;  %1849 = vmatpush.bf16.msra.mxu1 %v3524_v33 }
 0x3ae   : > { %1862 = vmatpush.bf16.msra.mxu2 %v3527_v47  ;;  %1875 = vmatpush.bf16.msra.mxu3 %v3531_v48 }
 0x3b1   : > { %1837 = vmatpush.bf16.msra.mxu0 %v3533_v49  ;;  %1850 = vmatpush.bf16.msra.mxu1 %v3536_v56 }
 0x3b2   : > { %1863 = vmatpush.bf16.msra.mxu2 %v3539_v61  ;;  %1876 = vmatpush.bf16.msra.mxu3 %v3543_v62 }
 0x410   : > { %v1549_v23 = vpop.f32.mrf.mxu0  ;;  %v1562_v8 = vpop.f32.mrf.mxu1 }
 0x411   : > { %v1596_v41 = vrot.slane %v1549_v23, 4  ;;  %v1597_v21 = vrot.slane %v1562_v8, 4 }
 0x413   : > { %v1604_v22 = vadd.f32 %v1596_v41, %v3615_v37  ;;  %v1605_v50 = vadd.f32 %v1597_v21, %v3617_v15 }
 0x415   : > { %v2750_v4 = vmul.f32 -1.442695, %v1604_v22  ;;  %v2751_v43 = vmul.f32 -1.442695, %v1605_v50 }
 0x417   : > { %2966 = vpow2.f32 %v2750_v4  ;;  %v1575_v45 = vpop.f32.mrf.mxu2  ;;  %v1588_v6 = vpop.f32.mrf.mxu3 }
 0x418   : > { %2968 = vpow2.f32 %v2751_v43  ;;  %v1599_v9 = vrot.slane %v1588_v6, 4  ;;  %v1551_v29 = vpop.f32.mrf.mxu0  ;;  %v1564_v51 = vpop.f32.mrf.mxu1  ;;  %v1598_v15 = vrot.slane %v1575_v45, 4 }
 0x419   : > { %v1667_v29 = vrot.slane %v3739_v24, 4 }
 0x41a   : > { %v1607_v34 = vadd.f32 %v1599_v9, %v3956_v57  ;;  %v1606_v11 = vadd.f32 %v1598_v15, %v3957_v5 }
 0x41c   : > { %v2752_v63 = vmul.f32 -1.442695, %v1607_v34 }
 0x41d   : > { %v2967_v44 = vpop.eup %2966 }
 0x41e   : > { %v2969_v16 = vpop.eup %2968  ;;  %v1611_v32 = vadd.f32 1.0, %v2967_v44  ;;  %2970 = vpow2.f32 %v2752_v63 }
 0x41f   : > { %v1630_v2 = vadd.f32 1.0, %v2969_v16  ;;  %v1577_v37 = vpop.f32.mrf.mxu2  ;;  %v1590_v42 = vpop.f32.mrf.mxu3 }
 0x420   : > { %2972 = vrcp.f32 %v1611_v32  ;;  %v1623_v8 = vand.u32 2147483648, %v1611_v32  ;;  %v1621_v22 = vand.u32 2147483647, %v1611_v32  ;;  %vm1617_vm10 = vweird.f32 %v1611_v32 }
 0x421   : > { %2974 = vrcp.f32 %v1630_v2  ;;  %v1642_v41 = vand.u32 2147483648, %v1630_v2  ;;  %v1640_v4 = vand.u32 2147483647, %v1630_v2  ;;  %vm1636_vm11 = vweird.f32 %v1630_v2 }
 0x422   : > { %v1624_v5 = vor.u32 1.1754944e-38, %v1623_v8  ;;  %vm1622_vm14 = vcmp.eq.f32.partialorder %v1621_v22, 8.507059e+37 }
 0x423   : > { %v1643_v51 = vor.u32 1.1754944e-38, %v1642_v41  ;;  %vm1641_vm15 = vcmp.eq.f32.partialorder %v1640_v4, 8.507059e+37 }
 0x424   : > { %v2971_v31 = vpop.eup %2970 }
 0x425   : > { %v1650_v10 = vadd.f32 1.0, %v2971_v31 }
 0x426   : > { %v2973_v19 = vpop.eup %2972 }
 0x427   : > { %v2975_v18 = vpop.eup %2974  ;;  %v1613_v35 = vmul.f32 %v2973_v19, %v1611_v32  ;;  %2976 = vrcp.f32 %v1650_v10  ;;  %vm1618_vm8 = vweird.f32 %v2973_v19  ;;  %v1662_v24 = vand.u32 2147483648, %v1650_v10 }
 0x428   : > { %v1632_v57 = vmul.f32 %v2975_v18, %v1630_v2  ;;  %2978 = vtanh.f32 %v1606_v11  ;;  %vm1637_vm9 = vweird.f32 %v2975_v18  ;;  %vm1619_vm12 = vmor %vm1617_vm10, %vm1618_vm8  ;;  %vm1656_vm1 = vweird.f32 %v1650_v10 }
 0x429   : > { %v1614_v60 = vsub.f32 1.0, %v1613_v35  ;;  %vm1638_vm13 = vmor %vm1636_vm11, %vm1637_vm9  ;;  %v1660_v35 = vand.u32 2147483647, %v1650_v10 }
 0x42a   : > { %v1633_v23 = vsub.f32 1.0, %v1632_v57  ;;  %v1663_v57 = vor.u32 1.1754944e-38, %v1662_v24 }
 0x42b   : > { %v1615_v21 = vmul.f32 %v2973_v19, %v1614_v60  ;;  %vm1661_vm3 = vcmp.eq.f32.partialorder %v1660_v35, 8.507059e+37 }
 0x42c   : > { %v1634_v50 = vmul.f32 %v2975_v18, %v1633_v23 }
 0x42d   : > { %v2977_v43 = vpop.eup %2976  ;;  %v1616_v45 = vadd.f32 %v2973_v19, %v1615_v21 }
 0x42e   : > { %v1635_v6 = vadd.f32 %v2975_v18, %v1634_v50  ;;  %v1652_v9 = vmul.f32 %v2977_v43, %v1650_v10  ;;  %v2979_v63 = vpop.eup %2978  ;;  %vm1657_vm0 = vweird.f32 %v2977_v43 }
 0x42f   : > { %v1620_v34 = vsel %vm1619_vm12, %v2973_v19, %v1616_v45  ;;  %vm1658_vm2 = vmor %vm1656_vm1, %vm1657_vm0  ;;  %v3958_v45 = vld [vmem:[#allocation13_spill] sm:$0xff] }
 0x430   : > { %v1625_v44 = vsel %vm1622_vm14, %v1624_v5, %v1620_v34  ;;  %v1639_v16 = vsel %vm1638_vm13, %v2975_v18, %v1635_v6  ;;  %v1653_v37 = vsub.f32 1.0, %v1652_v9  ;;  %v3959_v6 = vld [vmem:[#allocation14_spill] sm:$0xff] }
 0x431   : > { %v1644_v42 = vsel %vm1641_vm15, %v1643_v51, %v1639_v16  ;;  %v1670_v15 = vmul.f32 %v2979_v63, %v1625_v44  ;;  %v3960_v44 = vld [vmem:[#allocation16_spill] sm:$0xff] }
 0x432   : > { %v1669_v31 = vmul.f32 %v1667_v29, %v1644_v42  ;;  %v1654_v32 = vmul.f32 %v2977_v43, %v1653_v37 }
 0x434   : > { %v3783_v2 = vadd.f32 %v1670_v15, %v1669_v31  ;;  %v1655_v11 = vadd.f32 %v2977_v43, %v1654_v32 }
 0x436   : > { %2980 = vtanh.f32 %v3783_v2  ;;  %v1659_v19 = vsel %vm1658_vm2, %v2977_v43, %v1655_v11 }
 0x437   : > { %v1664_v60 = vsel %vm1661_vm3, %v1663_v57, %v1659_v19 }
 0x43c   : > { %v2981_v18 = vpop.eup %2980 }
 0x43d   : > { %v1673_v23 = vmul.f32 %v2981_v18, %v1664_v60 }
 0x43f   : > { %1675 = vst [vmem:[#allocation1] sm:$0xff] %v1673_v23  ;;  %v1692_v8 = vpack.c.bf16 %v1673_v23, %v1673_v23  ;;  %v3961_v23 = vld [vmem:[#allocation15_spill] sm:$0xff] }
 0x441   : > { %v1694_v41 = vrot.slane %v1692_v8, 2 }
 0x443   : > { %1704 = vmatmul.bf16.vlgmr.msrb.gmra.mxu0 %v1694_v41  ;;  %1717 = vmatmul.bf16.vlgmr.msrb.gmra.mxu1 %v1694_v41 }
 0x444   : > { %1730 = vmatmul.bf16.vlgmr.msrb.gmra.mxu2 %v1694_v41  ;;  %1743 = vmatmul.bf16.vlgmr.msrb.gmra.mxu3 %v1694_v41 }
 0x445   : > { %1986 = vmatpush.bf16.msrb.mxu0 %v3451_v17  ;;  %1999 = vmatpush.bf16.msrb.mxu1 %v3453_v20 }
 0x446   : > { %v1677_v10 = vld [vmem:[#allocation1 + $0x4] ss:$9 sm:$0xff]  ;;  %v1681_v22 = vld [vmem:[#allocation1 + $0x6] ss:$9 sm:$0xff]  ;;  %2012 = vmatpush.bf16.msrb.mxu2 %v3455_v26  ;;  %2025 = vmatpush.bf16.msrb.mxu3 %v3458_v27 }
 0x447   : > { %v1679_v21 = vld [vmem:[#allocation1 + $0x5] ss:$9 sm:$0xff]  ;;  %v1683_v50 = vld [vmem:[#allocation1 + $0x7] ss:$9 sm:$0xff]  ;;  %1688 = vst [vmem:[%s3249_s18 + $0x3] sm:$0x1] %v1677_v10 }
 0x448   : > { %1689 = vst [vmem:[%s3249_s18 + $0xb] sm:$0x1] %v1679_v21 }
 0x449   : > { %1690 = vst [vmem:[%s3249_s18 + $0x13] sm:$0x1] %v1681_v22  ;;  %1987 = vmatpush.bf16.msrb.mxu0 %v3460_v59  ;;  %2000 = vmatpush.bf16.msrb.mxu1 %v3463_v30 }
 0x44a   : > { %1691 = vst [vmem:[%s3249_s18 + $0x1b] sm:$0x1] %v1683_v50  ;;  %2013 = vmatpush.bf16.msrb.mxu2 %v3466_v36  ;;  %2026 = vmatpush.bf16.msrb.mxu3 %v3470_v38 }
 0x44d   : > { %1988 = vmatpush.bf16.msrb.mxu0 %v3472_v39  ;;  %2001 = vmatpush.bf16.msrb.mxu1 %v3475_v46 }
 0x44e   : > { %2014 = vmatpush.bf16.msrb.mxu2 %v3478_v52  ;;  %2027 = vmatpush.bf16.msrb.mxu3 %v3482_v53 }
 0x451   : > { %1989 = vmatpush.bf16.msrb.mxu0 %v3484_v54  ;;  %2002 = vmatpush.bf16.msrb.mxu1 %v3487_v58 }
 0x452   : > { %2015 = vmatpush.bf16.msrb.mxu2 %v3490_v0  ;;  %2028 = vmatpush.bf16.msrb.mxu3 %v3495_v1 }
 0x455   : > { %1990 = vmatpush.bf16.msrb.mxu0 %v3497_v3  ;;  %2003 = vmatpush.bf16.msrb.mxu1 %v3500_v7 }
 0x456   : > { %2016 = vmatpush.bf16.msrb.mxu2 %v3503_v12  ;;  %2029 = vmatpush.bf16.msrb.mxu3 %v3507_v13 }
 0x459   : > { %1991 = vmatpush.bf16.msrb.mxu0 %v3509_v14  ;;  %2004 = vmatpush.bf16.msrb.mxu1 %v3512_v55 }
 0x45a   : > { %2017 = vmatpush.bf16.msrb.mxu2 %v3515_v40  ;;  %2030 = vmatpush.bf16.msrb.mxu3 %v3519_v25 }
 0x45d   : > { %1992 = vmatpush.bf16.msrb.mxu0 %v3521_v28  ;;  %2005 = vmatpush.bf16.msrb.mxu1 %v3524_v33 }
 0x45e   : > { %2018 = vmatpush.bf16.msrb.mxu2 %v3527_v47  ;;  %2031 = vmatpush.bf16.msrb.mxu3 %v3531_v48 }
 0x461   : > { %1993 = vmatpush.bf16.msrb.mxu0 %v3533_v49  ;;  %2006 = vmatpush.bf16.msrb.mxu1 %v3536_v56 }
 0x462   : > { %2019 = vmatpush.bf16.msrb.mxu2 %v3539_v61  ;;  %2032 = vmatpush.bf16.msrb.mxu3 %v3543_v62 }
 0x4c0   : > { %v1705_v4 = vpop.f32.mrf.mxu0  ;;  %v1718_v43 = vpop.f32.mrf.mxu1 }
 0x4c1   : > { %v1748_v5 = vadd.f32 %v1705_v4, %v3958_v45  ;;  %v1749_v9 = vadd.f32 %v1718_v43, %v3959_v6 }
 0x4c3   : > { %v2753_v29 = vmul.f32 -1.442695, %v1748_v5  ;;  %v2754_v51 = vmul.f32 -1.442695, %v1749_v9 }
 0x4c5   : > { %2982 = vpow2.f32 %v2753_v29 }
 0x4c6   : > { %2984 = vpow2.f32 %v2754_v51 }
 0x4c7   : > { %v1731_v34 = vpop.f32.mrf.mxu2  ;;  %v1744_v63 = vpop.f32.mrf.mxu3 }
 0x4c8   : > { %v1751_v16 = vadd.f32 %v1744_v63, %v3960_v44  ;;  %v1707_v37 = vpop.f32.mrf.mxu0  ;;  %v1720_v42 = vpop.f32.mrf.mxu1  ;;  %v1750_v8 = vadd.f32 %v1731_v34, %v3961_v23 }
 0x4ca   : > { %v2755_v15 = vmul.f32 -1.442695, %v1751_v16 }
 0x4cb   : > { %v2983_v31 = vpop.eup %2982 }
 0x4cc   : > { %v2985_v32 = vpop.eup %2984  ;;  %v1755_v11 = vadd.f32 1.0, %v2983_v31  ;;  %2986 = vpow2.f32 %v2755_v15 }
 0x4cd   : > { %v1774_v24 = vadd.f32 1.0, %v2985_v32  ;;  %v1811_v32 = vrot.slane %v3783_v2, 4 }
 0x4ce   : > { %2988 = vrcp.f32 %v1755_v11  ;;  %v1767_v4 = vand.u32 2147483648, %v1755_v11  ;;  %v1765_v9 = vand.u32 2147483647, %v1755_v11  ;;  %vm1761_vm6 = vweird.f32 %v1755_v11 }
 0x4cf   : > { %2990 = vrcp.f32 %v1774_v24  ;;  %v1733_v35 = vpop.f32.mrf.mxu2  ;;  %v1746_v19 = vpop.f32.mrf.mxu3  ;;  %v1786_v43 = vand.u32 2147483648, %v1774_v24  ;;  %v1784_v51 = vand.u32 2147483647, %v1774_v24  ;;  %vm1780_vm7 = vweird.f32 %v1774_v24 }
 0x4d0   : > { %v1768_v34 = vor.u32 1.1754944e-38, %v1767_v4  ;;  %vm1766_vm10 = vcmp.eq.f32.partialorder %v1765_v9, 8.507059e+37 }
 0x4d1   : > { %v1787_v15 = vor.u32 1.1754944e-38, %v1786_v43  ;;  %vm1785_vm11 = vcmp.eq.f32.partialorder %v1784_v51, 8.507059e+37 }
 0x4d2   : > { %v2987_v57 = vpop.eup %2986 }
 0x4d3   : > { %v1794_v18 = vadd.f32 1.0, %v2987_v57 }
 0x4d4   : > { %v2989_v60 = vpop.eup %2988 }
 0x4d5   : > { %v2991_v41 = vpop.eup %2990  ;;  %v1757_v10 = vmul.f32 %v2989_v60, %v1755_v11  ;;  %2992 = vrcp.f32 %v1794_v18  ;;  %vm1762_vm4 = vweird.f32 %v2989_v60  ;;  %vm1800_vm13 = vweird.f32 %v1794_v18 }
 0x4d6   : > { %v1776_v21 = vmul.f32 %v2991_v41, %v1774_v24  ;;  %2994 = vtanh.f32 %v1750_v8  ;;  %vm1781_vm5 = vweird.f32 %v2991_v41  ;;  %vm1763_vm8 = vmor %vm1761_vm6, %vm1762_vm4  ;;  %v1804_v2 = vand.u32 2147483647, %v1794_v18 }
 0x4d7   : > { %v1758_v22 = vsub.f32 1.0, %v1757_v10  ;;  %vm1782_vm9 = vmor %vm1780_vm7, %vm1781_vm5 }
 0x4d8   : > { %v1777_v50 = vsub.f32 1.0, %v1776_v21  ;;  %vm1805_vm15 = vcmp.eq.f32.partialorder %v1804_v2, 8.507059e+37 }
 0x4d9   : > { %v1759_v5 = vmul.f32 %v2989_v60, %v1758_v22 }
 0x4da   : > { %v1778_v29 = vmul.f32 %v2991_v41, %v1777_v50 }
 0x4db   : > { %v2993_v63 = vpop.eup %2992  ;;  %v1760_v16 = vadd.f32 %v2989_v60, %v1759_v5 }
 0x4dc   : > { %v1779_v37 = vadd.f32 %v2991_v41, %v1778_v29  ;;  %v1796_v42 = vmul.f32 %v2993_v63, %v1794_v18  ;;  %v2995_v35 = vpop.eup %2994  ;;  %vm1801_vm12 = vweird.f32 %v2993_v63 }
 0x4dd   : > { %v1764_v31 = vsel %vm1763_vm8, %v2989_v60, %v1760_v16  ;;  %v1806_v60 = vand.u32 2147483648, %v1794_v18  ;;  %vm1802_vm14 = vmor %vm1800_vm13, %vm1801_vm12 }
 0x4de   : > { %v1769_v19 = vsel %vm1766_vm10, %v1768_v34, %v1764_v31  ;;  %v1783_v57 = vsel %vm1782_vm9, %v2991_v41, %v1779_v37  ;;  %v1797_v8 = vsub.f32 1.0, %v1796_v42 }
 0x4df   : > { %v1788_v10 = vsel %vm1785_vm11, %v1787_v15, %v1783_v57  ;;  %v1814_v21 = vmul.f32 %v2995_v35, %v1769_v19  ;;  %v1807_v4 = vor.u32 1.1754944e-38, %v1806_v60 }
 0x4e0   : > { %v1813_v22 = vmul.f32 %v1811_v32, %v1788_v10  ;;  %v1798_v11 = vmul.f32 %v2993_v63, %v1797_v8 }
 0x4e2   : > { %v3827_v24 = vadd.f32 %v1814_v21, %v1813_v22  ;;  %v1799_v50 = vadd.f32 %v2993_v63, %v1798_v11 }
 0x4e4   : > { %2996 = vtanh.f32 %v3827_v24  ;;  %v1803_v41 = vsel %vm1802_vm14, %v2993_v63, %v1799_v50  ;;  %v1957_v32 = vrot.slane %v3827_v24, 4 }
 0x4e5   : > { %v1808_v5 = vsel %vm1805_vm15, %v1807_v4, %v1803_v41 }
 0x4ea   : > { %v2997_v43 = vpop.eup %2996 }
 0x4eb   : > { %v1817_v9 = vmul.f32 %v2997_v43, %v1808_v5 }
 0x4ed   : > { %v1819_v29 = vrot.slane %v1817_v9, 1  ;;  %v1820_v51 = vrot.slane %v1817_v9, 2  ;;  %v1821_v16 = vrot.slane %v1817_v9, 3  ;;  %1825 = vst [vmem:[%s3249_s18 + $0x4] sm:$0x1] %v1817_v9  ;;  %v1829_v34 = vpack.c.bf16 %v1817_v9, %v1817_v9 }
 0x4ef   : > { %1826 = vst [vmem:[%s3249_s18 + $0xc] sm:$0x1] %v1819_v29  ;;  %1838 = vmatmul.bf16.vlgmr.msra.gmra.mxu0 %v1829_v34  ;;  %1851 = vmatmul.bf16.vlgmr.msra.gmra.mxu1 %v1829_v34 }
 0x4f0   : > { %1827 = vst [vmem:[%s3249_s18 + $0x14] sm:$0x1] %v1820_v51  ;;  %1864 = vmatmul.bf16.vlgmr.msra.gmra.mxu2 %v1829_v34  ;;  %1877 = vmatmul.bf16.vlgmr.msra.gmra.mxu3 %v1829_v34 }
 0x4f1   : > { %1828 = vst [vmem:[%s3249_s18 + $0x1c] sm:$0x1] %v1821_v16  ;;  %2120 = vmatpush.bf16.msra.mxu0 %v3451_v17  ;;  %2133 = vmatpush.bf16.msra.mxu1 %v3453_v20 }
 0x4f2   : > { %2146 = vmatpush.bf16.msra.mxu2 %v3455_v26  ;;  %2159 = vmatpush.bf16.msra.mxu3 %v3458_v27 }
 0x4f5   : > { %2121 = vmatpush.bf16.msra.mxu0 %v3460_v59  ;;  %2134 = vmatpush.bf16.msra.mxu1 %v3463_v30 }
 0x4f6   : > { %2147 = vmatpush.bf16.msra.mxu2 %v3466_v36  ;;  %2160 = vmatpush.bf16.msra.mxu3 %v3470_v38 }
 0x4f9   : > { %2122 = vmatpush.bf16.msra.mxu0 %v3472_v39  ;;  %2135 = vmatpush.bf16.msra.mxu1 %v3475_v46 }
 0x4fa   : > { %2148 = vmatpush.bf16.msra.mxu2 %v3478_v52  ;;  %2161 = vmatpush.bf16.msra.mxu3 %v3482_v53 }
 0x4fd   : > { %2123 = vmatpush.bf16.msra.mxu0 %v3484_v54  ;;  %2136 = vmatpush.bf16.msra.mxu1 %v3487_v58 }
 0x4fe   : > { %2149 = vmatpush.bf16.msra.mxu2 %v3490_v0  ;;  %2162 = vmatpush.bf16.msra.mxu3 %v3495_v1 }
 0x501   : > { %2124 = vmatpush.bf16.msra.mxu0 %v3497_v3  ;;  %2137 = vmatpush.bf16.msra.mxu1 %v3500_v7 }
 0x502   : > { %2150 = vmatpush.bf16.msra.mxu2 %v3503_v12  ;;  %2163 = vmatpush.bf16.msra.mxu3 %v3507_v13 }
 0x505   : > { %2125 = vmatpush.bf16.msra.mxu0 %v3509_v14  ;;  %2138 = vmatpush.bf16.msra.mxu1 %v3512_v55 }
 0x506   : > { %2151 = vmatpush.bf16.msra.mxu2 %v3515_v40  ;;  %2164 = vmatpush.bf16.msra.mxu3 %v3519_v25 }
 0x509   : > { %2126 = vmatpush.bf16.msra.mxu0 %v3521_v28  ;;  %2139 = vmatpush.bf16.msra.mxu1 %v3524_v33 }
 0x50a   : > { %2152 = vmatpush.bf16.msra.mxu2 %v3527_v47  ;;  %2165 = vmatpush.bf16.msra.mxu3 %v3531_v48 }
 0x50d   : > { %2127 = vmatpush.bf16.msra.mxu0 %v3533_v49  ;;  %2140 = vmatpush.bf16.msra.mxu1 %v3536_v56 }
 0x50e   : > { %2153 = vmatpush.bf16.msra.mxu2 %v3539_v61  ;;  %2166 = vmatpush.bf16.msra.mxu3 %v3543_v62 }
 0x56c   : > { %v1839_v17 = vpop.f32.mrf.mxu0  ;;  %v1852_v20 = vpop.f32.mrf.mxu1 }
 0x56d   : > { %v1886_v26 = vrot.slane %v1839_v17, 4  ;;  %v1887_v27 = vrot.slane %v1852_v20, 4 }
 0x56f   : > { %v1894_v59 = vadd.f32 %v1886_v26, %v3958_v45  ;;  %v1895_v30 = vadd.f32 %v1887_v27, %v3959_v6 }
 0x571   : > { %v2756_v36 = vmul.f32 -1.442695, %v1894_v59  ;;  %v2757_v38 = vmul.f32 -1.442695, %v1895_v30 }
 0x573   : > { %2998 = vpow2.f32 %v2756_v36  ;;  %v1865_v39 = vpop.f32.mrf.mxu2  ;;  %v1878_v46 = vpop.f32.mrf.mxu3  ;;  %v3962_v36 = vld [vmem:[#allocation17_spill] sm:$0xff] }
 0x574   : > { %3000 = vpow2.f32 %v2757_v38  ;;  %v1889_v52 = vrot.slane %v1878_v46, 4  ;;  %v1841_v53 = vpop.f32.mrf.mxu0  ;;  %v1854_v54 = vpop.f32.mrf.mxu1  ;;  %v1888_v55 = vrot.slane %v1865_v39, 4  ;;  %v3963_v39 = vld [vmem:[#allocation18_spill] sm:$0xff] }
 0x576   : > { %v1897_v58 = vadd.f32 %v1889_v52, %v3960_v44  ;;  %v1896_v33 = vadd.f32 %v1888_v55, %v3961_v23 }
 0x578   : > { %v2758_v0 = vmul.f32 -1.442695, %v1897_v58 }
 0x579   : > { %v2999_v1 = vpop.eup %2998 }
 0x57a   : > { %v3001_v3 = vpop.eup %3000  ;;  %v1901_v7 = vadd.f32 1.0, %v2999_v1  ;;  %3002 = vpow2.f32 %v2758_v0  ;;  %v3964_v0 = vld [vmem:[#allocation20_spill] sm:$0xff] }
 0x57b   : > { %v1920_v12 = vadd.f32 1.0, %v3001_v3  ;;  %v1867_v13 = vpop.f32.mrf.mxu2  ;;  %v1880_v14 = vpop.f32.mrf.mxu3 }
 0x57c   : > { %3004 = vrcp.f32 %v1901_v7  ;;  %v1913_v62 = vand.u32 2147483648, %v1901_v7  ;;  %v1911_v44 = vand.u32 2147483647, %v1901_v7  ;;  %vm1907_vm2 = vweird.f32 %v1901_v7 }
 0x57d   : > { %3006 = vrcp.f32 %v1920_v12  ;;  %v1932_v45 = vand.u32 2147483648, %v1920_v12  ;;  %v1930_v63 = vand.u32 2147483647, %v1920_v12  ;;  %vm1926_vm3 = vweird.f32 %v1920_v12 }
 0x57e   : > { %v1914_v23 = vor.u32 1.1754944e-38, %v1913_v62  ;;  %vm1912_vm6 = vcmp.eq.f32.partialorder %v1911_v44, 8.507059e+37 }
 0x57f   : > { %v1933_v35 = vor.u32 1.1754944e-38, %v1932_v45  ;;  %vm1931_vm7 = vcmp.eq.f32.partialorder %v1930_v63, 8.507059e+37 }
 0x580   : > { %v3003_v40 = vpop.eup %3002 }
 0x581   : > { %v1940_v25 = vadd.f32 1.0, %v3003_v40 }
 0x582   : > { %v3005_v28 = vpop.eup %3004 }
 0x583   : > { %v3007_v47 = vpop.eup %3006  ;;  %v1903_v48 = vmul.f32 %v3005_v28, %v1901_v7  ;;  %3008 = vrcp.f32 %v1940_v25  ;;  %vm1908_vm0 = vweird.f32 %v3005_v28  ;;  %v1952_v24 = vand.u32 2147483648, %v1940_v25 }
 0x584   : > { %v1922_v49 = vmul.f32 %v3007_v47, %v1920_v12  ;;  %3010 = vtanh.f32 %v1896_v33  ;;  %vm1927_vm1 = vweird.f32 %v3007_v47  ;;  %vm1909_vm4 = vmor %vm1907_vm2, %vm1908_vm0  ;;  %vm1946_vm9 = vweird.f32 %v1940_v25 }
 0x585   : > { %v1904_v56 = vsub.f32 1.0, %v1903_v48  ;;  %vm1928_vm5 = vmor %vm1926_vm3, %vm1927_vm1  ;;  %v1950_v4 = vand.u32 2147483647, %v1940_v25  ;;  %v1953_v5 = vor.u32 1.1754944e-38, %v1952_v24 }
 0x586   : > { %v1923_v61 = vsub.f32 1.0, %v1922_v49  ;;  %v3965_v49 = vld [vmem:[#allocation19_spill] sm:$0xff] }
 0x587   : > { %v1905_v6 = vmul.f32 %v3005_v28, %v1904_v56  ;;  %vm1951_vm11 = vcmp.eq.f32.partialorder %v1950_v4, 8.507059e+37 }
 0x588   : > { %v1924_v18 = vmul.f32 %v3007_v47, %v1923_v61 }
 0x589   : > { %v3009_v37 = vpop.eup %3008  ;;  %v1906_v42 = vadd.f32 %v3005_v28, %v1905_v6 }
 0x58a   : > { %v1925_v15 = vadd.f32 %v3007_v47, %v1924_v18  ;;  %v1942_v31 = vmul.f32 %v3009_v37, %v1940_v25  ;;  %v3011_v57 = vpop.eup %3010  ;;  %vm1947_vm8 = vweird.f32 %v3009_v37 }
 0x58b   : > { %v1910_v19 = vsel %vm1909_vm4, %v3005_v28, %v1906_v42  ;;  %vm1948_vm10 = vmor %vm1946_vm9, %vm1947_vm8 }
 0x58c   : > { %v1915_v8 = vsel %vm1912_vm6, %v1914_v23, %v1910_v19  ;;  %v1929_v10 = vsel %vm1928_vm5, %v3007_v47, %v1925_v15  ;;  %v1943_v21 = vsub.f32 1.0, %v1942_v31 }
 0x58d   : > { %v1934_v22 = vsel %vm1931_vm7, %v1933_v35, %v1929_v10  ;;  %v1960_v11 = vmul.f32 %v3011_v57, %v1915_v8 }
 0x58e   : > { %v1959_v50 = vmul.f32 %v1957_v32, %v1934_v22  ;;  %v1944_v60 = vmul.f32 %v3009_v37, %v1943_v21 }
 0x590   : > { %v3871_v2 = vadd.f32 %v1960_v11, %v1959_v50  ;;  %v1945_v41 = vadd.f32 %v3009_v37, %v1944_v60 }
 0x592   : > { %3012 = vtanh.f32 %v3871_v2  ;;  %v1949_v43 = vsel %vm1948_vm10, %v3009_v37, %v1945_v41  ;;  %v2101_v21 = vrot.slane %v3871_v2, 4 }
 0x593   : > { %v1954_v29 = vsel %vm1951_vm11, %v1953_v5, %v1949_v43 }
 0x598   : > { %v3013_v9 = vpop.eup %3012 }
 0x599   : > { %v1963_v51 = vmul.f32 %v3013_v9, %v1954_v29 }
 0x59b   : > { %1965 = vst [vmem:[#allocation1] sm:$0xff] %v1963_v51  ;;  %v1982_v16 = vpack.c.bf16 %v1963_v51, %v1963_v51 }
 0x59d   : > { %v1984_v34 = vrot.slane %v1982_v16, 2 }
 0x59f   : > { %1994 = vmatmul.bf16.vlgmr.msrb.gmra.mxu0 %v1984_v34  ;;  %2007 = vmatmul.bf16.vlgmr.msrb.gmra.mxu1 %v1984_v34 }
 0x5a0   : > { %2020 = vmatmul.bf16.vlgmr.msrb.gmra.mxu2 %v1984_v34  ;;  %2033 = vmatmul.bf16.vlgmr.msrb.gmra.mxu3 %v1984_v34 }
 0x5a2   : > { %v1967_v17 = vld [vmem:[#allocation1 + $0x4] ss:$9 sm:$0xff]  ;;  %v1971_v26 = vld [vmem:[#allocation1 + $0x6] ss:$9 sm:$0xff] }
 0x5a3   : > { %v1969_v20 = vld [vmem:[#allocation1 + $0x5] ss:$9 sm:$0xff]  ;;  %v1973_v27 = vld [vmem:[#allocation1 + $0x7] ss:$9 sm:$0xff]  ;;  %1978 = vst [vmem:[%s3249_s18 + $0x5] sm:$0x1] %v1967_v17 }
 0x5a4   : > { %1979 = vst [vmem:[%s3249_s18 + $0xd] sm:$0x1] %v1969_v20 }
 0x5a5   : > { %1980 = vst [vmem:[%s3249_s18 + $0x15] sm:$0x1] %v1971_v26 }
 0x5a6   : > { %1981 = vst [vmem:[%s3249_s18 + $0x1d] sm:$0x1] %v1973_v27 }
 0x61c   : > { %v1995_v59 = vpop.f32.mrf.mxu0  ;;  %v2008_v30 = vpop.f32.mrf.mxu1 }
 0x61d   : > { %v2038_v38 = vadd.f32 %v1995_v59, %v3962_v36  ;;  %v2039_v46 = vadd.f32 %v2008_v30, %v3963_v39 }
 0x61f   : > { %v2759_v52 = vmul.f32 -1.442695, %v2038_v38  ;;  %v2760_v53 = vmul.f32 -1.442695, %v2039_v46 }
 0x621   : > { %3014 = vpow2.f32 %v2759_v52 }
 0x622   : > { %3016 = vpow2.f32 %v2760_v53 }
 0x623   : > { %v2021_v54 = vpop.f32.mrf.mxu2  ;;  %v2034_v58 = vpop.f32.mrf.mxu3 }
 0x624   : > { %v2041_v1 = vadd.f32 %v2034_v58, %v3964_v0  ;;  %v1997_v3 = vpop.f32.mrf.mxu0  ;;  %v2010_v7 = vpop.f32.mrf.mxu1  ;;  %v2040_v56 = vadd.f32 %v2021_v54, %v3965_v49 }
 0x626   : > { %v2761_v12 = vmul.f32 -1.442695, %v2041_v1 }
 0x627   : > { %v3015_v13 = vpop.eup %3014 }
 0x628   : > { %v3017_v14 = vpop.eup %3016  ;;  %v2045_v55 = vadd.f32 1.0, %v3015_v13  ;;  %3018 = vpow2.f32 %v2761_v12 }
 0x629   : > { %v2064_v40 = vadd.f32 1.0, %v3017_v14 }
 0x62a   : > { %3020 = vrcp.f32 %v2045_v55  ;;  %v2057_v18 = vand.u32 2147483648, %v2045_v55  ;;  %v2055_v42 = vand.u32 2147483647, %v2045_v55  ;;  %vm2051_vm14 = vweird.f32 %v2045_v55 }
 0x62b   : > { %3022 = vrcp.f32 %v2064_v40  ;;  %v2023_v25 = vpop.f32.mrf.mxu2  ;;  %v2036_v28 = vpop.f32.mrf.mxu3  ;;  %v2076_v63 = vand.u32 2147483648, %v2064_v40  ;;  %v2074_v15 = vand.u32 2147483647, %v2064_v40  ;;  %vm2070_vm15 = vweird.f32 %v2064_v40 }
 0x62c   : > { %v2058_v35 = vor.u32 1.1754944e-38, %v2057_v18  ;;  %vm2056_vm2 = vcmp.eq.f32.partialorder %v2055_v42, 8.507059e+37 }
 0x62d   : > { %v2077_v8 = vor.u32 1.1754944e-38, %v2076_v63  ;;  %vm2075_vm3 = vcmp.eq.f32.partialorder %v2074_v15, 8.507059e+37 }
 0x62e   : > { %v3019_v33 = vpop.eup %3018 }
 0x62f   : > { %v2084_v47 = vadd.f32 1.0, %v3019_v33 }
 0x630   : > { %v3021_v48 = vpop.eup %3020 }
 0x631   : > { %v3023_v61 = vpop.eup %3022  ;;  %v2047_v62 = vmul.f32 %v3021_v48, %v2045_v55  ;;  %3024 = vrcp.f32 %v2084_v47  ;;  %vm2052_vm12 = vweird.f32 %v3021_v48  ;;  %v2096_v29 = vand.u32 2147483648, %v2084_v47 }
 0x632   : > { %v2066_v45 = vmul.f32 %v3023_v61, %v2064_v40  ;;  %3026 = vtanh.f32 %v2040_v56  ;;  %vm2071_vm13 = vweird.f32 %v3023_v61  ;;  %vm2053_vm0 = vmor %vm2051_vm14, %vm2052_vm12  ;;  %vm2090_vm5 = vweird.f32 %v2084_v47 }
 0x633   : > { %v2048_v6 = vsub.f32 1.0, %v2047_v62  ;;  %vm2072_vm1 = vmor %vm2070_vm15, %vm2071_vm13  ;;  %v2094_v2 = vand.u32 2147483647, %v2084_v47  ;;  %v2097_v16 = vor.u32 1.1754944e-38, %v2096_v29 }
 0x634   : > { %v2067_v44 = vsub.f32 1.0, %v2066_v45 }
 0x635   : > { %v2049_v37 = vmul.f32 %v3021_v48, %v2048_v6  ;;  %vm2095_vm7 = vcmp.eq.f32.partialorder %v2094_v2, 8.507059e+37 }
 0x636   : > { %v2068_v23 = vmul.f32 %v3023_v61, %v2067_v44 }
 0x637   : > { %v3025_v31 = vpop.eup %3024  ;;  %v2050_v32 = vadd.f32 %v3021_v48, %v2049_v37 }
 0x638   : > { %v2069_v19 = vadd.f32 %v3023_v61, %v2068_v23  ;;  %v2086_v57 = vmul.f32 %v3025_v31, %v2084_v47  ;;  %v3027_v22 = vpop.eup %3026  ;;  %vm2091_vm4 = vweird.f32 %v3025_v31 }
 0x639   : > { %v2054_v10 = vsel %vm2053_vm0, %v3021_v48, %v2050_v32  ;;  %vm2092_vm6 = vmor %vm2090_vm5, %vm2091_vm4 }
 0x63a   : > { %v2059_v11 = vsel %vm2056_vm2, %v2058_v35, %v2054_v10  ;;  %v2073_v50 = vsel %vm2072_vm1, %v3023_v61, %v2069_v19  ;;  %v2087_v60 = vsub.f32 1.0, %v2086_v57 }
 0x63b   : > { %v2078_v41 = vsel %vm2075_vm3, %v2077_v8, %v2073_v50  ;;  %v2104_v24 = vmul.f32 %v3027_v22, %v2059_v11 }
 0x63c   : > { %v2103_v4 = vmul.f32 %v2101_v21, %v2078_v41  ;;  %v2088_v43 = vmul.f32 %v3025_v31, %v2087_v60 }
 0x63e   : > { %v3883_v5 = vadd.f32 %v2104_v24, %v2103_v4  ;;  %v2089_v9 = vadd.f32 %v3025_v31, %v2088_v43 }
 0x640   : > { %3028 = vtanh.f32 %v3883_v5  ;;  %v2093_v51 = vsel %vm2092_vm6, %v3025_v31, %v2089_v9  ;;  %v2247_v21 = vrot.slane %v3883_v5, 4 }
 0x641   : > { %v2098_v17 = vsel %vm2095_vm7, %v2097_v16, %v2093_v51 }
 0x646   : > { %v3029_v34 = vpop.eup %3028 }
 0x647   : > { %v2107_v20 = vmul.f32 %v3029_v34, %v2098_v17 }
 0x649   : > { %v2109_v26 = vrot.slane %v2107_v20, 1  ;;  %v2110_v27 = vrot.slane %v2107_v20, 2  ;;  %v2111_v59 = vrot.slane %v2107_v20, 3  ;;  %2115 = vst [vmem:[%s3249_s18 + $0x6] sm:$0x1] %v2107_v20  ;;  %v2119_v30 = vpack.c.bf16 %v2107_v20, %v2107_v20 }
 0x64b   : > { %2116 = vst [vmem:[%s3249_s18 + $0xe] sm:$0x1] %v2109_v26  ;;  %2128 = vmatmul.bf16.vlgmr.msra.gmra.mxu0 %v2119_v30  ;;  %2141 = vmatmul.bf16.vlgmr.msra.gmra.mxu1 %v2119_v30 }
 0x64c   : > { %2117 = vst [vmem:[%s3249_s18 + $0x16] sm:$0x1] %v2110_v27  ;;  %2154 = vmatmul.bf16.vlgmr.msra.gmra.mxu2 %v2119_v30  ;;  %2167 = vmatmul.bf16.vlgmr.msra.gmra.mxu3 %v2119_v30 }
 0x64d   : > { %2118 = vst [vmem:[%s3249_s18 + $0x1e] sm:$0x1] %v2111_v59 }
 0x6c8   : > { %v2129_v38 = vpop.f32.mrf.mxu0  ;;  %v2142_v46 = vpop.f32.mrf.mxu1 }
 0x6c9   : > { %v2176_v52 = vrot.slane %v2129_v38, 4  ;;  %v2177_v53 = vrot.slane %v2142_v46, 4 }
 0x6cb   : > { %v2184_v54 = vadd.f32 %v2176_v52, %v3962_v36  ;;  %v2185_v58 = vadd.f32 %v2177_v53, %v3963_v39 }
 0x6cd   : > { %v2762_v1 = vmul.f32 -1.442695, %v2184_v54  ;;  %v2763_v3 = vmul.f32 -1.442695, %v2185_v58 }
 0x6cf   : > { %3030 = vpow2.f32 %v2762_v1  ;;  %v2155_v7 = vpop.f32.mrf.mxu2  ;;  %v2168_v12 = vpop.f32.mrf.mxu3 }
 0x6d0   : > { %3032 = vpow2.f32 %v2763_v3  ;;  %v2179_v13 = vrot.slane %v2168_v12, 4  ;;  %v2131_v14 = vpop.f32.mrf.mxu0  ;;  %v2144_v55 = vpop.f32.mrf.mxu1  ;;  %v2178_v39 = vrot.slane %v2155_v7, 4 }
 0x6d2   : > { %v2187_v40 = vadd.f32 %v2179_v13, %v3964_v0  ;;  %v2186_v6 = vadd.f32 %v2178_v39, %v3965_v49 }
 0x6d4   : > { %v2764_v25 = vmul.f32 -1.442695, %v2187_v40 }
 0x6d5   : > { %v3031_v28 = vpop.eup %3030 }
 0x6d6   : > { %v3033_v33 = vpop.eup %3032  ;;  %v2191_v47 = vadd.f32 1.0, %v3031_v28  ;;  %3034 = vpow2.f32 %v2764_v25 }
 0x6d7   : > { %v2210_v48 = vadd.f32 1.0, %v3033_v33  ;;  %v2157_v36 = vpop.f32.mrf.mxu2  ;;  %v2170_v56 = vpop.f32.mrf.mxu3 }
 0x6d8   : > { %3036 = vrcp.f32 %v2191_v47  ;;  %v2203_v42 = vand.u32 2147483648, %v2191_v47  ;;  %v2201_v31 = vand.u32 2147483647, %v2191_v47  ;;  %vm2197_vm10 = vweird.f32 %v2191_v47 }
 0x6d9   : > { %3038 = vrcp.f32 %v2210_v48  ;;  %v2222_v23 = vand.u32 2147483648, %v2210_v48  ;;  %v2220_v35 = vand.u32 2147483647, %v2210_v48  ;;  %vm2216_vm11 = vweird.f32 %v2210_v48 }
 0x6da   : > { %v2204_v49 = vor.u32 1.1754944e-38, %v2203_v42  ;;  %vm2202_vm14 = vcmp.eq.f32.partialorder %v2201_v31, 8.507059e+37 }
 0x6db   : > { %v2223_v22 = vor.u32 1.1754944e-38, %v2222_v23  ;;  %vm2221_vm15 = vcmp.eq.f32.partialorder %v2220_v35, 8.507059e+37 }
 0x6dc   : > { %v3035_v61 = vpop.eup %3034 }
 0x6dd   : > { %v2230_v62 = vadd.f32 1.0, %v3035_v61 }
 0x6de   : > { %v3037_v45 = vpop.eup %3036 }
 0x6df   : > { %v3039_v44 = vpop.eup %3038  ;;  %v2193_v18 = vmul.f32 %v3037_v45, %v2191_v47  ;;  %3040 = vrcp.f32 %v2230_v62  ;;  %vm2198_vm8 = vweird.f32 %v3037_v45  ;;  %v2242_v16 = vand.u32 2147483648, %v2230_v62 }
 0x6e0   : > { %v2212_v0 = vmul.f32 %v3039_v44, %v2210_v48  ;;  %3042 = vtanh.f32 %v2186_v6  ;;  %vm2217_vm9 = vweird.f32 %v3039_v44  ;;  %vm2199_vm12 = vmor %vm2197_vm10, %vm2198_vm8  ;;  %vm2236_vm1 = vweird.f32 %v2230_v62 }
 0x6e1   : > { %v2194_v63 = vsub.f32 1.0, %v2193_v18  ;;  %vm2218_vm13 = vmor %vm2216_vm11, %vm2217_vm9  ;;  %v2240_v5 = vand.u32 2147483647, %v2230_v62  ;;  %v2243_v17 = vor.u32 1.1754944e-38, %v2242_v16 }
 0x6e2   : > { %v2213_v37 = vsub.f32 1.0, %v2212_v0 }
 0x6e3   : > { %v2195_v15 = vmul.f32 %v3037_v45, %v2194_v63  ;;  %vm2241_vm3 = vcmp.eq.f32.partialorder %v2240_v5, 8.507059e+37 }
 0x6e4   : > { %v2214_v32 = vmul.f32 %v3039_v44, %v2213_v37 }
 0x6e5   : > { %v3041_v19 = vpop.eup %3040  ;;  %v2196_v57 = vadd.f32 %v3037_v45, %v2195_v15 }
 0x6e6   : > { %v2215_v8 = vadd.f32 %v3039_v44, %v2214_v32  ;;  %v2232_v10 = vmul.f32 %v3041_v19, %v2230_v62  ;;  %v3043_v50 = vpop.eup %3042  ;;  %vm2237_vm0 = vweird.f32 %v3041_v19 }
 0x6e7   : > { %v2200_v11 = vsel %vm2199_vm12, %v3037_v45, %v2196_v57  ;;  %vm2238_vm2 = vmor %vm2236_vm1, %vm2237_vm0 }
 0x6e8   : > { %v2205_v60 = vsel %vm2202_vm14, %v2204_v49, %v2200_v11  ;;  %v2219_v41 = vsel %vm2218_vm13, %v3039_v44, %v2215_v8  ;;  %v2233_v24 = vsub.f32 1.0, %v2232_v10 }
 0x6e9   : > { %v2224_v4 = vsel %vm2221_vm15, %v2223_v22, %v2219_v41  ;;  %v2250_v43 = vmul.f32 %v3043_v50, %v2205_v60 }
 0x6ea   : > { %v2249_v9 = vmul.f32 %v2247_v21, %v2224_v4  ;;  %v2234_v29 = vmul.f32 %v3041_v19, %v2233_v24 }
 0x6ec   : > { %v2251_v2 = vadd.f32 %v2250_v43, %v2249_v9  ;;  %v2235_v51 = vadd.f32 %v3041_v19, %v2234_v29 }
 0x6ee   : > { %3044 = vtanh.f32 %v2251_v2  ;;  %2273 = vst [vmem:[#allocation3 - $0x4] sm:$0xf0] %v2251_v2  ;;  %v2239_v34 = vsel %vm2238_vm2, %v3041_v19, %v2235_v51 }
 0x6ef   : > { %v2244_v26 = vsel %vm2241_vm3, %v2243_v17, %v2239_v34 }
 0x6f4   : > { %v3045_v20 = vpop.eup %3044 }
 0x6f5   : > { %v2253_v27 = vmul.f32 %v3045_v20, %v2244_v26 }
 0x6f7   : > { %2255 = vst [vmem:[#allocation1] sm:$0xff] %v2253_v27 }
 0x6f8   : > { %2272 = vst [vmem:[#allocation2 - $0x4] sm:$0xf0] %v2253_v27 }
 0x6fe   : > { %v2257_v59 = vld [vmem:[#allocation1 + $0x4] ss:$9 sm:$0xff]  ;;  %v2261_v38 = vld [vmem:[#allocation1 + $0x6] ss:$9 sm:$0xff]  ;;  %2280 = sbr.rel (!%p3212_p4) target bundleno = 1803 (0x70b), region = 68 }
 0x6ff   : > { %v2259_v30 = vld [vmem:[#allocation1 + $0x5] ss:$9 sm:$0xff]  ;;  %v2263_v46 = vld [vmem:[#allocation1 + $0x7] ss:$9 sm:$0xff]  ;;  %2268 = vst [vmem:[%s3249_s18 + $0x7] sm:$0x1] %v2257_v59 }
 0x700   : > { %2269 = vst [vmem:[%s3249_s18 + $0xf] sm:$0x1] %v2259_v30 }
 0x701   : > { %2270 = vst [vmem:[%s3249_s18 + $0x17] sm:$0x1] %v2261_v38 }
 0x702   : > { %2271 = vst [vmem:[%s3249_s18 + $0x1f] sm:$0x1] %v2263_v46 }
 0x706   : > { %v2317_v52 = vld [vmem:[%s3249_s18] sm:$0xff] }
 0x707   : > { %v2319_v53 = vld [vmem:[%s3249_s18 + $0x8] sm:$0xff]  ;;  %2318 = vst [vmem:[%s2282_s20] sm:$0xff] %v2317_v52 }
 0x708   : > { %v2321_v54 = vld [vmem:[%s3249_s18 + $0x10] sm:$0xff]  ;;  %2320 = vst [vmem:[%s2282_s20 + $0x18] sm:$0xff] %v2319_v53 }
 0x709   : > { %v2323_v58 = vld [vmem:[%s3249_s18 + $0x18] sm:$0xff]  ;;  %2322 = vst [vmem:[%s2282_s20 + $0x30] sm:$0xff] %v2321_v54 }
 0x70a   : > { %2324 = vst [vmem:[%s2282_s20 + $0x48] sm:$0xff] %v2323_v58 }
 0x70b PF: > { %p17_p12 = scmp.ge.s32.totalorder %s3202_s9, 5   ;;  %s3966_s27 = smov %s3132_s28 }
 0x70c   : > { %s3967_s28 = smov %s3210_s12  ;;  %s3968_s29 = smov %s3202_s9 }
 0x70d   :  { %19 = sbr.rel (!%p17_p12) target bundleno = 3 (0x3), region = 149 }
 0x712   :  { %2340 = vsyncpa [#allocation5], 1 }
 0x713   :  { %2342 = vsyncpa [#allocation5 + $0x1], 1 }
 0x714   :  { %2343 = vsyncpa [#allocation7], 1 }

</bundles_post_ra>
